<compile_context>
chip_gen: v5e
topology: v5e:2x2
jax: 0.10.0
libtpu: 0.0.40
codegen_flags: <defaults>
</compile_context>

<pallas_src>
import functools
import math

import jax
import jax.numpy as jnp
from jax import lax
from jax.experimental import pallas as pl
from jax.experimental.pallas import tpu as pltpu


def _round_up(v, m):
    return (v + m - 1) // m * m


# ----------------------------- Pallas kernels -----------------------------

def _mm_bias_kernel(a_ref, w_ref, b_ref, o_ref, *, relu):
    # out = relu?(A @ W + bias)   -- conv(+folded BN)(+ReLU) in one shot
    acc = jnp.dot(a_ref[...], w_ref[...], preferred_element_type=jnp.float32)
    acc = acc + b_ref[...]
    if relu:
        acc = jnp.maximum(acc, 0.0)
    o_ref[...] = acc


def _mm_bias_res_relu_kernel(a_ref, w_ref, b_ref, r_ref, o_ref):
    # out = relu(A @ W + bias + residual_slab)   -- conv2+bn2+identity+ReLU
    acc = jnp.dot(a_ref[...], w_ref[...], preferred_element_type=jnp.float32)
    o_ref[...] = jnp.maximum(acc + b_ref[...] + r_ref[...], 0.0)


def _mm2_bias_relu_kernel(a_ref, w_ref, d_ref, wd_ref, b_ref, o_ref):
    # out = relu(A @ W + D @ Wd + bias)  -- conv2+bn2 + 1x1 downsample+bn + add + ReLU
    acc = jnp.dot(a_ref[...], w_ref[...], preferred_element_type=jnp.float32)
    acc = acc + jnp.dot(d_ref[...], wd_ref[...], preferred_element_type=jnp.float32)
    o_ref[...] = jnp.maximum(acc + b_ref[...], 0.0)


def _gap_fc_kernel(x_ref, w_ref, b_ref, o_ref, *, inv_hw):
    # global average pool over spatial axis + FC + bias, fused
    feat = jnp.sum(x_ref[...], axis=1) * inv_hw          # (N, C)
    o_ref[...] = jnp.dot(feat, w_ref[...],
                         preferred_element_type=jnp.float32) + b_ref[...]


_WAVELENGTH = 0.0005


def _radar_kernel(x_ref, o_ref):
    x = x_ref[...]                                        # (3, M) xyz coords
    r = jnp.sqrt(x[0:1, :] ** 2 + x[1:2, :] ** 2 + x[2:3, :] ** 2)
    o_ref[...] = jnp.cos((4.0 * math.pi / _WAVELENGTH) * r)


# ----------------------------- kernel wrappers -----------------------------

def _row_tile(mp):
    # split big-M convs (only conv1: M=512) into parallel row tiles for v7x's 2 TCs
    return 256 if (mp > 256 and mp % 256 == 0) else mp


def _mosaic():
    return pltpu.CompilerParams(dimension_semantics=("parallel",))


def mm_bias(cols, w, bias, relu):
    mp, kp = cols.shape
    np_ = w.shape[1]
    tm = _row_tile(mp)
    return pl.pallas_call(
        functools.partial(_mm_bias_kernel, relu=relu),
        out_shape=jax.ShapeDtypeStruct((mp, np_), jnp.float32),
        grid=(mp // tm,),
        in_specs=[pl.BlockSpec((tm, kp), lambda i: (i, 0)),
                  pl.BlockSpec((kp, np_), lambda i: (0, 0)),
                  pl.BlockSpec((1, np_), lambda i: (0, 0))],
        out_specs=pl.BlockSpec((tm, np_), lambda i: (i, 0)),
        compiler_params=_mosaic(),
    )(cols, w, bias)


def mm_bias_res_relu(cols, w, bias, res):
    mp, kp = cols.shape
    np_ = w.shape[1]
    tm = _row_tile(mp)
    return pl.pallas_call(
        _mm_bias_res_relu_kernel,
        out_shape=jax.ShapeDtypeStruct((mp, np_), jnp.float32),
        grid=(mp // tm,),
        in_specs=[pl.BlockSpec((tm, kp), lambda i: (i, 0)),
                  pl.BlockSpec((kp, np_), lambda i: (0, 0)),
                  pl.BlockSpec((1, np_), lambda i: (0, 0)),
                  pl.BlockSpec((tm, np_), lambda i: (i, 0))],
        out_specs=pl.BlockSpec((tm, np_), lambda i: (i, 0)),
        compiler_params=_mosaic(),
    )(cols, w, bias, res)


def mm2_bias_relu(cols, w, cols_d, w_d, bias):
    mp, kp = cols.shape
    kd = cols_d.shape[1]
    np_ = w.shape[1]
    tm = _row_tile(mp)
    return pl.pallas_call(
        _mm2_bias_relu_kernel,
        out_shape=jax.ShapeDtypeStruct((mp, np_), jnp.float32),
        grid=(mp // tm,),
        in_specs=[pl.BlockSpec((tm, kp), lambda i: (i, 0)),
                  pl.BlockSpec((kp, np_), lambda i: (0, 0)),
                  pl.BlockSpec((tm, kd), lambda i: (i, 0)),
                  pl.BlockSpec((kd, np_), lambda i: (0, 0)),
                  pl.BlockSpec((1, np_), lambda i: (0, 0))],
        out_specs=pl.BlockSpec((tm, np_), lambda i: (i, 0)),
        compiler_params=_mosaic(),
    )(cols, w, cols_d, w_d, bias)


def gap_fc(h_nhwc, fc_w, fc_b):
    n, h, w, c = h_nhwc.shape
    np_rows = _round_up(n, 8)
    x3 = h_nhwc.reshape(n, h * w, c)
    if np_rows != n:
        x3 = jnp.pad(x3, ((0, np_rows - n), (0, 0), (0, 0)))
    nc = fc_w.shape[1]
    out = pl.pallas_call(
        functools.partial(_gap_fc_kernel, inv_hw=1.0 / (h * w)),
        out_shape=jax.ShapeDtypeStruct((np_rows, nc), jnp.float32),
    )(x3, fc_w, fc_b)
    return out[:n]


def virtual_radar(x):
    # TODO(synk): `VirtualRadar` is not defined in the reference source; this is a
    # physics-inspired stand-in: per (time, joint) radar phase map cos(4*pi*r/lambda)
    # computed from 3-D positions, producing a (N, T, J) image.
    n, t, j, _ = x.shape
    m = n * t * j
    xt = x.reshape(m, 3).T                                # (3, M)
    out = pl.pallas_call(
        _radar_kernel,
        out_shape=jax.ShapeDtypeStruct((1, m), jnp.float32),
    )(xt)
    return out.reshape(n, t, j)


# ----------------------------- conv / resnet glue -----------------------------

def _im2col(x, kh, kw, stride, pad):
    n, h, w, c = x.shape
    oh = (h + 2 * pad - kh) // stride + 1
    ow = (w + 2 * pad - kw) // stride + 1
    xp = jnp.pad(x, ((0, 0), (pad, pad), (pad, pad), (0, 0))) if pad else x
    cols = []
    for i in range(kh):
        for j in range(kw):
            cols.append(xp[:, i:i + (oh - 1) * stride + 1:stride,
                           j:j + (ow - 1) * stride + 1:stride, :])
    patches = jnp.stack(cols, axis=3)                     # (N, OH, OW, kh*kw, C)
    return patches.reshape(n * oh * ow, kh * kw * c), (n, oh, ow)


def _pad_cast(a, rows, cols, dtype=jnp.bfloat16):
    m, k = a.shape
    if rows != m or cols != k:
        a = jnp.pad(a, ((0, rows - m), (0, cols - k)))
    return a.astype(dtype)


def conv_bn(x_nhwc, cp, kh, kw, stride, pad, relu):
    """conv + folded BN (+ReLU) as a single fused Pallas matmul call."""
    cols, (n, oh, ow) = _im2col(x_nhwc, kh, kw, stride, pad)
    m = cols.shape[0]
    mp = _round_up(m, 8)
    cols = _pad_cast(cols, mp, cp["w"].shape[0])
    y = mm_bias(cols, cp["w"], cp["b"], relu)
    return y[:m].reshape(n, oh, ow, cp["w"].shape[1])


def basic_block(x, bp, stride):
    cout = bp["c2"]["w"].shape[1]
    h1 = conv_bn(x, bp["c1"], 3, 3, stride, 1, relu=True)

    cols2, (n, oh, ow) = _im2col(h1, 3, 3, 1, 1)
    m = cols2.shape[0]
    mp = _round_up(m, 8)
    cols2 = _pad_cast(cols2, mp, bp["c2"]["w"].shape[0])

    if "cd" in bp:
        # downsample path fused as a second matmul in the same kernel
        xs = x[:, ::stride, ::stride, :] if stride > 1 else x
        colsd = xs.reshape(-1, xs.shape[-1])
        colsd = _pad_cast(colsd, mp, bp["cd"]["w"].shape[0])
        y = mm2_bias_relu(cols2, bp["c2"]["w"], colsd, bp["cd"]["w"], bp["res_b"])
    else:
        res = x.reshape(-1, cout)
        if mp != m:
            res = jnp.pad(res, ((0, mp - m), (0, 0)))
        y = mm_bias_res_relu(cols2, bp["c2"]["w"], bp["c2"]["b"], res)
    return y[:m].reshape(n, oh, ow, cout)


def resnet18_forward(x_nhwc, p):
    h = conv_bn(x_nhwc, p["c1"], 7, 7, stride=2, pad=3, relu=True)
    # 3x3/s2/p1 max pool: small one-off window reduction, left as XLA glue.
    h = lax.reduce_window(h, -jnp.inf, lax.max, (1, 3, 3, 1), (1, 2, 2, 1),
                          ((0, 0), (1, 1), (1, 1), (0, 0)))
    for li, layer in enumerate(p["layers"]):
        for bi, blk in enumerate(layer["blocks"]):
            stride = 2 if (li > 0 and bi == 0) else 1
            h = basic_block(h, blk, stride)
    return gap_fc(h, p["fc_w"], p["fc_b"])               # fused GAP + FC + bias


def _nearest_axis(x, axis, out_size):
    # matches torch F.interpolate(mode='nearest'): src = floor(dst * in/out)
    in_size = x.shape[axis]
    if in_size == out_size:
        return x
    if in_size % out_size == 0:                           # integer downsample -> strided slice
        step = in_size // out_size
        idx = [slice(None)] * x.ndim
        idx[axis] = slice(0, in_size, step)
        return x[tuple(idx)]
    if out_size % in_size == 0:                           # integer upsample -> repeat
        return jnp.repeat(x, out_size // in_size, axis=axis)
    src = (jnp.arange(out_size) * (in_size / out_size)).astype(jnp.int32)
    return jnp.take(x, src, axis=axis)                    # rare fallback


def model_forward(x, params, image_size=32):
    rad = virtual_radar(x)                                # (N, T, J)
    img = rad[:, None, :, :]                              # unsqueeze(1) -> (N,1,T,J)
    img = _nearest_axis(img, 2, image_size)
    img = _nearest_axis(img, 3, image_size)
    h = jnp.transpose(img, (0, 2, 3, 1))                  # -> NHWC
    return resnet18_forward(h, params)


# ----------------------------- deterministic params -----------------------------

def _conv_init(key, cout, cin, kh, kw):
    fan_in = cin * kh * kw
    return jax.random.normal(key, (cout, cin, kh, kw), jnp.float32) * math.sqrt(2.0 / fan_in)


def _bn_init(key, c, eps=1e-5):
    k1, k2, k3, k4 = jax.random.split(key, 4)
    gamma = 1.0 + 0.1 * jax.random.normal(k1, (1, c), jnp.float32)
    beta = 0.1 * jax.random.normal(k2, (1, c), jnp.float32)
    mean = 0.1 * jax.random.normal(k3, (1, c), jnp.float32)
    var = jax.random.uniform(k4, (1, c), jnp.float32, 0.5, 1.5)
    scale = gamma / jnp.sqrt(var + eps)                   # eval-mode BN fold
    shift = beta - mean * scale
    return scale, shift


def _prep_conv(w_oihw, scale, shift):
    """Fold BN scale into weight columns, transpose to im2col layout
    (kh*kw*cin, cout), zero-pad K to a multiple of 16, cast to bf16."""
    cout, cin, kh, kw = w_oihw.shape
    wmat = jnp.transpose(w_oihw, (2, 3, 1, 0)).reshape(kh * kw * cin, cout)
    wmat = wmat * scale                                   # (K, cout) * (1, cout)
    k = kh * kw * cin
    kp = _round_up(k, 16)
    if kp != k:
        wmat = jnp.pad(wmat, ((0, kp - k), (0, 0)))
    return {"w": wmat.astype(jnp.bfloat16), "b": shift}


def init_params(key, num_classes=60, num_filters=8, in_ch=1):
    keys = iter(jax.random.split(key, 64))

    def conv_bn_params(cout, cin, kh, kw):
        w = _conv_init(next(keys), cout, cin, kh, kw)
        scale, shift = _bn_init(next(keys), cout)
        return _prep_conv(w, scale, shift)

    p = {"c1": conv_bn_params(num_filters, in_ch, 7, 7)}
    layers = []
    cin = num_filters
    for cout, stride in [(num_filters, 1), (2 * num_filters, 2),
                         (4 * num_filters, 2), (8 * num_filters, 2)]:
        blocks = []
        for bi in range(2):
            s = stride if bi == 0 else 1
            blk = {"c1": conv_bn_params(cout, cin, 3, 3),
                   "c2": conv_bn_params(cout, cout, 3, 3)}
            if s != 1 or cin != cout:
                blk["cd"] = conv_bn_params(cout, cin, 1, 1)
                blk["res_b"] = blk["c2"]["b"] + blk["cd"]["b"]   # combined bias
            blocks.append(blk)
            cin = cout
        layers.append({"blocks": blocks})
    p["layers"] = layers
    feat = 8 * num_filters
    p["fc_w"] = jax.random.normal(next(keys), (feat, num_classes), jnp.float32) / math.sqrt(feat)
    p["fc_b"] = 0.01 * jax.random.normal(next(keys), (1, num_classes), jnp.float32)
    return p


if __name__ == "__main__":
    key = jax.random.PRNGKey(0)
    kx, kp = jax.random.split(key)

    # small shapes: batch=2, 64 time steps, 8 "scatterers" with xyz coords,
    # image_size=32, num_filters=8, num_classes=60
    N, T, J = 2, 64, 8
    num_classes, num_filters, image_size = 60, 8, 32

    x = jax.random.normal(kx, (N, T, J, 3), jnp.float32)
    params = init_params(kp, num_classes=num_classes, num_filters=num_filters, in_ch=1)

    fwd = jax.jit(functools.partial(model_forward, image_size=image_size))
    out = fwd(x, params)
    out = jax.block_until_ready(out)
    assert out.shape == (N, num_classes), out.shape
    assert bool(jnp.all(jnp.isfinite(out)))
    print("KERNEL_OK")
</pallas_src>

<mosaic_0001>
module attributes {stable_mosaic.version = 11 : i64} {
  func.func @_radar_kernel(%arg0: memref<3x1024xf32, #tpu.memory_space<vmem>>, %arg1: memref<1x1024xf32, #tpu.memory_space<vmem>>) attributes {dimension_semantics = [], scalar_prefetch = 0 : i64, scratch_operands = 0 : i64, tpu.core_type = #tpu.core_type<tc>} {
    %c0 = arith.constant 0 : index
    %c0_0 = arith.constant 0 : index
    %0 = vector.load %arg0[%c0, %c0_0] : memref<3x1024xf32, #tpu.memory_space<vmem>>, vector<3x1024xf32>
    %1 = vector.extract_strided_slice %0 {offsets = [0, 0], sizes = [1, 1024], strides = [1, 1]} : vector<3x1024xf32> to vector<1x1024xf32>
    %2 = arith.mulf %1, %1 : vector<1x1024xf32>
    %3 = vector.extract_strided_slice %0 {offsets = [1, 0], sizes = [1, 1024], strides = [1, 1]} : vector<3x1024xf32> to vector<1x1024xf32>
    %4 = arith.mulf %3, %3 : vector<1x1024xf32>
    %5 = arith.addf %2, %4 : vector<1x1024xf32>
    %6 = vector.extract_strided_slice %0 {offsets = [2, 0], sizes = [1, 1024], strides = [1, 1]} : vector<3x1024xf32> to vector<1x1024xf32>
    %7 = arith.mulf %6, %6 : vector<1x1024xf32>
    %8 = arith.addf %5, %7 : vector<1x1024xf32>
    %9 = math.sqrt %8 : vector<1x1024xf32>
    %cst = arith.constant 25132.7422 : f32
    %10 = vector.broadcast %cst : f32 to vector<1x1024xf32>
    %11 = arith.mulf %10, %9 : vector<1x1024xf32>
    %12 = math.cos %11 : vector<1x1024xf32>
    %c0_1 = arith.constant 0 : index
    %c0_2 = arith.constant 0 : index
    %13 = vector.load %arg1[%c0_1, %c0_2] : memref<1x1024xf32, #tpu.memory_space<vmem>>, vector<1x1024xf32>
    tpu.vector_store %arg1[%c0_1, %c0_2], %12 {strides = array<i32>} : memref<1x1024xf32, #tpu.memory_space<vmem>>, vector<1x1024xf32>,
    return
  }
}

module attributes {stable_mosaic.version = 11 : i64} {
  func.func @_mm_bias_kernel(%arg0: i32, %arg1: memref<256x64xbf16, #tpu.memory_space<vmem>>, %arg2: memref<64x8xbf16, #tpu.memory_space<vmem>>, %arg3: memref<1x8xf32, #tpu.memory_space<vmem>>, %arg4: memref<256x8xf32, #tpu.memory_space<vmem>>) attributes {dimension_semantics = [#tpu.dimension_semantics<parallel>], iteration_bounds = array<i64: 2>, scalar_prefetch = 0 : i64, scratch_operands = 0 : i64, tpu.core_type = #tpu.core_type<tc>, window_params = [{transform_indices = @transform_0, window_bounds = array<i64: 256, 64>}, {pipeline_mode = #tpu.pipeline_mode<synchronous>, transform_indices = @transform_1, window_bounds = array<i64: 64, 8>}, {pipeline_mode = #tpu.pipeline_mode<synchronous>, transform_indices = @transform_2, window_bounds = array<i64: 1, 8>}, {transform_indices = @transform_3, window_bounds = array<i64: 256, 8>}]} {
    %c0 = arith.constant 0 : index
    %c0_0 = arith.constant 0 : index
    %0 = vector.load %arg1[%c0, %c0_0] : memref<256x64xbf16, #tpu.memory_space<vmem>>, vector<256x64xbf16>
    %c0_1 = arith.constant 0 : index
    %c0_2 = arith.constant 0 : index
    %1 = vector.load %arg2[%c0_1, %c0_2] : memref<64x8xbf16, #tpu.memory_space<vmem>>, vector<64x8xbf16>
    %cst = arith.constant dense<0.000000e+00> : vector<256x8xf32>
    %2 = tpu.matmul %0, %1, %cst {dimension_numbers = #tpu.dot_dimension_numbers<[1], [0], [0], [1], [0, 0, 1, 1], [], []>} : vector<256x64xbf16>, vector<64x8xbf16>, vector<256x8xf32> -> vector<256x8xf32>
    %c0_3 = arith.constant 0 : index
    %c0_4 = arith.constant 0 : index
    %3 = vector.load %arg3[%c0_3, %c0_4] : memref<1x8xf32, #tpu.memory_space<vmem>>, vector<1x8xf32>
    %4 = vector.broadcast %3 : vector<1x8xf32> to vector<256x8xf32>
    %5 = arith.addf %2, %4 : vector<256x8xf32>
    %cst_5 = arith.constant 0.000000e+00 : f32
    %6 = vector.broadcast %cst_5 : f32 to vector<256x8xf32>
    %7 = arith.maximumf %5, %6 : vector<256x8xf32>
    %c0_6 = arith.constant 0 : index
    %c0_7 = arith.constant 0 : index
    %8 = vector.load %arg4[%c0_6, %c0_7] : memref<256x8xf32, #tpu.memory_space<vmem>>, vector<256x8xf32>
    tpu.vector_store %arg4[%c0_6, %c0_7], %7 {strides = array<i32>} : memref<256x8xf32, #tpu.memory_space<vmem>>, vector<256x8xf32>,
    return
  }
  func.func @transform_0(%arg0: i32) -> (i32, i32) {
    %c0_i32 = arith.constant 0 : i32
    %c0_i32_0 = arith.constant 0 : i32
    return %arg0, %c0_i32 : i32, i32
  }
  func.func @transform_1(%arg0: i32) -> (i32, i32) {
    %c0_i32 = arith.constant 0 : i32
    %c0_i32_0 = arith.constant 0 : i32
    %c0_i32_1 = arith.constant 0 : i32
    return %c0_i32, %c0_i32_0 : i32, i32
  }
  func.func @transform_2(%arg0: i32) -> (i32, i32) {
    %c0_i32 = arith.constant 0 : i32
    %c0_i32_0 = arith.constant 0 : i32
    %c0_i32_1 = arith.constant 0 : i32
    return %c0_i32, %c0_i32_0 : i32, i32
  }
  func.func @transform_3(%arg0: i32) -> (i32, i32) {
    %c0_i32 = arith.constant 0 : i32
    %c0_i32_0 = arith.constant 0 : i32
    return %arg0, %c0_i32 : i32, i32
  }
}

module attributes {stable_mosaic.version = 11 : i64} {
  func.func @_mm_bias_kernel(%arg0: i32, %arg1: memref<128x80xbf16, #tpu.memory_space<vmem>>, %arg2: memref<80x8xbf16, #tpu.memory_space<vmem>>, %arg3: memref<1x8xf32, #tpu.memory_space<vmem>>, %arg4: memref<128x8xf32, #tpu.memory_space<vmem>>) attributes {dimension_semantics = [#tpu.dimension_semantics<parallel>], iteration_bounds = array<i64: 1>, scalar_prefetch = 0 : i64, scratch_operands = 0 : i64, tpu.core_type = #tpu.core_type<tc>, window_params = [{transform_indices = @transform_0, window_bounds = array<i64: 128, 80>}, {pipeline_mode = #tpu.pipeline_mode<synchronous>, transform_indices = @transform_1, window_bounds = array<i64: 80, 8>}, {pipeline_mode = #tpu.pipeline_mode<synchronous>, transform_indices = @transform_2, window_bounds = array<i64: 1, 8>}, {transform_indices = @transform_3, window_bounds = array<i64: 128, 8>}]} {
    %c0 = arith.constant 0 : index
    %c0_0 = arith.constant 0 : index
    %0 = vector.load %arg1[%c0, %c0_0] : memref<128x80xbf16, #tpu.memory_space<vmem>>, vector<128x80xbf16>
    %c0_1 = arith.constant 0 : index
    %c0_2 = arith.constant 0 : index
    %1 = vector.load %arg2[%c0_1, %c0_2] : memref<80x8xbf16, #tpu.memory_space<vmem>>, vector<80x8xbf16>
    %cst = arith.constant dense<0.000000e+00> : vector<128x8xf32>
    %2 = tpu.matmul %0, %1, %cst {dimension_numbers = #tpu.dot_dimension_numbers<[1], [0], [0], [1], [0, 0, 1, 1], [], []>} : vector<128x80xbf16>, vector<80x8xbf16>, vector<128x8xf32> -> vector<128x8xf32>
    %c0_3 = arith.constant 0 : index
    %c0_4 = arith.constant 0 : index
    %3 = vector.load %arg3[%c0_3, %c0_4] : memref<1x8xf32, #tpu.memory_space<vmem>>, vector<1x8xf32>
    %4 = vector.broadcast %3 : vector<1x8xf32> to vector<128x8xf32>
    %5 = arith.addf %2, %4 : vector<128x8xf32>
    %cst_5 = arith.constant 0.000000e+00 : f32
    %6 = vector.broadcast %cst_5 : f32 to vector<128x8xf32>
    %7 = arith.maximumf %5, %6 : vector<128x8xf32>
    %c0_6 = arith.constant 0 : index
    %c0_7 = arith.constant 0 : index
    %8 = vector.load %arg4[%c0_6, %c0_7] : memref<128x8xf32, #tpu.memory_space<vmem>>, vector<128x8xf32>
    tpu.vector_store %arg4[%c0_6, %c0_7], %7 {strides = array<i32>} : memref<128x8xf32, #tpu.memory_space<vmem>>, vector<128x8xf32>,
    return
  }
  func.func @transform_0(%arg0: i32) -> (i32, i32) {
    %c0_i32 = arith.constant 0 : i32
    %c0_i32_0 = arith.constant 0 : i32
    return %arg0, %c0_i32 : i32, i32
  }
  func.func @transform_1(%arg0: i32) -> (i32, i32) {
    %c0_i32 = arith.constant 0 : i32
    %c0_i32_0 = arith.constant 0 : i32
    %c0_i32_1 = arith.constant 0 : i32
    return %c0_i32, %c0_i32_0 : i32, i32
  }
  func.func @transform_2(%arg0: i32) -> (i32, i32) {
    %c0_i32 = arith.constant 0 : i32
    %c0_i32_0 = arith.constant 0 : i32
    %c0_i32_1 = arith.constant 0 : i32
    return %c0_i32, %c0_i32_0 : i32, i32
  }
  func.func @transform_3(%arg0: i32) -> (i32, i32) {
    %c0_i32 = arith.constant 0 : i32
    %c0_i32_0 = arith.constant 0 : i32
    return %arg0, %c0_i32 : i32, i32
  }
}

module attributes {stable_mosaic.version = 11 : i64} {
  func.func @_mm_bias_res_relu_kernel(%arg0: i32, %arg1: memref<128x80xbf16, #tpu.memory_space<vmem>>, %arg2: memref<80x8xbf16, #tpu.memory_space<vmem>>, %arg3: memref<1x8xf32, #tpu.memory_space<vmem>>, %arg4: memref<128x8xf32, #tpu.memory_space<vmem>>, %arg5: memref<128x8xf32, #tpu.memory_space<vmem>>) attributes {dimension_semantics = [#tpu.dimension_semantics<parallel>], iteration_bounds = array<i64: 1>, scalar_prefetch = 0 : i64, scratch_operands = 0 : i64, tpu.core_type = #tpu.core_type<tc>, window_params = [{transform_indices = @transform_0, window_bounds = array<i64: 128, 80>}, {pipeline_mode = #tpu.pipeline_mode<synchronous>, transform_indices = @transform_1, window_bounds = array<i64: 80, 8>}, {pipeline_mode = #tpu.pipeline_mode<synchronous>, transform_indices = @transform_2, window_bounds = array<i64: 1, 8>}, {transform_indices = @transform_3, window_bounds = array<i64: 128, 8>}, {transform_indices = @transform_4, window_bounds = array<i64: 128, 8>}]} {
    %c0 = arith.constant 0 : index
    %c0_0 = arith.constant 0 : index
    %0 = vector.load %arg1[%c0, %c0_0] : memref<128x80xbf16, #tpu.memory_space<vmem>>, vector<128x80xbf16>
    %c0_1 = arith.constant 0 : index
    %c0_2 = arith.constant 0 : index
    %1 = vector.load %arg2[%c0_1, %c0_2] : memref<80x8xbf16, #tpu.memory_space<vmem>>, vector<80x8xbf16>
    %cst = arith.constant dense<0.000000e+00> : vector<128x8xf32>
    %2 = tpu.matmul %0, %1, %cst {dimension_numbers = #tpu.dot_dimension_numbers<[1], [0], [0], [1], [0, 0, 1, 1], [], []>} : vector<128x80xbf16>, vector<80x8xbf16>, vector<128x8xf32> -> vector<128x8xf32>
    %c0_3 = arith.constant 0 : index
    %c0_4 = arith.constant 0 : index
    %3 = vector.load %arg3[%c0_3, %c0_4] : memref<1x8xf32, #tpu.memory_space<vmem>>, vector<1x8xf32>
    %4 = vector.broadcast %3 : vector<1x8xf32> to vector<128x8xf32>
    %5 = arith.addf %2, %4 : vector<128x8xf32>
    %c0_5 = arith.constant 0 : index
    %c0_6 = arith.constant 0 : index
    %6 = vector.load %arg4[%c0_5, %c0_6] : memref<128x8xf32, #tpu.memory_space<vmem>>, vector<128x8xf32>
    %7 = arith.addf %5, %6 : vector<128x8xf32>
    %cst_7 = arith.constant 0.000000e+00 : f32
    %8 = vector.broadcast %cst_7 : f32 to vector<128x8xf32>
    %9 = arith.maximumf %7, %8 : vector<128x8xf32>
    %c0_8 = arith.constant 0 : index
    %c0_9 = arith.constant 0 : index
    %10 = vector.load %arg5[%c0_8, %c0_9] : memref<128x8xf32, #tpu.memory_space<vmem>>, vector<128x8xf32>
    tpu.vector_store %arg5[%c0_8, %c0_9], %9 {strides = array<i32>} : memref<128x8xf32, #tpu.memory_space<vmem>>, vector<128x8xf32>,
    return
  }
  func.func @transform_0(%arg0: i32) -> (i32, i32) {
    %c0_i32 = arith.constant 0 : i32
    %c0_i32_0 = arith.constant 0 : i32
    return %arg0, %c0_i32 : i32, i32
  }
  func.func @transform_1(%arg0: i32) -> (i32, i32) {
    %c0_i32 = arith.constant 0 : i32
    %c0_i32_0 = arith.constant 0 : i32
    %c0_i32_1 = arith.constant 0 : i32
    return %c0_i32, %c0_i32_0 : i32, i32
  }
  func.func @transform_2(%arg0: i32) -> (i32, i32) {
    %c0_i32 = arith.constant 0 : i32
    %c0_i32_0 = arith.constant 0 : i32
    %c0_i32_1 = arith.constant 0 : i32
    return %c0_i32, %c0_i32_0 : i32, i32
  }
  func.func @transform_3(%arg0: i32) -> (i32, i32) {
    %c0_i32 = arith.constant 0 : i32
    %c0_i32_0 = arith.constant 0 : i32
    return %arg0, %c0_i32 : i32, i32
  }
  func.func @transform_4(%arg0: i32) -> (i32, i32) {
    %c0_i32 = arith.constant 0 : i32
    %c0_i32_0 = arith.constant 0 : i32
    return %arg0, %c0_i32 : i32, i32
  }
}

module attributes {stable_mosaic.version = 11 : i64} {
  func.func @_mm_bias_kernel(%arg0: i32, %arg1: memref<32x80xbf16, #tpu.memory_space<vmem>>, %arg2: memref<80x16xbf16, #tpu.memory_space<vmem>>, %arg3: memref<1x16xf32, #tpu.memory_space<vmem>>, %arg4: memref<32x16xf32, #tpu.memory_space<vmem>>) attributes {dimension_semantics = [#tpu.dimension_semantics<parallel>], iteration_bounds = array<i64: 1>, scalar_prefetch = 0 : i64, scratch_operands = 0 : i64, tpu.core_type = #tpu.core_type<tc>, window_params = [{transform_indices = @transform_0, window_bounds = array<i64: 32, 80>}, {pipeline_mode = #tpu.pipeline_mode<synchronous>, transform_indices = @transform_1, window_bounds = array<i64: 80, 16>}, {pipeline_mode = #tpu.pipeline_mode<synchronous>, transform_indices = @transform_2, window_bounds = array<i64: 1, 16>}, {transform_indices = @transform_3, window_bounds = array<i64: 32, 16>}]} {
    %c0 = arith.constant 0 : index
    %c0_0 = arith.constant 0 : index
    %0 = vector.load %arg1[%c0, %c0_0] : memref<32x80xbf16, #tpu.memory_space<vmem>>, vector<32x80xbf16>
    %c0_1 = arith.constant 0 : index
    %c0_2 = arith.constant 0 : index
    %1 = vector.load %arg2[%c0_1, %c0_2] : memref<80x16xbf16, #tpu.memory_space<vmem>>, vector<80x16xbf16>
    %cst = arith.constant dense<0.000000e+00> : vector<32x16xf32>
    %2 = tpu.matmul %0, %1, %cst {dimension_numbers = #tpu.dot_dimension_numbers<[1], [0], [0], [1], [0, 0, 1, 1], [], []>} : vector<32x80xbf16>, vector<80x16xbf16>, vector<32x16xf32> -> vector<32x16xf32>
    %c0_3 = arith.constant 0 : index
    %c0_4 = arith.constant 0 : index
    %3 = vector.load %arg3[%c0_3, %c0_4] : memref<1x16xf32, #tpu.memory_space<vmem>>, vector<1x16xf32>
    %4 = vector.broadcast %3 : vector<1x16xf32> to vector<32x16xf32>
    %5 = arith.addf %2, %4 : vector<32x16xf32>
    %cst_5 = arith.constant 0.000000e+00 : f32
    %6 = vector.broadcast %cst_5 : f32 to vector<32x16xf32>
    %7 = arith.maximumf %5, %6 : vector<32x16xf32>
    %c0_6 = arith.constant 0 : index
    %c0_7 = arith.constant 0 : index
    %8 = vector.load %arg4[%c0_6, %c0_7] : memref<32x16xf32, #tpu.memory_space<vmem>>, vector<32x16xf32>
    tpu.vector_store %arg4[%c0_6, %c0_7], %7 {strides = array<i32>} : memref<32x16xf32, #tpu.memory_space<vmem>>, vector<32x16xf32>,
    return
  }
  func.func @transform_0(%arg0: i32) -> (i32, i32) {
    %c0_i32 = arith.constant 0 : i32
    %c0_i32_0 = arith.constant 0 : i32
    return %arg0, %c0_i32 : i32, i32
  }
  func.func @transform_1(%arg0: i32) -> (i32, i32) {
    %c0_i32 = arith.constant 0 : i32
    %c0_i32_0 = arith.constant 0 : i32
    %c0_i32_1 = arith.constant 0 : i32
    return %c0_i32, %c0_i32_0 : i32, i32
  }
  func.func @transform_2(%arg0: i32) -> (i32, i32) {
    %c0_i32 = arith.constant 0 : i32
    %c0_i32_0 = arith.constant 0 : i32
    %c0_i32_1 = arith.constant 0 : i32
    return %c0_i32, %c0_i32_0 : i32, i32
  }
  func.func @transform_3(%arg0: i32) -> (i32, i32) {
    %c0_i32 = arith.constant 0 : i32
    %c0_i32_0 = arith.constant 0 : i32
    return %arg0, %c0_i32 : i32, i32
  }
}

module attributes {stable_mosaic.version = 11 : i64} {
  func.func @_mm2_bias_relu_kernel(%arg0: i32, %arg1: memref<32x144xbf16, #tpu.memory_space<vmem>>, %arg2: memref<144x16xbf16, #tpu.memory_space<vmem>>, %arg3: memref<32x16xbf16, #tpu.memory_space<vmem>>, %arg4: memref<16x16xbf16, #tpu.memory_space<vmem>>, %arg5: memref<1x16xf32, #tpu.memory_space<vmem>>, %arg6: memref<32x16xf32, #tpu.memory_space<vmem>>) attributes {dimension_semantics = [#tpu.dimension_semantics<parallel>], iteration_bounds = array<i64: 1>, scalar_prefetch = 0 : i64, scratch_operands = 0 : i64, tpu.core_type = #tpu.core_type<tc>, window_params = [{transform_indices = @transform_0, window_bounds = array<i64: 32, 144>}, {pipeline_mode = #tpu.pipeline_mode<synchronous>, transform_indices = @transform_1, window_bounds = array<i64: 144, 16>}, {transform_indices = @transform_2, window_bounds = array<i64: 32, 16>}, {pipeline_mode = #tpu.pipeline_mode<synchronous>, transform_indices = @transform_3, window_bounds = array<i64: 16, 16>}, {pipeline_mode = #tpu.pipeline_mode<synchronous>, transform_indices = @transform_4, window_bounds = array<i64: 1, 16>}, {transform_indices = @transform_5, window_bounds = array<i64: 32, 16>}]} {
    %c0 = arith.constant 0 : index
    %c0_0 = arith.constant 0 : index
    %0 = vector.load %arg1[%c0, %c0_0] : memref<32x144xbf16, #tpu.memory_space<vmem>>, vector<32x144xbf16>
    %c0_1 = arith.constant 0 : index
    %c0_2 = arith.constant 0 : index
    %1 = vector.load %arg2[%c0_1, %c0_2] : memref<144x16xbf16, #tpu.memory_space<vmem>>, vector<144x16xbf16>
    %cst = arith.constant dense<0.000000e+00> : vector<32x16xf32>
    %2 = tpu.matmul %0, %1, %cst {dimension_numbers = #tpu.dot_dimension_numbers<[1], [0], [0], [1], [0, 0, 1, 1], [], []>} : vector<32x144xbf16>, vector<144x16xbf16>, vector<32x16xf32> -> vector<32x16xf32>
    %c0_3 = arith.constant 0 : index
    %c0_4 = arith.constant 0 : index
    %3 = vector.load %arg3[%c0_3, %c0_4] : memref<32x16xbf16, #tpu.memory_space<vmem>>, vector<32x16xbf16>
    %c0_5 = arith.constant 0 : index
    %c0_6 = arith.constant 0 : index
    %4 = vector.load %arg4[%c0_5, %c0_6] : memref<16x16xbf16, #tpu.memory_space<vmem>>, vector<16x16xbf16>
    %cst_7 = arith.constant dense<0.000000e+00> : vector<32x16xf32>
    %5 = tpu.matmul %3, %4, %cst_7 {dimension_numbers = #tpu.dot_dimension_numbers<[1], [0], [0], [1], [0, 0, 1, 1], [], []>} : vector<32x16xbf16>, vector<16x16xbf16>, vector<32x16xf32> -> vector<32x16xf32>
    %6 = arith.addf %2, %5 : vector<32x16xf32>
    %c0_8 = arith.constant 0 : index
    %c0_9 = arith.constant 0 : index
    %7 = vector.load %arg5[%c0_8, %c0_9] : memref<1x16xf32, #tpu.memory_space<vmem>>, vector<1x16xf32>
    %8 = vector.broadcast %7 : vector<1x16xf32> to vector<32x16xf32>
    %9 = arith.addf %6, %8 : vector<32x16xf32>
    %cst_10 = arith.constant 0.000000e+00 : f32
    %10 = vector.broadcast %cst_10 : f32 to vector<32x16xf32>
    %11 = arith.maximumf %9, %10 : vector<32x16xf32>
    %c0_11 = arith.constant 0 : index
    %c0_12 = arith.constant 0 : index
    %12 = vector.load %arg6[%c0_11, %c0_12] : memref<32x16xf32, #tpu.memory_space<vmem>>, vector<32x16xf32>
    tpu.vector_store %arg6[%c0_11, %c0_12], %11 {strides = array<i32>} : memref<32x16xf32, #tpu.memory_space<vmem>>, vector<32x16xf32>,
    return
  }
  func.func @transform_0(%arg0: i32) -> (i32, i32) {
    %c0_i32 = arith.constant 0 : i32
    %c0_i32_0 = arith.constant 0 : i32
    return %arg0, %c0_i32 : i32, i32
  }
  func.func @transform_1(%arg0: i32) -> (i32, i32) {
    %c0_i32 = arith.constant 0 : i32
    %c0_i32_0 = arith.constant 0 : i32
    %c0_i32_1 = arith.constant 0 : i32
    return %c0_i32, %c0_i32_0 : i32, i32
  }
  func.func @transform_2(%arg0: i32) -> (i32, i32) {
    %c0_i32 = arith.constant 0 : i32
    %c0_i32_0 = arith.constant 0 : i32
    return %arg0, %c0_i32 : i32, i32
  }
  func.func @transform_3(%arg0: i32) -> (i32, i32) {
    %c0_i32 = arith.constant 0 : i32
    %c0_i32_0 = arith.constant 0 : i32
    %c0_i32_1 = arith.constant 0 : i32
    return %c0_i32, %c0_i32_0 : i32, i32
  }
  func.func @transform_4(%arg0: i32) -> (i32, i32) {
    %c0_i32 = arith.constant 0 : i32
    %c0_i32_0 = arith.constant 0 : i32
    %c0_i32_1 = arith.constant 0 : i32
    return %c0_i32, %c0_i32_0 : i32, i32
  }
  func.func @transform_5(%arg0: i32) -> (i32, i32) {
    %c0_i32 = arith.constant 0 : i32
    %c0_i32_0 = arith.constant 0 : i32
    return %arg0, %c0_i32 : i32, i32
  }
}

module attributes {stable_mosaic.version = 11 : i64} {
  func.func @_mm_bias_res_relu_kernel(%arg0: i32, %arg1: memref<32x144xbf16, #tpu.memory_space<vmem>>, %arg2: memref<144x16xbf16, #tpu.memory_space<vmem>>, %arg3: memref<1x16xf32, #tpu.memory_space<vmem>>, %arg4: memref<32x16xf32, #tpu.memory_space<vmem>>, %arg5: memref<32x16xf32, #tpu.memory_space<vmem>>) attributes {dimension_semantics = [#tpu.dimension_semantics<parallel>], iteration_bounds = array<i64: 1>, scalar_prefetch = 0 : i64, scratch_operands = 0 : i64, tpu.core_type = #tpu.core_type<tc>, window_params = [{transform_indices = @transform_0, window_bounds = array<i64: 32, 144>}, {pipeline_mode = #tpu.pipeline_mode<synchronous>, transform_indices = @transform_1, window_bounds = array<i64: 144, 16>}, {pipeline_mode = #tpu.pipeline_mode<synchronous>, transform_indices = @transform_2, window_bounds = array<i64: 1, 16>}, {transform_indices = @transform_3, window_bounds = array<i64: 32, 16>}, {transform_indices = @transform_4, window_bounds = array<i64: 32, 16>}]} {
    %c0 = arith.constant 0 : index
    %c0_0 = arith.constant 0 : index
    %0 = vector.load %arg1[%c0, %c0_0] : memref<32x144xbf16, #tpu.memory_space<vmem>>, vector<32x144xbf16>
    %c0_1 = arith.constant 0 : index
    %c0_2 = arith.constant 0 : index
    %1 = vector.load %arg2[%c0_1, %c0_2] : memref<144x16xbf16, #tpu.memory_space<vmem>>, vector<144x16xbf16>
    %cst = arith.constant dense<0.000000e+00> : vector<32x16xf32>
    %2 = tpu.matmul %0, %1, %cst {dimension_numbers = #tpu.dot_dimension_numbers<[1], [0], [0], [1], [0, 0, 1, 1], [], []>} : vector<32x144xbf16>, vector<144x16xbf16>, vector<32x16xf32> -> vector<32x16xf32>
    %c0_3 = arith.constant 0 : index
    %c0_4 = arith.constant 0 : index
    %3 = vector.load %arg3[%c0_3, %c0_4] : memref<1x16xf32, #tpu.memory_space<vmem>>, vector<1x16xf32>
    %4 = vector.broadcast %3 : vector<1x16xf32> to vector<32x16xf32>
    %5 = arith.addf %2, %4 : vector<32x16xf32>
    %c0_5 = arith.constant 0 : index
    %c0_6 = arith.constant 0 : index
    %6 = vector.load %arg4[%c0_5, %c0_6] : memref<32x16xf32, #tpu.memory_space<vmem>>, vector<32x16xf32>
    %7 = arith.addf %5, %6 : vector<32x16xf32>
    %cst_7 = arith.constant 0.000000e+00 : f32
    %8 = vector.broadcast %cst_7 : f32 to vector<32x16xf32>
    %9 = arith.maximumf %7, %8 : vector<32x16xf32>
    %c0_8 = arith.constant 0 : index
    %c0_9 = arith.constant 0 : index
    %10 = vector.load %arg5[%c0_8, %c0_9] : memref<32x16xf32, #tpu.memory_space<vmem>>, vector<32x16xf32>
    tpu.vector_store %arg5[%c0_8, %c0_9], %9 {strides = array<i32>} : memref<32x16xf32, #tpu.memory_space<vmem>>, vector<32x16xf32>,
    return
  }
  func.func @transform_0(%arg0: i32) -> (i32, i32) {
    %c0_i32 = arith.constant 0 : i32
    %c0_i32_0 = arith.constant 0 : i32
    return %arg0, %c0_i32 : i32, i32
  }
  func.func @transform_1(%arg0: i32) -> (i32, i32) {
    %c0_i32 = arith.constant 0 : i32
    %c0_i32_0 = arith.constant 0 : i32
    %c0_i32_1 = arith.constant 0 : i32
    return %c0_i32, %c0_i32_0 : i32, i32
  }
  func.func @transform_2(%arg0: i32) -> (i32, i32) {
    %c0_i32 = arith.constant 0 : i32
    %c0_i32_0 = arith.constant 0 : i32
    %c0_i32_1 = arith.constant 0 : i32
    return %c0_i32, %c0_i32_0 : i32, i32
  }
  func.func @transform_3(%arg0: i32) -> (i32, i32) {
    %c0_i32 = arith.constant 0 : i32
    %c0_i32_0 = arith.constant 0 : i32
    return %arg0, %c0_i32 : i32, i32
  }
  func.func @transform_4(%arg0: i32) -> (i32, i32) {
    %c0_i32 = arith.constant 0 : i32
    %c0_i32_0 = arith.constant 0 : i32
    return %arg0, %c0_i32 : i32, i32
  }
}

module attributes {stable_mosaic.version = 11 : i64} {
  func.func @_mm_bias_kernel(%arg0: i32, %arg1: memref<32x144xbf16, #tpu.memory_space<vmem>>, %arg2: memref<144x16xbf16, #tpu.memory_space<vmem>>, %arg3: memref<1x16xf32, #tpu.memory_space<vmem>>, %arg4: memref<32x16xf32, #tpu.memory_space<vmem>>) attributes {dimension_semantics = [#tpu.dimension_semantics<parallel>], iteration_bounds = array<i64: 1>, scalar_prefetch = 0 : i64, scratch_operands = 0 : i64, tpu.core_type = #tpu.core_type<tc>, window_params = [{transform_indices = @transform_0, window_bounds = array<i64: 32, 144>}, {pipeline_mode = #tpu.pipeline_mode<synchronous>, transform_indices = @transform_1, window_bounds = array<i64: 144, 16>}, {pipeline_mode = #tpu.pipeline_mode<synchronous>, transform_indices = @transform_2, window_bounds = array<i64: 1, 16>}, {transform_indices = @transform_3, window_bounds = array<i64: 32, 16>}]} {
    %c0 = arith.constant 0 : index
    %c0_0 = arith.constant 0 : index
    %0 = vector.load %arg1[%c0, %c0_0] : memref<32x144xbf16, #tpu.memory_space<vmem>>, vector<32x144xbf16>
    %c0_1 = arith.constant 0 : index
    %c0_2 = arith.constant 0 : index
    %1 = vector.load %arg2[%c0_1, %c0_2] : memref<144x16xbf16, #tpu.memory_space<vmem>>, vector<144x16xbf16>
    %cst = arith.constant dense<0.000000e+00> : vector<32x16xf32>
    %2 = tpu.matmul %0, %1, %cst {dimension_numbers = #tpu.dot_dimension_numbers<[1], [0], [0], [1], [0, 0, 1, 1], [], []>} : vector<32x144xbf16>, vector<144x16xbf16>, vector<32x16xf32> -> vector<32x16xf32>
    %c0_3 = arith.constant 0 : index
    %c0_4 = arith.constant 0 : index
    %3 = vector.load %arg3[%c0_3, %c0_4] : memref<1x16xf32, #tpu.memory_space<vmem>>, vector<1x16xf32>
    %4 = vector.broadcast %3 : vector<1x16xf32> to vector<32x16xf32>
    %5 = arith.addf %2, %4 : vector<32x16xf32>
    %cst_5 = arith.constant 0.000000e+00 : f32
    %6 = vector.broadcast %cst_5 : f32 to vector<32x16xf32>
    %7 = arith.maximumf %5, %6 : vector<32x16xf32>
    %c0_6 = arith.constant 0 : index
    %c0_7 = arith.constant 0 : index
    %8 = vector.load %arg4[%c0_6, %c0_7] : memref<32x16xf32, #tpu.memory_space<vmem>>, vector<32x16xf32>
    tpu.vector_store %arg4[%c0_6, %c0_7], %7 {strides = array<i32>} : memref<32x16xf32, #tpu.memory_space<vmem>>, vector<32x16xf32>,
    return
  }
  func.func @transform_0(%arg0: i32) -> (i32, i32) {
    %c0_i32 = arith.constant 0 : i32
    %c0_i32_0 = arith.constant 0 : i32
    return %arg0, %c0_i32 : i32, i32
  }
  func.func @transform_1(%arg0: i32) -> (i32, i32) {
    %c0_i32 = arith.constant 0 : i32
    %c0_i32_0 = arith.constant 0 : i32
    %c0_i32_1 = arith.constant 0 : i32
    return %c0_i32, %c0_i32_0 : i32, i32
  }
  func.func @transform_2(%arg0: i32) -> (i32, i32) {
    %c0_i32 = arith.constant 0 : i32
    %c0_i32_0 = arith.constant 0 : i32
    %c0_i32_1 = arith.constant 0 : i32
    return %c0_i32, %c0_i32_0 : i32, i32
  }
  func.func @transform_3(%arg0: i32) -> (i32, i32) {
    %c0_i32 = arith.constant 0 : i32
    %c0_i32_0 = arith.constant 0 : i32
    return %arg0, %c0_i32 : i32, i32
  }
}

module attributes {stable_mosaic.version = 11 : i64} {
  func.func @_mm_bias_kernel(%arg0: i32, %arg1: memref<8x144xbf16, #tpu.memory_space<vmem>>, %arg2: memref<144x32xbf16, #tpu.memory_space<vmem>>, %arg3: memref<1x32xf32, #tpu.memory_space<vmem>>, %arg4: memref<8x32xf32, #tpu.memory_space<vmem>>) attributes {dimension_semantics = [#tpu.dimension_semantics<parallel>], iteration_bounds = array<i64: 1>, scalar_prefetch = 0 : i64, scratch_operands = 0 : i64, tpu.core_type = #tpu.core_type<tc>, window_params = [{transform_indices = @transform_0, window_bounds = array<i64: 8, 144>}, {pipeline_mode = #tpu.pipeline_mode<synchronous>, transform_indices = @transform_1, window_bounds = array<i64: 144, 32>}, {pipeline_mode = #tpu.pipeline_mode<synchronous>, transform_indices = @transform_2, window_bounds = array<i64: 1, 32>}, {transform_indices = @transform_3, window_bounds = array<i64: 8, 32>}]} {
    %c0 = arith.constant 0 : index
    %c0_0 = arith.constant 0 : index
    %0 = vector.load %arg1[%c0, %c0_0] : memref<8x144xbf16, #tpu.memory_space<vmem>>, vector<8x144xbf16>
    %c0_1 = arith.constant 0 : index
    %c0_2 = arith.constant 0 : index
    %1 = vector.load %arg2[%c0_1, %c0_2] : memref<144x32xbf16, #tpu.memory_space<vmem>>, vector<144x32xbf16>
    %cst = arith.constant dense<0.000000e+00> : vector<8x32xf32>
    %2 = tpu.matmul %0, %1, %cst {dimension_numbers = #tpu.dot_dimension_numbers<[1], [0], [0], [1], [0, 0, 1, 1], [], []>} : vector<8x144xbf16>, vector<144x32xbf16>, vector<8x32xf32> -> vector<8x32xf32>
    %c0_3 = arith.constant 0 : index
    %c0_4 = arith.constant 0 : index
    %3 = vector.load %arg3[%c0_3, %c0_4] : memref<1x32xf32, #tpu.memory_space<vmem>>, vector<1x32xf32>
    %4 = vector.broadcast %3 : vector<1x32xf32> to vector<8x32xf32>
    %5 = arith.addf %2, %4 : vector<8x32xf32>
    %cst_5 = arith.constant 0.000000e+00 : f32
    %6 = vector.broadcast %cst_5 : f32 to vector<8x32xf32>
    %7 = arith.maximumf %5, %6 : vector<8x32xf32>
    %c0_6 = arith.constant 0 : index
    %c0_7 = arith.constant 0 : index
    %8 = vector.load %arg4[%c0_6, %c0_7] : memref<8x32xf32, #tpu.memory_space<vmem>>, vector<8x32xf32>
    tpu.vector_store %arg4[%c0_6, %c0_7], %7 {strides = array<i32>} : memref<8x32xf32, #tpu.memory_space<vmem>>, vector<8x32xf32>,
    return
  }
  func.func @transform_0(%arg0: i32) -> (i32, i32) {
    %c0_i32 = arith.constant 0 : i32
    %c0_i32_0 = arith.constant 0 : i32
    return %arg0, %c0_i32 : i32, i32
  }
  func.func @transform_1(%arg0: i32) -> (i32, i32) {
    %c0_i32 = arith.constant 0 : i32
    %c0_i32_0 = arith.constant 0 : i32
    %c0_i32_1 = arith.constant 0 : i32
    return %c0_i32, %c0_i32_0 : i32, i32
  }
  func.func @transform_2(%arg0: i32) -> (i32, i32) {
    %c0_i32 = arith.constant 0 : i32
    %c0_i32_0 = arith.constant 0 : i32
    %c0_i32_1 = arith.constant 0 : i32
    return %c0_i32, %c0_i32_0 : i32, i32
  }
  func.func @transform_3(%arg0: i32) -> (i32, i32) {
    %c0_i32 = arith.constant 0 : i32
    %c0_i32_0 = arith.constant 0 : i32
    return %arg0, %c0_i32 : i32, i32
  }
}

module attributes {stable_mosaic.version = 11 : i64} {
  func.func @_mm_bias_kernel(%arg0: i32, %arg1: memref<8x288xbf16, #tpu.memory_space<vmem>>, %arg2: memref<288x32xbf16, #tpu.memory_space<vmem>>, %arg3: memref<1x32xf32, #tpu.memory_space<vmem>>, %arg4: memref<8x32xf32, #tpu.memory_space<vmem>>) attributes {dimension_semantics = [#tpu.dimension_semantics<parallel>], iteration_bounds = array<i64: 1>, scalar_prefetch = 0 : i64, scratch_operands = 0 : i64, tpu.core_type = #tpu.core_type<tc>, window_params = [{transform_indices = @transform_0, window_bounds = array<i64: 8, 288>}, {pipeline_mode = #tpu.pipeline_mode<synchronous>, transform_indices = @transform_1, window_bounds = array<i64: 288, 32>}, {pipeline_mode = #tpu.pipeline_mode<synchronous>, transform_indices = @transform_2, window_bounds = array<i64: 1, 32>}, {transform_indices = @transform_3, window_bounds = array<i64: 8, 32>}]} {
    %c0 = arith.constant 0 : index
    %c0_0 = arith.constant 0 : index
    %0 = vector.load %arg1[%c0, %c0_0] : memref<8x288xbf16, #tpu.memory_space<vmem>>, vector<8x288xbf16>
    %c0_1 = arith.constant 0 : index
    %c0_2 = arith.constant 0 : index
    %1 = vector.load %arg2[%c0_1, %c0_2] : memref<288x32xbf16, #tpu.memory_space<vmem>>, vector<288x32xbf16>
    %cst = arith.constant dense<0.000000e+00> : vector<8x32xf32>
    %2 = tpu.matmul %0, %1, %cst {dimension_numbers = #tpu.dot_dimension_numbers<[1], [0], [0], [1], [0, 0, 1, 1], [], []>} : vector<8x288xbf16>, vector<288x32xbf16>, vector<8x32xf32> -> vector<8x32xf32>
    %c0_3 = arith.constant 0 : index
    %c0_4 = arith.constant 0 : index
    %3 = vector.load %arg3[%c0_3, %c0_4] : memref<1x32xf32, #tpu.memory_space<vmem>>, vector<1x32xf32>
    %4 = vector.broadcast %3 : vector<1x32xf32> to vector<8x32xf32>
    %5 = arith.addf %2, %4 : vector<8x32xf32>
    %cst_5 = arith.constant 0.000000e+00 : f32
    %6 = vector.broadcast %cst_5 : f32 to vector<8x32xf32>
    %7 = arith.maximumf %5, %6 : vector<8x32xf32>
    %c0_6 = arith.constant 0 : index
    %c0_7 = arith.constant 0 : index
    %8 = vector.load %arg4[%c0_6, %c0_7] : memref<8x32xf32, #tpu.memory_space<vmem>>, vector<8x32xf32>
    tpu.vector_store %arg4[%c0_6, %c0_7], %7 {strides = array<i32>} : memref<8x32xf32, #tpu.memory_space<vmem>>, vector<8x32xf32>,
    return
  }
  func.func @transform_0(%arg0: i32) -> (i32, i32) {
    %c0_i32 = arith.constant 0 : i32
    %c0_i32_0 = arith.constant 0 : i32
    return %arg0, %c0_i32 : i32, i32
  }
  func.func @transform_1(%arg0: i32) -> (i32, i32) {
    %c0_i32 = arith.constant 0 : i32
    %c0_i32_0 = arith.constant 0 : i32
    %c0_i32_1 = arith.constant 0 : i32
    return %c0_i32, %c0_i32_0 : i32, i32
  }
  func.func @transform_2(%arg0: i32) -> (i32, i32) {
    %c0_i32 = arith.constant 0 : i32
    %c0_i32_0 = arith.constant 0 : i32
    %c0_i32_1 = arith.constant 0 : i32
    return %c0_i32, %c0_i32_0 : i32, i32
  }
  func.func @transform_3(%arg0: i32) -> (i32, i32) {
    %c0_i32 = arith.constant 0 : i32
    %c0_i32_0 = arith.constant 0 : i32
    return %arg0, %c0_i32 : i32, i32
  }
}

module attributes {stable_mosaic.version = 11 : i64} {
  func.func @_mm2_bias_relu_kernel(%arg0: i32, %arg1: memref<8x288xbf16, #tpu.memory_space<vmem>>, %arg2: memref<288x32xbf16, #tpu.memory_space<vmem>>, %arg3: memref<8x16xbf16, #tpu.memory_space<vmem>>, %arg4: memref<16x32xbf16, #tpu.memory_space<vmem>>, %arg5: memref<1x32xf32, #tpu.memory_space<vmem>>, %arg6: memref<8x32xf32, #tpu.memory_space<vmem>>) attributes {dimension_semantics = [#tpu.dimension_semantics<parallel>], iteration_bounds = array<i64: 1>, scalar_prefetch = 0 : i64, scratch_operands = 0 : i64, tpu.core_type = #tpu.core_type<tc>, window_params = [{transform_indices = @transform_0, window_bounds = array<i64: 8, 288>}, {pipeline_mode = #tpu.pipeline_mode<synchronous>, transform_indices = @transform_1, window_bounds = array<i64: 288, 32>}, {transform_indices = @transform_2, window_bounds = array<i64: 8, 16>}, {pipeline_mode = #tpu.pipeline_mode<synchronous>, transform_indices = @transform_3, window_bounds = array<i64: 16, 32>}, {pipeline_mode = #tpu.pipeline_mode<synchronous>, transform_indices = @transform_4, window_bounds = array<i64: 1, 32>}, {transform_indices = @transform_5, window_bounds = array<i64: 8, 32>}]} {
    %c0 = arith.constant 0 : index
    %c0_0 = arith.constant 0 : index
    %0 = vector.load %arg1[%c0, %c0_0] : memref<8x288xbf16, #tpu.memory_space<vmem>>, vector<8x288xbf16>
    %c0_1 = arith.constant 0 : index
    %c0_2 = arith.constant 0 : index
    %1 = vector.load %arg2[%c0_1, %c0_2] : memref<288x32xbf16, #tpu.memory_space<vmem>>, vector<288x32xbf16>
    %cst = arith.constant dense<0.000000e+00> : vector<8x32xf32>
    %2 = tpu.matmul %0, %1, %cst {dimension_numbers = #tpu.dot_dimension_numbers<[1], [0], [0], [1], [0, 0, 1, 1], [], []>} : vector<8x288xbf16>, vector<288x32xbf16>, vector<8x32xf32> -> vector<8x32xf32>
    %c0_3 = arith.constant 0 : index
    %c0_4 = arith.constant 0 : index
    %3 = vector.load %arg3[%c0_3, %c0_4] : memref<8x16xbf16, #tpu.memory_space<vmem>>, vector<8x16xbf16>
    %c0_5 = arith.constant 0 : index
    %c0_6 = arith.constant 0 : index
    %4 = vector.load %arg4[%c0_5, %c0_6] : memref<16x32xbf16, #tpu.memory_space<vmem>>, vector<16x32xbf16>
    %cst_7 = arith.constant dense<0.000000e+00> : vector<8x32xf32>
    %5 = tpu.matmul %3, %4, %cst_7 {dimension_numbers = #tpu.dot_dimension_numbers<[1], [0], [0], [1], [0, 0, 1, 1], [], []>} : vector<8x16xbf16>, vector<16x32xbf16>, vector<8x32xf32> -> vector<8x32xf32>
    %6 = arith.addf %2, %5 : vector<8x32xf32>
    %c0_8 = arith.constant 0 : index
    %c0_9 = arith.constant 0 : index
    %7 = vector.load %arg5[%c0_8, %c0_9] : memref<1x32xf32, #tpu.memory_space<vmem>>, vector<1x32xf32>
    %8 = vector.broadcast %7 : vector<1x32xf32> to vector<8x32xf32>
    %9 = arith.addf %6, %8 : vector<8x32xf32>
    %cst_10 = arith.constant 0.000000e+00 : f32
    %10 = vector.broadcast %cst_10 : f32 to vector<8x32xf32>
    %11 = arith.maximumf %9, %10 : vector<8x32xf32>
    %c0_11 = arith.constant 0 : index
    %c0_12 = arith.constant 0 : index
    %12 = vector.load %arg6[%c0_11, %c0_12] : memref<8x32xf32, #tpu.memory_space<vmem>>, vector<8x32xf32>
    tpu.vector_store %arg6[%c0_11, %c0_12], %11 {strides = array<i32>} : memref<8x32xf32, #tpu.memory_space<vmem>>, vector<8x32xf32>,
    return
  }
  func.func @transform_0(%arg0: i32) -> (i32, i32) {
    %c0_i32 = arith.constant 0 : i32
    %c0_i32_0 = arith.constant 0 : i32
    return %arg0, %c0_i32 : i32, i32
  }
  func.func @transform_1(%arg0: i32) -> (i32, i32) {
    %c0_i32 = arith.constant 0 : i32
    %c0_i32_0 = arith.constant 0 : i32
    %c0_i32_1 = arith.constant 0 : i32
    return %c0_i32, %c0_i32_0 : i32, i32
  }
  func.func @transform_2(%arg0: i32) -> (i32, i32) {
    %c0_i32 = arith.constant 0 : i32
    %c0_i32_0 = arith.constant 0 : i32
    return %arg0, %c0_i32 : i32, i32
  }
  func.func @transform_3(%arg0: i32) -> (i32, i32) {
    %c0_i32 = arith.constant 0 : i32
    %c0_i32_0 = arith.constant 0 : i32
    %c0_i32_1 = arith.constant 0 : i32
    return %c0_i32, %c0_i32_0 : i32, i32
  }
  func.func @transform_4(%arg0: i32) -> (i32, i32) {
    %c0_i32 = arith.constant 0 : i32
    %c0_i32_0 = arith.constant 0 : i32
    %c0_i32_1 = arith.constant 0 : i32
    return %c0_i32, %c0_i32_0 : i32, i32
  }
  func.func @transform_5(%arg0: i32) -> (i32, i32) {
    %c0_i32 = arith.constant 0 : i32
    %c0_i32_0 = arith.constant 0 : i32
    return %arg0, %c0_i32 : i32, i32
  }
}

module attributes {stable_mosaic.version = 11 : i64} {
  func.func @_mm_bias_res_relu_kernel(%arg0: i32, %arg1: memref<8x288xbf16, #tpu.memory_space<vmem>>, %arg2: memref<288x32xbf16, #tpu.memory_space<vmem>>, %arg3: memref<1x32xf32, #tpu.memory_space<vmem>>, %arg4: memref<8x32xf32, #tpu.memory_space<vmem>>, %arg5: memref<8x32xf32, #tpu.memory_space<vmem>>) attributes {dimension_semantics = [#tpu.dimension_semantics<parallel>], iteration_bounds = array<i64: 1>, scalar_prefetch = 0 : i64, scratch_operands = 0 : i64, tpu.core_type = #tpu.core_type<tc>, window_params = [{transform_indices = @transform_0, window_bounds = array<i64: 8, 288>}, {pipeline_mode = #tpu.pipeline_mode<synchronous>, transform_indices = @transform_1, window_bounds = array<i64: 288, 32>}, {pipeline_mode = #tpu.pipeline_mode<synchronous>, transform_indices = @transform_2, window_bounds = array<i64: 1, 32>}, {transform_indices = @transform_3, window_bounds = array<i64: 8, 32>}, {transform_indices = @transform_4, window_bounds = array<i64: 8, 32>}]} {
    %c0 = arith.constant 0 : index
    %c0_0 = arith.constant 0 : index
    %0 = vector.load %arg1[%c0, %c0_0] : memref<8x288xbf16, #tpu.memory_space<vmem>>, vector<8x288xbf16>
    %c0_1 = arith.constant 0 : index
    %c0_2 = arith.constant 0 : index
    %1 = vector.load %arg2[%c0_1, %c0_2] : memref<288x32xbf16, #tpu.memory_space<vmem>>, vector<288x32xbf16>
    %cst = arith.constant dense<0.000000e+00> : vector<8x32xf32>
    %2 = tpu.matmul %0, %1, %cst {dimension_numbers = #tpu.dot_dimension_numbers<[1], [0], [0], [1], [0, 0, 1, 1], [], []>} : vector<8x288xbf16>, vector<288x32xbf16>, vector<8x32xf32> -> vector<8x32xf32>
    %c0_3 = arith.constant 0 : index
    %c0_4 = arith.constant 0 : index
    %3 = vector.load %arg3[%c0_3, %c0_4] : memref<1x32xf32, #tpu.memory_space<vmem>>, vector<1x32xf32>
    %4 = vector.broadcast %3 : vector<1x32xf32> to vector<8x32xf32>
    %5 = arith.addf %2, %4 : vector<8x32xf32>
    %c0_5 = arith.constant 0 : index
    %c0_6 = arith.constant 0 : index
    %6 = vector.load %arg4[%c0_5, %c0_6] : memref<8x32xf32, #tpu.memory_space<vmem>>, vector<8x32xf32>
    %7 = arith.addf %5, %6 : vector<8x32xf32>
    %cst_7 = arith.constant 0.000000e+00 : f32
    %8 = vector.broadcast %cst_7 : f32 to vector<8x32xf32>
    %9 = arith.maximumf %7, %8 : vector<8x32xf32>
    %c0_8 = arith.constant 0 : index
    %c0_9 = arith.constant 0 : index
    %10 = vector.load %arg5[%c0_8, %c0_9] : memref<8x32xf32, #tpu.memory_space<vmem>>, vector<8x32xf32>
    tpu.vector_store %arg5[%c0_8, %c0_9], %9 {strides = array<i32>} : memref<8x32xf32, #tpu.memory_space<vmem>>, vector<8x32xf32>,
    return
  }
  func.func @transform_0(%arg0: i32) -> (i32, i32) {
    %c0_i32 = arith.constant 0 : i32
    %c0_i32_0 = arith.constant 0 : i32
    return %arg0, %c0_i32 : i32, i32
  }
  func.func @transform_1(%arg0: i32) -> (i32, i32) {
    %c0_i32 = arith.constant 0 : i32
    %c0_i32_0 = arith.constant 0 : i32
    %c0_i32_1 = arith.constant 0 : i32
    return %c0_i32, %c0_i32_0 : i32, i32
  }
  func.func @transform_2(%arg0: i32) -> (i32, i32) {
    %c0_i32 = arith.constant 0 : i32
    %c0_i32_0 = arith.constant 0 : i32
    %c0_i32_1 = arith.constant 0 : i32
    return %c0_i32, %c0_i32_0 : i32, i32
  }
  func.func @transform_3(%arg0: i32) -> (i32, i32) {
    %c0_i32 = arith.constant 0 : i32
    %c0_i32_0 = arith.constant 0 : i32
    return %arg0, %c0_i32 : i32, i32
  }
  func.func @transform_4(%arg0: i32) -> (i32, i32) {
    %c0_i32 = arith.constant 0 : i32
    %c0_i32_0 = arith.constant 0 : i32
    return %arg0, %c0_i32 : i32, i32
  }
}

module attributes {stable_mosaic.version = 11 : i64} {
  func.func @_mm_bias_kernel(%arg0: i32, %arg1: memref<8x288xbf16, #tpu.memory_space<vmem>>, %arg2: memref<288x64xbf16, #tpu.memory_space<vmem>>, %arg3: memref<1x64xf32, #tpu.memory_space<vmem>>, %arg4: memref<8x64xf32, #tpu.memory_space<vmem>>) attributes {dimension_semantics = [#tpu.dimension_semantics<parallel>], iteration_bounds = array<i64: 1>, scalar_prefetch = 0 : i64, scratch_operands = 0 : i64, tpu.core_type = #tpu.core_type<tc>, window_params = [{transform_indices = @transform_0, window_bounds = array<i64: 8, 288>}, {pipeline_mode = #tpu.pipeline_mode<synchronous>, transform_indices = @transform_1, window_bounds = array<i64: 288, 64>}, {pipeline_mode = #tpu.pipeline_mode<synchronous>, transform_indices = @transform_2, window_bounds = array<i64: 1, 64>}, {transform_indices = @transform_3, window_bounds = array<i64: 8, 64>}]} {
    %c0 = arith.constant 0 : index
    %c0_0 = arith.constant 0 : index
    %0 = vector.load %arg1[%c0, %c0_0] : memref<8x288xbf16, #tpu.memory_space<vmem>>, vector<8x288xbf16>
    %c0_1 = arith.constant 0 : index
    %c0_2 = arith.constant 0 : index
    %1 = vector.load %arg2[%c0_1, %c0_2] : memref<288x64xbf16, #tpu.memory_space<vmem>>, vector<288x64xbf16>
    %cst = arith.constant dense<0.000000e+00> : vector<8x64xf32>
    %2 = tpu.matmul %0, %1, %cst {dimension_numbers = #tpu.dot_dimension_numbers<[1], [0], [0], [1], [0, 0, 1, 1], [], []>} : vector<8x288xbf16>, vector<288x64xbf16>, vector<8x64xf32> -> vector<8x64xf32>
    %c0_3 = arith.constant 0 : index
    %c0_4 = arith.constant 0 : index
    %3 = vector.load %arg3[%c0_3, %c0_4] : memref<1x64xf32, #tpu.memory_space<vmem>>, vector<1x64xf32>
    %4 = vector.broadcast %3 : vector<1x64xf32> to vector<8x64xf32>
    %5 = arith.addf %2, %4 : vector<8x64xf32>
    %cst_5 = arith.constant 0.000000e+00 : f32
    %6 = vector.broadcast %cst_5 : f32 to vector<8x64xf32>
    %7 = arith.maximumf %5, %6 : vector<8x64xf32>
    %c0_6 = arith.constant 0 : index
    %c0_7 = arith.constant 0 : index
    %8 = vector.load %arg4[%c0_6, %c0_7] : memref<8x64xf32, #tpu.memory_space<vmem>>, vector<8x64xf32>
    tpu.vector_store %arg4[%c0_6, %c0_7], %7 {strides = array<i32>} : memref<8x64xf32, #tpu.memory_space<vmem>>, vector<8x64xf32>,
    return
  }
  func.func @transform_0(%arg0: i32) -> (i32, i32) {
    %c0_i32 = arith.constant 0 : i32
    %c0_i32_0 = arith.constant 0 : i32
    return %arg0, %c0_i32 : i32, i32
  }
  func.func @transform_1(%arg0: i32) -> (i32, i32) {
    %c0_i32 = arith.constant 0 : i32
    %c0_i32_0 = arith.constant 0 : i32
    %c0_i32_1 = arith.constant 0 : i32
    return %c0_i32, %c0_i32_0 : i32, i32
  }
  func.func @transform_2(%arg0: i32) -> (i32, i32) {
    %c0_i32 = arith.constant 0 : i32
    %c0_i32_0 = arith.constant 0 : i32
    %c0_i32_1 = arith.constant 0 : i32
    return %c0_i32, %c0_i32_0 : i32, i32
  }
  func.func @transform_3(%arg0: i32) -> (i32, i32) {
    %c0_i32 = arith.constant 0 : i32
    %c0_i32_0 = arith.constant 0 : i32
    return %arg0, %c0_i32 : i32, i32
  }
}

module attributes {stable_mosaic.version = 11 : i64} {
  func.func @_mm_bias_kernel(%arg0: i32, %arg1: memref<8x576xbf16, #tpu.memory_space<vmem>>, %arg2: memref<576x64xbf16, #tpu.memory_space<vmem>>, %arg3: memref<1x64xf32, #tpu.memory_space<vmem>>, %arg4: memref<8x64xf32, #tpu.memory_space<vmem>>) attributes {dimension_semantics = [#tpu.dimension_semantics<parallel>], iteration_bounds = array<i64: 1>, scalar_prefetch = 0 : i64, scratch_operands = 0 : i64, tpu.core_type = #tpu.core_type<tc>, window_params = [{transform_indices = @transform_0, window_bounds = array<i64: 8, 576>}, {pipeline_mode = #tpu.pipeline_mode<synchronous>, transform_indices = @transform_1, window_bounds = array<i64: 576, 64>}, {pipeline_mode = #tpu.pipeline_mode<synchronous>, transform_indices = @transform_2, window_bounds = array<i64: 1, 64>}, {transform_indices = @transform_3, window_bounds = array<i64: 8, 64>}]} {
    %c0 = arith.constant 0 : index
    %c0_0 = arith.constant 0 : index
    %0 = vector.load %arg1[%c0, %c0_0] : memref<8x576xbf16, #tpu.memory_space<vmem>>, vector<8x576xbf16>
    %c0_1 = arith.constant 0 : index
    %c0_2 = arith.constant 0 : index
    %1 = vector.load %arg2[%c0_1, %c0_2] : memref<576x64xbf16, #tpu.memory_space<vmem>>, vector<576x64xbf16>
    %cst = arith.constant dense<0.000000e+00> : vector<8x64xf32>
    %2 = tpu.matmul %0, %1, %cst {dimension_numbers = #tpu.dot_dimension_numbers<[1], [0], [0], [1], [0, 0, 1, 1], [], []>} : vector<8x576xbf16>, vector<576x64xbf16>, vector<8x64xf32> -> vector<8x64xf32>
    %c0_3 = arith.constant 0 : index
    %c0_4 = arith.constant 0 : index
    %3 = vector.load %arg3[%c0_3, %c0_4] : memref<1x64xf32, #tpu.memory_space<vmem>>, vector<1x64xf32>
    %4 = vector.broadcast %3 : vector<1x64xf32> to vector<8x64xf32>
    %5 = arith.addf %2, %4 : vector<8x64xf32>
    %cst_5 = arith.constant 0.000000e+00 : f32
    %6 = vector.broadcast %cst_5 : f32 to vector<8x64xf32>
    %7 = arith.maximumf %5, %6 : vector<8x64xf32>
    %c0_6 = arith.constant 0 : index
    %c0_7 = arith.constant 0 : index
    %8 = vector.load %arg4[%c0_6, %c0_7] : memref<8x64xf32, #tpu.memory_space<vmem>>, vector<8x64xf32>
    tpu.vector_store %arg4[%c0_6, %c0_7], %7 {strides = array<i32>} : memref<8x64xf32, #tpu.memory_space<vmem>>, vector<8x64xf32>,
    return
  }
  func.func @transform_0(%arg0: i32) -> (i32, i32) {
    %c0_i32 = arith.constant 0 : i32
    %c0_i32_0 = arith.constant 0 : i32
    return %arg0, %c0_i32 : i32, i32
  }
  func.func @transform_1(%arg0: i32) -> (i32, i32) {
    %c0_i32 = arith.constant 0 : i32
    %c0_i32_0 = arith.constant 0 : i32
    %c0_i32_1 = arith.constant 0 : i32
    return %c0_i32, %c0_i32_0 : i32, i32
  }
  func.func @transform_2(%arg0: i32) -> (i32, i32) {
    %c0_i32 = arith.constant 0 : i32
    %c0_i32_0 = arith.constant 0 : i32
    %c0_i32_1 = arith.constant 0 : i32
    return %c0_i32, %c0_i32_0 : i32, i32
  }
  func.func @transform_3(%arg0: i32) -> (i32, i32) {
    %c0_i32 = arith.constant 0 : i32
    %c0_i32_0 = arith.constant 0 : i32
    return %arg0, %c0_i32 : i32, i32
  }
}

module attributes {stable_mosaic.version = 11 : i64} {
  func.func @_mm2_bias_relu_kernel(%arg0: i32, %arg1: memref<8x576xbf16, #tpu.memory_space<vmem>>, %arg2: memref<576x64xbf16, #tpu.memory_space<vmem>>, %arg3: memref<8x32xbf16, #tpu.memory_space<vmem>>, %arg4: memref<32x64xbf16, #tpu.memory_space<vmem>>, %arg5: memref<1x64xf32, #tpu.memory_space<vmem>>, %arg6: memref<8x64xf32, #tpu.memory_space<vmem>>) attributes {dimension_semantics = [#tpu.dimension_semantics<parallel>], iteration_bounds = array<i64: 1>, scalar_prefetch = 0 : i64, scratch_operands = 0 : i64, tpu.core_type = #tpu.core_type<tc>, window_params = [{transform_indices = @transform_0, window_bounds = array<i64: 8, 576>}, {pipeline_mode = #tpu.pipeline_mode<synchronous>, transform_indices = @transform_1, window_bounds = array<i64: 576, 64>}, {transform_indices = @transform_2, window_bounds = array<i64: 8, 32>}, {pipeline_mode = #tpu.pipeline_mode<synchronous>, transform_indices = @transform_3, window_bounds = array<i64: 32, 64>}, {pipeline_mode = #tpu.pipeline_mode<synchronous>, transform_indices = @transform_4, window_bounds = array<i64: 1, 64>}, {transform_indices = @transform_5, window_bounds = array<i64: 8, 64>}]} {
    %c0 = arith.constant 0 : index
    %c0_0 = arith.constant 0 : index
    %0 = vector.load %arg1[%c0, %c0_0] : memref<8x576xbf16, #tpu.memory_space<vmem>>, vector<8x576xbf16>
    %c0_1 = arith.constant 0 : index
    %c0_2 = arith.constant 0 : index
    %1 = vector.load %arg2[%c0_1, %c0_2] : memref<576x64xbf16, #tpu.memory_space<vmem>>, vector<576x64xbf16>
    %cst = arith.constant dense<0.000000e+00> : vector<8x64xf32>
    %2 = tpu.matmul %0, %1, %cst {dimension_numbers = #tpu.dot_dimension_numbers<[1], [0], [0], [1], [0, 0, 1, 1], [], []>} : vector<8x576xbf16>, vector<576x64xbf16>, vector<8x64xf32> -> vector<8x64xf32>
    %c0_3 = arith.constant 0 : index
    %c0_4 = arith.constant 0 : index
    %3 = vector.load %arg3[%c0_3, %c0_4] : memref<8x32xbf16, #tpu.memory_space<vmem>>, vector<8x32xbf16>
    %c0_5 = arith.constant 0 : index
    %c0_6 = arith.constant 0 : index
    %4 = vector.load %arg4[%c0_5, %c0_6] : memref<32x64xbf16, #tpu.memory_space<vmem>>, vector<32x64xbf16>
    %cst_7 = arith.constant dense<0.000000e+00> : vector<8x64xf32>
    %5 = tpu.matmul %3, %4, %cst_7 {dimension_numbers = #tpu.dot_dimension_numbers<[1], [0], [0], [1], [0, 0, 1, 1], [], []>} : vector<8x32xbf16>, vector<32x64xbf16>, vector<8x64xf32> -> vector<8x64xf32>
    %6 = arith.addf %2, %5 : vector<8x64xf32>
    %c0_8 = arith.constant 0 : index
    %c0_9 = arith.constant 0 : index
    %7 = vector.load %arg5[%c0_8, %c0_9] : memref<1x64xf32, #tpu.memory_space<vmem>>, vector<1x64xf32>
    %8 = vector.broadcast %7 : vector<1x64xf32> to vector<8x64xf32>
    %9 = arith.addf %6, %8 : vector<8x64xf32>
    %cst_10 = arith.constant 0.000000e+00 : f32
    %10 = vector.broadcast %cst_10 : f32 to vector<8x64xf32>
    %11 = arith.maximumf %9, %10 : vector<8x64xf32>
    %c0_11 = arith.constant 0 : index
    %c0_12 = arith.constant 0 : index
    %12 = vector.load %arg6[%c0_11, %c0_12] : memref<8x64xf32, #tpu.memory_space<vmem>>, vector<8x64xf32>
    tpu.vector_store %arg6[%c0_11, %c0_12], %11 {strides = array<i32>} : memref<8x64xf32, #tpu.memory_space<vmem>>, vector<8x64xf32>,
    return
  }
  func.func @transform_0(%arg0: i32) -> (i32, i32) {
    %c0_i32 = arith.constant 0 : i32
    %c0_i32_0 = arith.constant 0 : i32
    return %arg0, %c0_i32 : i32, i32
  }
  func.func @transform_1(%arg0: i32) -> (i32, i32) {
    %c0_i32 = arith.constant 0 : i32
    %c0_i32_0 = arith.constant 0 : i32
    %c0_i32_1 = arith.constant 0 : i32
    return %c0_i32, %c0_i32_0 : i32, i32
  }
  func.func @transform_2(%arg0: i32) -> (i32, i32) {
    %c0_i32 = arith.constant 0 : i32
    %c0_i32_0 = arith.constant 0 : i32
    return %arg0, %c0_i32 : i32, i32
  }
  func.func @transform_3(%arg0: i32) -> (i32, i32) {
    %c0_i32 = arith.constant 0 : i32
    %c0_i32_0 = arith.constant 0 : i32
    %c0_i32_1 = arith.constant 0 : i32
    return %c0_i32, %c0_i32_0 : i32, i32
  }
  func.func @transform_4(%arg0: i32) -> (i32, i32) {
    %c0_i32 = arith.constant 0 : i32
    %c0_i32_0 = arith.constant 0 : i32
    %c0_i32_1 = arith.constant 0 : i32
    return %c0_i32, %c0_i32_0 : i32, i32
  }
  func.func @transform_5(%arg0: i32) -> (i32, i32) {
    %c0_i32 = arith.constant 0 : i32
    %c0_i32_0 = arith.constant 0 : i32
    return %arg0, %c0_i32 : i32, i32
  }
}

module attributes {stable_mosaic.version = 11 : i64} {
  func.func @_mm_bias_res_relu_kernel(%arg0: i32, %arg1: memref<8x576xbf16, #tpu.memory_space<vmem>>, %arg2: memref<576x64xbf16, #tpu.memory_space<vmem>>, %arg3: memref<1x64xf32, #tpu.memory_space<vmem>>, %arg4: memref<8x64xf32, #tpu.memory_space<vmem>>, %arg5: memref<8x64xf32, #tpu.memory_space<vmem>>) attributes {dimension_semantics = [#tpu.dimension_semantics<parallel>], iteration_bounds = array<i64: 1>, scalar_prefetch = 0 : i64, scratch_operands = 0 : i64, tpu.core_type = #tpu.core_type<tc>, window_params = [{transform_indices = @transform_0, window_bounds = array<i64: 8, 576>}, {pipeline_mode = #tpu.pipeline_mode<synchronous>, transform_indices = @transform_1, window_bounds = array<i64: 576, 64>}, {pipeline_mode = #tpu.pipeline_mode<synchronous>, transform_indices = @transform_2, window_bounds = array<i64: 1, 64>}, {transform_indices = @transform_3, window_bounds = array<i64: 8, 64>}, {transform_indices = @transform_4, window_bounds = array<i64: 8, 64>}]} {
    %c0 = arith.constant 0 : index
    %c0_0 = arith.constant 0 : index
    %0 = vector.load %arg1[%c0, %c0_0] : memref<8x576xbf16, #tpu.memory_space<vmem>>, vector<8x576xbf16>
    %c0_1 = arith.constant 0 : index
    %c0_2 = arith.constant 0 : index
    %1 = vector.load %arg2[%c0_1, %c0_2] : memref<576x64xbf16, #tpu.memory_space<vmem>>, vector<576x64xbf16>
    %cst = arith.constant dense<0.000000e+00> : vector<8x64xf32>
    %2 = tpu.matmul %0, %1, %cst {dimension_numbers = #tpu.dot_dimension_numbers<[1], [0], [0], [1], [0, 0, 1, 1], [], []>} : vector<8x576xbf16>, vector<576x64xbf16>, vector<8x64xf32> -> vector<8x64xf32>
    %c0_3 = arith.constant 0 : index
    %c0_4 = arith.constant 0 : index
    %3 = vector.load %arg3[%c0_3, %c0_4] : memref<1x64xf32, #tpu.memory_space<vmem>>, vector<1x64xf32>
    %4 = vector.broadcast %3 : vector<1x64xf32> to vector<8x64xf32>
    %5 = arith.addf %2, %4 : vector<8x64xf32>
    %c0_5 = arith.constant 0 : index
    %c0_6 = arith.constant 0 : index
    %6 = vector.load %arg4[%c0_5, %c0_6] : memref<8x64xf32, #tpu.memory_space<vmem>>, vector<8x64xf32>
    %7 = arith.addf %5, %6 : vector<8x64xf32>
    %cst_7 = arith.constant 0.000000e+00 : f32
    %8 = vector.broadcast %cst_7 : f32 to vector<8x64xf32>
    %9 = arith.maximumf %7, %8 : vector<8x64xf32>
    %c0_8 = arith.constant 0 : index
    %c0_9 = arith.constant 0 : index
    %10 = vector.load %arg5[%c0_8, %c0_9] : memref<8x64xf32, #tpu.memory_space<vmem>>, vector<8x64xf32>
    tpu.vector_store %arg5[%c0_8, %c0_9], %9 {strides = array<i32>} : memref<8x64xf32, #tpu.memory_space<vmem>>, vector<8x64xf32>,
    return
  }
  func.func @transform_0(%arg0: i32) -> (i32, i32) {
    %c0_i32 = arith.constant 0 : i32
    %c0_i32_0 = arith.constant 0 : i32
    return %arg0, %c0_i32 : i32, i32
  }
  func.func @transform_1(%arg0: i32) -> (i32, i32) {
    %c0_i32 = arith.constant 0 : i32
    %c0_i32_0 = arith.constant 0 : i32
    %c0_i32_1 = arith.constant 0 : i32
    return %c0_i32, %c0_i32_0 : i32, i32
  }
  func.func @transform_2(%arg0: i32) -> (i32, i32) {
    %c0_i32 = arith.constant 0 : i32
    %c0_i32_0 = arith.constant 0 : i32
    %c0_i32_1 = arith.constant 0 : i32
    return %c0_i32, %c0_i32_0 : i32, i32
  }
  func.func @transform_3(%arg0: i32) -> (i32, i32) {
    %c0_i32 = arith.constant 0 : i32
    %c0_i32_0 = arith.constant 0 : i32
    return %arg0, %c0_i32 : i32, i32
  }
  func.func @transform_4(%arg0: i32) -> (i32, i32) {
    %c0_i32 = arith.constant 0 : i32
    %c0_i32_0 = arith.constant 0 : i32
    return %arg0, %c0_i32 : i32, i32
  }
}

module attributes {stable_mosaic.version = 11 : i64} {
  func.func @_gap_fc_kernel(%arg0: memref<8x1x64xf32, #tpu.memory_space<vmem>>, %arg1: memref<64x60xf32, #tpu.memory_space<vmem>>, %arg2: memref<1x60xf32, #tpu.memory_space<vmem>>, %arg3: memref<8x60xf32, #tpu.memory_space<vmem>>) attributes {dimension_semantics = [], scalar_prefetch = 0 : i64, scratch_operands = 0 : i64, tpu.core_type = #tpu.core_type<tc>} {
    %c0 = arith.constant 0 : index
    %c0_0 = arith.constant 0 : index
    %c0_1 = arith.constant 0 : index
    %0 = vector.load %arg0[%c0, %c0_0, %c0_1] : memref<8x1x64xf32, #tpu.memory_space<vmem>>, vector<8x1x64xf32>
    %cst = arith.constant dense<0.000000e+00> : vector<8x64xf32>
    %1 = vector.multi_reduction <add>, %0, %cst [1] : vector<8x1x64xf32> to vector<8x64xf32>
    %cst_2 = arith.constant 1.000000e+00 : f32
    %2 = vector.broadcast %cst_2 : f32 to vector<8x64xf32>
    %3 = arith.mulf %1, %2 : vector<8x64xf32>
    %c0_3 = arith.constant 0 : index
    %c0_4 = arith.constant 0 : index
    %4 = vector.load %arg1[%c0_3, %c0_4] : memref<64x60xf32, #tpu.memory_space<vmem>>, vector<64x60xf32>
    %cst_5 = arith.constant dense<0.000000e+00> : vector<8x60xf32>
    %5 = tpu.matmul %3, %4, %cst_5 {dimension_numbers = #tpu.dot_dimension_numbers<[1], [0], [0], [1], [0, 0, 1, 1], [], []>} : vector<8x64xf32>, vector<64x60xf32>, vector<8x60xf32> -> vector<8x60xf32>
    %c0_6 = arith.constant 0 : index
    %c0_7 = arith.constant 0 : index
    %6 = vector.load %arg2[%c0_6, %c0_7] : memref<1x60xf32, #tpu.memory_space<vmem>>, vector<1x60xf32>
    %7 = vector.broadcast %6 : vector<1x60xf32> to vector<8x60xf32>
    %8 = arith.addf %5, %7 : vector<8x60xf32>
    %c0_8 = arith.constant 0 : index
    %c0_9 = arith.constant 0 : index
    %9 = vector.load %arg3[%c0_8, %c0_9] : memref<8x60xf32, #tpu.memory_space<vmem>>, vector<8x60xf32>
    tpu.vector_store %arg3[%c0_8, %c0_9], %8 {strides = array<i32>} : memref<8x60xf32, #tpu.memory_space<vmem>>, vector<8x60xf32>,
    return
  }
}

</mosaic_0001>

<bundles_post_ra>
// kernel: model_forward.19
= control target key start
LH: loop header
LB: loop body
LE: loop exit
PB: predicated region body
PF: predicated region fallthrough
CT: control target
= control target key end

     0   :  { %s1314_s0 = inlined_call_operand.vmem [shape: f32[3,1024], index: 0, kind: input, shape index: {}]   ;;  %s1315_s1 = inlined_call_operand.vmem [shape: f32[1,1024], index: 1, kind: output, shape index: {}]  }
   0x1   :  { %v8_v0 = vld [vmem:[%s1314_s0] sm:$0x77]  ;;  %v9_v1 = vld [vmem:[%s1314_s0 + $0x8] sm:$0x77]  ;;  %v10_v2 = vld [vmem:[%s1314_s0 + $0x10] sm:$0x77] }
   0x2   :  { %v12_v3 = vmul.f32 %v8_v0, %v8_v0  ;;  %v13_v4 = vmul.f32 %v9_v1, %v9_v1  ;;  %v14_v5 = vmul.f32 %v10_v2, %v10_v2  ;;  %v11_v40 = vld [vmem:[%s1314_s0 + $0x18] sm:$0x77] }
   0x3   :  { %v15_v47 = vmul.f32 %v11_v40, %v11_v40 }
   0x4   :  { %v751_v6 = vrot.slane %v12_v3, 9  ;;  %v752_v7 = vrot.slane %v13_v4, 9  ;;  %v753_v8 = vrot.slane %v14_v5, 9  ;;  %v755_v9 = vrot.slane %v12_v3, 10 }
   0x5   :  { %v756_v10 = vrot.slane %v13_v4, 10  ;;  %v757_v11 = vrot.slane %v14_v5, 10  ;;  %v754_v53 = vrot.slane %v15_v47, 9  ;;  %v758_v63 = vrot.slane %v15_v47, 10 }
   0x6   :  { %v32_v12 = vadd.f32 %v751_v6, %v12_v3  ;;  %v33_v13 = vadd.f32 %v752_v7, %v13_v4  ;;  %v34_v14 = vadd.f32 %v753_v8, %v14_v5 }
   0x7   :  { %v35_v62 = vadd.f32 %v754_v53, %v15_v47 }
   0x8   :  { %v48_v15 = vadd.f32 %v755_v9, %v32_v12  ;;  %v49_v16 = vadd.f32 %v756_v10, %v33_v13  ;;  %v50_v17 = vadd.f32 %v757_v11, %v34_v14  ;;  %v786_v11 = vmov 683565275  }
   0x9   :  { %v830_v6 = vadd.f32 %v758_v63, %v35_v62  ;;  %v787_v13 = vmov 2475754826  }
   0xa   :  { %778 = vrsqrt.f32 %v48_v15  ;;  %vm59_vm0 = vcmp.eq.f32.partialorder %v48_v15, inf  ;;  %vm61_vm1 = vcmp.eq.f32.partialorder %v48_v15, 0.0  ;;  %v62_v34 = vand.u32 2147483648, %v48_v15 }
   0xb   :  { %780 = vrsqrt.f32 %v49_v16  ;;  %vm71_vm2 = vcmp.eq.f32.partialorder %v49_v16, inf  ;;  %v74_v37 = vand.u32 2147483648, %v49_v16  ;;  %vm73_vm3 = vcmp.eq.f32.partialorder %v49_v16, 0.0 }
   0xc   :  { %782 = vrsqrt.f32 %v50_v17  ;;  %vm83_vm4 = vcmp.eq.f32.partialorder %v50_v17, inf  ;;  %v86_v48 = vand.u32 2147483648, %v50_v17  ;;  %vm85_vm5 = vcmp.eq.f32.partialorder %v50_v17, 0.0 }
   0xd   :  { %784 = vrsqrt.f32 %v830_v6 }
  0x10   :  { %v779_v18 = vpop.eup %778 }
  0x11   :  { %v781_v19 = vpop.eup %780  ;;  %v53_v20 = vmul.f32 %v779_v18, %v48_v15 }
  0x12   :  { %v783_v21 = vpop.eup %782  ;;  %v65_v22 = vmul.f32 %v781_v19, %v49_v16 }
  0x13   :  { %v54_v23 = vmul.f32 %v779_v18, %v53_v20  ;;  %v77_v24 = vmul.f32 %v783_v21, %v50_v17 }
  0x14   :  { %v66_v25 = vmul.f32 %v781_v19, %v65_v22 }
  0x15   :  { %v55_v26 = vmul.f32 0.5, %v54_v23  ;;  %v78_v27 = vmul.f32 %v783_v21, %v77_v24 }
  0x16   :  { %v67_v28 = vmul.f32 0.5, %v66_v25 }
  0x17   :  { %v56_v29 = vsub.f32 1.5, %v55_v26  ;;  %v79_v30 = vmul.f32 0.5, %v78_v27 }
  0x18   :  { %v68_v31 = vsub.f32 1.5, %v67_v28  ;;  %v791_v28 = vmov 1326507024  }
  0x19   :  { %v57_v32 = vmul.f32 %v779_v18, %v56_v29  ;;  %v80_v33 = vsub.f32 1.5, %v79_v30 }
  0x1a   :  { %v69_v35 = vmul.f32 %v781_v19, %v68_v31  ;;  %v790_v19 = vmov 920167782  }
  0x1b   :  { %v58_v36 = vmul.f32 %v57_v32, %v48_v15  ;;  %v81_v38 = vmul.f32 %v783_v21, %v80_v33 }
  0x1c   :  { %v70_v39 = vmul.f32 %v69_v35, %v49_v16 }
  0x1d   :  { %v60_v41 = vsel %vm59_vm0, %v48_v15, %v58_v36  ;;  %v82_v42 = vmul.f32 %v81_v38, %v50_v17  ;;  %v788_v15 = vmov 2131351028  }
  0x1e   :  { %v63_v43 = vsel %vm61_vm1, %v62_v34, %v60_v41  ;;  %v72_v44 = vsel %vm71_vm2, %v49_v16, %v70_v39 }
  0x1f   :  { %v75_v45 = vsel %vm73_vm3, %v74_v37, %v72_v44  ;;  %v815_v46 = vmul.f32 25132.742, %v63_v43  ;;  %v84_v50 = vsel %vm83_vm4, %v50_v17, %v82_v42  ;;  %v789_v17 = vmov 2102212464  }
  0x20   :  { %v817_v49 = vmul.f32 25132.742, %v75_v45  ;;  %v87_v54 = vsel %vm85_vm5, %v86_v48, %v84_v50 }
  0x21   :  { %v107_v51 = vand.u32 2139095040, %v815_v46  ;;  %v104_v57 = vand.u32 2147483647, %v815_v46  ;;  %v822_v60 = vmul.f32 25132.742, %v87_v54 }
  0x22   :  { %v261_v52 = vand.u32 2139095040, %v817_v49  ;;  %v258_v61 = vand.u32 2147483647, %v817_v49 }
  0x23   :  { %v108_v55 = vshrl.u32 %v107_v51, 23  ;;  %v111_v1 = vand.u32 8388607, %v104_v57  ;;  %v415_v5 = vand.u32 2139095040, %v822_v60 }
  0x24   :  { %v262_v56 = vshrl.u32 %v261_v52, 23  ;;  %v265_v4 = vand.u32 8388607, %v258_v61 }
  0x25   :  { %v759_v58 = vadd.s32 4294967169, %v108_v55  ;;  %v112_v8 = vor.u32 8388608, %v111_v1  ;;  %v416_v22 = vshrl.u32 %v415_v5, 23 }
  0x26   :  { %v762_v59 = vadd.s32 4294967169, %v262_v56  ;;  %v266_v21 = vor.u32 8388608, %v265_v4 }
  0x27   :  { %v114_v0 = vadd.s32 1, %v759_v58  ;;  %v853_v30 = vshll.u32 %v112_v8, 8  ;;  %v765_v42 = vadd.s32 4294967169, %v416_v22 }
  0x28   :  { %v268_v2 = vadd.s32 1, %v762_v59  ;;  %v876_v41 = vshll.u32 %v266_v21, 8 }
  0x29   :  { %vm115_vm6 = vcmp.gt.s32.totalorder %v114_v0, 0  ;;  %v153_v45 = vand.u32 65535, %v853_v30  ;;  %v154_v47 = vshrl.u32 %v853_v30, 16  ;;  %v422_v59 = vadd.s32 1, %v765_v42 }
  0x2a   :  { %v116_v3 = vsel %vm115_vm6, %v114_v0, 0  ;;  %vm269_vm7 = vcmp.gt.s32.totalorder %v268_v2, 0  ;;  %v893_v56 = vand.u32 65535, %v876_v41  ;;  %v896_v58 = vshrl.u32 %v876_v41, 16 }
  0x2b   :  { %v118_v7 = vand.u32 31, %v116_v3  ;;  %v832_v9 = vshrl.u32 %v116_v3, 5  ;;  %v270_v26 = vsel %vm269_vm7, %v268_v2, 0  ;;  %vm423_vm15 = vcmp.gt.s32.totalorder %v422_v59, 0 }
  0x2c   :  { %v272_v36 = vand.u32 31, %v270_v26  ;;  %v902_v1 = vshrl.u32 %v270_v26, 5 }
  0x2d   :  { %v834_v10 = vsub.s32 32, %v118_v7  ;;  %v121_v12 = vshll.u32 %v786_v11, %v118_v7  ;;  %v124_v14 = vshll.u32 %v787_v13, %v118_v7  ;;  %v127_v16 = vshll.u32 %v788_v15, %v118_v7 }
  0x2e   :  { %v130_v18 = vshll.u32 %v789_v17, %v118_v7  ;;  %v133_v20 = vshll.u32 %v790_v19, %v118_v7  ;;  %vm136_vm8 = vcmp.lt.s32.totalorder %v832_v9, 1  ;;  %vm139_vm9 = vcmp.lt.s32.totalorder %v832_v9, 4 }
  0x2f   :  { %v122_v23 = vshrl.u32 %v787_v13, %v834_v10  ;;  %v125_v24 = vshrl.u32 %v788_v15, %v834_v10  ;;  %v128_v25 = vshrl.u32 %v789_v17, %v834_v10  ;;  %v131_v27 = vshrl.u32 %v790_v19, %v834_v10 }
  0x30   :  { %v134_v29 = vshrl.u32 %v791_v28, %v834_v10  ;;  %vm138_vm10 = vcmp.lt.s32.totalorder %v832_v9, 3  ;;  %vm137_vm11 = vcmp.lt.s32.totalorder %v832_v9, 2  ;;  %v890_v51 = vsub.s32 32, %v272_v36 }
  0x31   :  { %v855_v31 = vor.u32 %v122_v23, %v121_v12  ;;  %v857_v32 = vor.u32 %v125_v24, %v124_v14  ;;  %v859_v33 = vor.u32 %v128_v25, %v127_v16  ;;  %v132_v34 = vor.u32 %v131_v27, %v130_v18  ;;  %v914_v16 = vpop.eup %784 }
  0x32   :  { %v135_v35 = vor.u32 %v134_v29, %v133_v20  ;;  %v275_v5 = vshll.u32 %v786_v11, %v272_v36  ;;  %v276_v12 = vshrl.u32 %v787_v13, %v890_v51  ;;  %v278_v14 = vshll.u32 %v787_v13, %v272_v36 }
  0x33   :  { %v144_v37 = vsel %vm136_vm8, %v855_v31, %v857_v32  ;;  %v148_v38 = vsel %vm136_vm8, %v857_v32, %v859_v33  ;;  %v145_v39 = vsel %vm139_vm9, %v132_v34, 920167782  ;;  %v279_v20 = vshrl.u32 %v788_v15, %v890_v51 }
  0x34   :  { %v149_v40 = vsel %vm139_vm9, %v135_v35, 1326507024  ;;  %v146_v43 = vsel %vm138_vm10, %v859_v33, %v145_v39  ;;  %v281_v21 = vshll.u32 %v788_v15, %v272_v36  ;;  %v282_v22 = vshrl.u32 %v789_v17, %v890_v51 }
  0x35   :  { %v150_v44 = vsel %vm138_vm10, %v132_v34, %v149_v40  ;;  %v147_v48 = vsel %vm137_vm11, %v144_v37, %v146_v43  ;;  %v284_v25 = vshll.u32 %v789_v17, %v272_v36  ;;  %v285_v29 = vshrl.u32 %v790_v19, %v890_v51 }
  0x36   :  { %v151_v50 = vsel %vm137_vm11, %v148_v38, %v150_v44  ;;  %v177_v54 = vand.u32 65535, %v147_v48  ;;  %v178_v55 = vshrl.u32 %v147_v48, 16  ;;  %v792_v34 = vmov 0  }
  0x37   :  { %v155_v52 = vand.u32 65535, %v151_v50  ;;  %v156_v53 = vshrl.u32 %v151_v50, 16  ;;  %v287_v38 = vshll.u32 %v790_v19, %v272_v36  ;;  %v277_v40 = vor.u32 %v276_v12, %v275_v5 }
  0x38   :  { %v179_v2 = vmul.u32 %v177_v54, %v153_v45  ;;  %v904_v3 = vmul.u32 %v178_v55, %v153_v45  ;;  %v906_v4 = vmul.u32 %v177_v54, %v154_v47  ;;  %v182_v37 = vmul.u32 %v178_v55, %v154_v47 }
  0x39   :  { %v157_v62 = vmul.u32 %v155_v52, %v153_v45  ;;  %v898_v63 = vmul.u32 %v156_v53, %v153_v45  ;;  %v900_v0 = vmul.u32 %v155_v52, %v154_v47  ;;  %v160_v26 = vmul.u32 %v156_v53, %v154_v47 }
  0x3a   :  { %v183_v18 = vshll.u32 %v904_v3, 16  ;;  %v185_v24 = vshll.u32 %v906_v4, 16  ;;  %v929_v42 = vor.u32 %v279_v20, %v278_v14  ;;  %v283_v43 = vor.u32 %v282_v22, %v281_v21 }
  0x3b   :  { %v161_v7 = vshll.u32 %v898_v63, 16  ;;  %v163_v8 = vshll.u32 %v900_v0, 16  ;;  %v286_v44 = vor.u32 %v285_v29, %v284_v25  ;;  %v288_v45 = vshrl.u32 %v791_v28, %v890_v51 }
  0x3c   :  { %vm187_vm13 = vc.u32 %v179_v2, %v183_v18  ;;  %v189_v27 = vadd.s32 %v183_v18, %v179_v2  ;;  %vm290_vm1 = vcmp.lt.s32.totalorder %v902_v1, 1  ;;  %vm292_vm2 = vcmp.lt.s32.totalorder %v902_v1, 3 }
  0x3d   :  { %vm165_vm12 = vc.u32 %v157_v62, %v161_v7  ;;  %v167_v23 = vadd.s32 %v161_v7, %v157_v62  ;;  %v188_v39 = vsel %vm187_vm13, 1, %v792_v34  ;;  %v289_v47 = vor.u32 %v288_v45, %v287_v38 }
  0x3e   :  { %v166_v35 = vsel %vm165_vm12, 1, %v792_v34  ;;  %vm191_vm0 = vc.u32 %v189_v27, %v185_v24  ;;  %v190_v36 = vadd.s32 %v188_v39, %v182_v37  ;;  %vm291_vm3 = vcmp.lt.s32.totalorder %v902_v1, 2 }
  0x3f   :  { %vm169_vm14 = vc.u32 %v167_v23, %v163_v8  ;;  %v168_v48 = vadd.s32 %v166_v35, %v160_v26  ;;  %vm293_vm4 = vcmp.lt.s32.totalorder %v902_v1, 4  ;;  %v120_v52 = vshrl.u32 %v786_v11, %v834_v10 }
  0x40   :  { %v170_v50 = vsel %vm169_vm14, 1, %v792_v34  ;;  %v192_v53 = vsel %vm191_vm0, 1, %v792_v34  ;;  %v298_v54 = vsel %vm290_vm1, %v277_v40, %v929_v42  ;;  %v299_v55 = vsel %vm293_vm4, %v286_v44, 920167782 }
  0x41   :  { %v141_v62 = vsel %vm139_vm9, %v859_v33, 2102212464  ;;  %v300_v2 = vsel %vm292_vm2, %v283_v43, %v299_v55  ;;  %v302_v10 = vsel %vm290_vm1, %v929_v42, %v283_v43  ;;  %v955_v5 = vsel %vm423_vm15, %v422_v59, 0 }
  0x42   :  { %v162_v7 = vshrl.u32 %v898_v63, 16  ;;  %v172_v8 = vadd.s32 %v170_v50, %v168_v48  ;;  %v301_v12 = vsel %vm291_vm3, %v298_v54, %v300_v2  ;;  %v303_v14 = vsel %vm293_vm4, %v289_v47, 1326507024 }
  0x43   :  { %v184_v33 = vshrl.u32 %v904_v3, 16  ;;  %v194_v18 = vadd.s32 %v192_v53, %v190_v36  ;;  %v304_v20 = vsel %vm292_vm2, %v286_v44, %v303_v14  ;;  %v331_v21 = vand.u32 65535, %v301_v12 }
  0x44   :  { %v140_v59 = vsel %vm136_vm8, %v120_v52, %v855_v31  ;;  %v142_v63 = vsel %vm138_vm10, %v857_v32, %v141_v62  ;;  %v305_v22 = vsel %vm291_vm3, %v302_v10, %v304_v20  ;;  %v332_v23 = vshrl.u32 %v301_v12, 16 }
  0x45   :  { %v164_v25 = vshrl.u32 %v900_v0, 16  ;;  %v274_v3 = vshrl.u32 %v786_v11, %v890_v51  ;;  %v309_v26 = vand.u32 65535, %v305_v22  ;;  %v310_v29 = vshrl.u32 %v305_v22, 16 }
  0x46   :  { %v173_v35 = vadd.s32 %v172_v8, %v162_v7  ;;  %v186_v37 = vshrl.u32 %v906_v4, 16  ;;  %v334_v31 = vmul.u32 %v332_v23, %v893_v56  ;;  %v335_v38 = vmul.u32 %v331_v21, %v896_v58 }
  0x47   :  { %v195_v39 = vadd.s32 %v194_v18, %v184_v33  ;;  %v311_v32 = vmul.u32 %v309_v26, %v893_v56  ;;  %v312_v44 = vmul.u32 %v310_v29, %v893_v56  ;;  %v333_v45 = vmul.u32 %v331_v21, %v893_v56 }
  0x48   :  { %v143_v0 = vsel %vm137_vm11, %v140_v59, %v142_v63  ;;  %v984_v51 = vadd.s32 %v189_v27, %v185_v24  ;;  %v313_v48 = vmul.u32 %v309_v26, %v896_v58  ;;  %v337_v50 = vshll.u32 %v334_v31, 16 }
  0x49   :  { %v294_v4 = vsel %vm290_vm1, %v274_v3, %v277_v40  ;;  %v295_v36 = vsel %vm293_vm4, %v283_v43, 2102212464  ;;  %v314_v47 = vmul.u32 %v310_v29, %v896_v58  ;;  %v315_v52 = vshll.u32 %v312_v44, 16 }
  0x4a   :  { %v992_v53 = vadd.s32 %v173_v35, %v164_v25  ;;  %v317_v56 = vshll.u32 %v313_v48, 16  ;;  %v336_v9 = vmul.u32 %v332_v23, %v896_v58  ;;  %v339_v54 = vshll.u32 %v335_v38, 16 }
  0x4b   :  { %v196_v24 = vadd.s32 %v195_v39, %v186_v37  ;;  %vm319_vm5 = vc.u32 %v311_v32, %v315_v52  ;;  %v321_v27 = vadd.s32 %v315_v52, %v311_v32  ;;  %vm341_vm6 = vc.u32 %v333_v45, %v337_v50 }
  0x4c   :  { %v296_v40 = vsel %vm292_vm2, %v929_v42, %v295_v36  ;;  %v320_v55 = vsel %vm319_vm5, 1, %v792_v34  ;;  %v342_v43 = vsel %vm341_vm6, 1, %v792_v34  ;;  %v343_v62 = vadd.s32 %v337_v50, %v333_v45 }
  0x4d   :  { %v316_v2 = vshrl.u32 %v312_v44, 16  ;;  %v322_v10 = vadd.s32 %v320_v55, %v314_v47  ;;  %vm323_vm7 = vc.u32 %v321_v27, %v317_v56  ;;  %v338_v7 = vshrl.u32 %v334_v31, 16 }
  0x4e   :  { %v324_v58 = vsel %vm323_vm7, 1, %v792_v34  ;;  %v344_v8 = vadd.s32 %v342_v43, %v336_v9  ;;  %vm345_vm8 = vc.u32 %v343_v62, %v339_v54  ;;  %v426_v12 = vand.u32 31, %v955_v5 }
  0x4f   :  { %v200_v14 = vadd.s32 1, %v196_v24  ;;  %v318_v33 = vshrl.u32 %v313_v48, 16  ;;  %v326_v18 = vadd.s32 %v324_v58, %v322_v10  ;;  %v346_v42 = vsel %vm345_vm8, 1, %v792_v34 }
  0x50   :  { %vm199_vm9 = vc.u32 %v992_v53, %v984_v51  ;;  %v340_v20 = vshrl.u32 %v335_v38, 16  ;;  %v348_v21 = vadd.s32 %v346_v42, %v344_v8  ;;  %v1005_v63 = vadd.s32 %v343_v62, %v339_v54 }
  0x51   :  { %v327_v59 = vadd.s32 %v326_v18, %v316_v2  ;;  %v197_v22 = vmul.u32 %v853_v30, %v143_v0  ;;  %v297_v23 = vsel %vm291_vm3, %v294_v4, %v296_v40  ;;  %v1010_v3 = vsub.s32 32, %v426_v12 }
  0x52   :  { %v349_v25 = vadd.s32 %v348_v21, %v338_v7  ;;  %v89_v26 = vmul.f32 %v914_v16, %v830_v6  ;;  %v201_v29 = vsel %vm199_vm9, %v200_v14, %v196_v24  ;;  %v412_v37 = vand.u32 2147483647, %v822_v60 }
  0x53   :  { %v1014_v35 = vadd.s32 %v327_v59, %v318_v33  ;;  %v351_v38 = vmul.u32 %v876_v41, %v297_v23  ;;  %v202_v30 = vadd.s32 %v201_v29, %v197_v22  ;;  %v438_v39 = vshll.u32 %v789_v17, %v426_v12 }
  0x54   :  { %v350_v31 = vadd.s32 %v349_v25, %v340_v20  ;;  %v439_v32 = vshrl.u32 %v790_v19, %v1010_v3  ;;  %v90_v44 = vmul.f32 %v914_v16, %v89_v26  ;;  %v419_v45 = vand.u32 8388607, %v412_v37 }
  0x55   :  { %vm353_vm10 = vc.u32 %v1014_v35, %v1005_v63  ;;  %v1027_v0 = vshrl.u32 %v955_v5, 5  ;;  %v432_v41 = vshll.u32 %v787_v13, %v426_v12  ;;  %v433_v50 = vshrl.u32 %v788_v15, %v1010_v3 }
  0x56   :  { %v354_v1 = vadd.s32 1, %v350_v31  ;;  %v435_v4 = vshll.u32 %v788_v15, %v426_v12  ;;  %v436_v36 = vshrl.u32 %v789_v17, %v1010_v3  ;;  %v429_v47 = vshll.u32 %v786_v11, %v426_v12 }
  0x57   :  { %v430_v52 = vshrl.u32 %v787_v13, %v1010_v3  ;;  %v441_v56 = vshll.u32 %v790_v19, %v426_v12  ;;  %v442_v5 = vshrl.u32 %v791_v28, %v1010_v3  ;;  %v203_v9 = vadd.s32 536870912, %v202_v30 }
  0x58   :  { %v355_v48 = vsel %vm353_vm10, %v354_v1, %v350_v31  ;;  %v440_v24 = vor.u32 %v439_v32, %v438_v39  ;;  %v91_v27 = vmul.f32 0.5, %v90_v44  ;;  %v1041_v40 = vor.u32 %v433_v50, %v432_v41 }
  0x59   :  { %v356_v54 = vadd.s32 %v355_v48, %v351_v38  ;;  %v1043_v55 = vor.u32 %v436_v36, %v435_v4  ;;  %vm447_vm11 = vcmp.lt.s32.totalorder %v1027_v0, 4  ;;  %v420_v43 = vor.u32 8388608, %v419_v45 }
  0x5a   :  { %v1046_v62 = vor.u32 %v430_v52, %v429_v47  ;;  %v443_v2 = vor.u32 %v442_v5, %v441_v56  ;;  %vm444_vm12 = vcmp.lt.s32.totalorder %v1027_v0, 1  ;;  %v1049_v10 = vshrl.u32 %v203_v9, 30 }
  0x5b   :  { %v357_v7 = vadd.s32 536870912, %v356_v54  ;;  %vm446_vm13 = vcmp.lt.s32.totalorder %v1027_v0, 3  ;;  %v453_v58 = vsel %vm447_vm11, %v440_v24, 920167782  ;;  %v92_v8 = vsub.f32 1.5, %v91_v27 }
  0x5c   :  { %vm445_vm14 = vcmp.lt.s32.totalorder %v1027_v0, 2  ;;  %v456_v12 = vsel %vm444_vm12, %v1041_v40, %v1043_v55  ;;  %v452_v14 = vsel %vm444_vm12, %v1046_v62, %v1041_v40  ;;  %v454_v33 = vsel %vm446_vm13, %v1043_v55, %v453_v58 }
  0x5d   :  { %v457_v18 = vsel %vm447_vm11, %v443_v2, 1326507024  ;;  %v1068_v42 = vshll.u32 %v420_v43, 8  ;;  %v205_v20 = vshll.u32 %v1049_v10, 30  ;;  %v1071_v21 = vshrl.u32 %v357_v7, 30 }
  0x5e   :  { %v458_v59 = vsel %vm446_vm13, %v440_v24, %v457_v18  ;;  %v93_v22 = vmul.f32 %v914_v16, %v92_v8  ;;  %v455_v26 = vsel %vm445_vm14, %v452_v14, %v454_v33  ;;  %vm95_vm15 = vcmp.eq.f32.partialorder %v830_v6, inf }
  0x5f   :  { %v459_v23 = vsel %vm445_vm14, %v456_v12, %v458_v59  ;;  %v461_v25 = vand.u32 65535, %v1068_v42  ;;  %v462_v29 = vshrl.u32 %v1068_v42, 16  ;;  %v1082_v1 = vsub.s32 %v202_v30, %v205_v20 }
  0x60   :  { %v463_v31 = vand.u32 65535, %v459_v23  ;;  %v464_v38 = vshrl.u32 %v459_v23, 16  ;;  %v359_v39 = vshll.u32 %v1071_v21, 30  ;;  %v486_v16 = vshrl.u32 %v455_v26, 16 }
  0x61   :  { %v94_v41 = vmul.f32 %v93_v22, %v830_v6  ;;  %v98_v50 = vand.u32 2147483648, %v830_v6  ;;  %v485_v36 = vand.u32 65535, %v455_v26  ;;  %vm207_vm0 = vcmp.lt.s32.totalorder %v1082_v1, 0 }
  0x62   :  { %v465_v32 = vmul.u32 %v463_v31, %v461_v25  ;;  %v466_v44 = vmul.u32 %v464_v38, %v461_v25  ;;  %v467_v45 = vmul.u32 %v463_v31, %v462_v29  ;;  %v468_v4 = vmul.u32 %v464_v38, %v462_v29 }
  0x63   :  { %v208_v30 = vsub.s32 0, %v1082_v1  ;;  %v1090_v47 = vsub.s32 %v356_v54, %v359_v39  ;;  %v488_v9 = vmul.u32 %v486_v16, %v461_v25  ;;  %v96_v24 = vsel %vm95_vm15, %v830_v6, %v94_v41 }
  0x64   :  { %v469_v48 = vshll.u32 %v466_v44, 16  ;;  %v471_v52 = vshll.u32 %v467_v45, 16  ;;  %vm97_vm2 = vcmp.eq.f32.partialorder %v830_v6, 0.0  ;;  %v489_v43 = vmul.u32 %v485_v36, %v462_v29 }
  0x65   :  { %v209_v2 = vsel %vm207_vm0, %v208_v30, %v1082_v1  ;;  %v362_v7 = vsub.s32 0, %v1090_v47  ;;  %v487_v58 = vmul.u32 %v485_v36, %v461_v25  ;;  %v99_v8 = vsel %vm97_vm2, %v98_v50, %v96_v24 }
  0x66   :  { %vm473_vm1 = vc.u32 %v465_v32, %v469_v48  ;;  %v475_v5 = vadd.s32 %v469_v48, %v465_v32  ;;  %vm361_vm3 = vcmp.lt.s32.totalorder %v1090_v47, 0  ;;  %v491_v54 = vshll.u32 %v488_v9, 16 }
  0x67   :  { %v474_v56 = vsel %vm473_vm1, 1, %v792_v34  ;;  %v470_v12 = vshrl.u32 %v466_v44, 16  ;;  %v490_v33 = vmul.u32 %v486_v16, %v462_v29  ;;  %v210_v18 = vclz %v209_v2 }
  0x68   :  { %v476_v27 = vadd.s32 %v474_v56, %v468_v4  ;;  %vm477_vm4 = vc.u32 %v475_v5, %v471_v52  ;;  %v493_v59 = vshll.u32 %v489_v43, 16  ;;  %v1099_v6 = vmul.f32 25132.742, %v99_v8 }
  0x69   :  { %v478_v14 = vsel %vm477_vm4, 1, %v792_v34  ;;  %v363_v22 = vsel %vm361_vm3, %v362_v7, %v1090_v47  ;;  %v428_v23 = vshrl.u32 %v786_v11, %v1010_v3  ;;  %vm495_vm5 = vc.u32 %v487_v58, %v491_v54 }
  0x6a   :  { %v480_v20 = vadd.s32 %v478_v14, %v476_v27  ;;  %v449_v25 = vsel %vm447_vm11, %v1043_v55, 2102212464  ;;  %v496_v26 = vsel %vm495_vm5, 1, %v792_v34  ;;  %v497_v31 = vadd.s32 %v491_v54, %v487_v58 }
  0x6b   :  { %v472_v38 = vshrl.u32 %v467_v45, 16  ;;  %v498_v39 = vadd.s32 %v496_v26, %v490_v33  ;;  %v760_v32 = vadd.s32 4294967294, %v210_v18  ;;  %v364_v44 = vclz %v363_v22 }
  0x6c   :  { %v481_v29 = vadd.s32 %v480_v20, %v470_v12  ;;  %v492_v16 = vshrl.u32 %v488_v9, 16  ;;  %vm499_vm6 = vc.u32 %v497_v31, %v493_v59  ;;  %v448_v41 = vsel %vm444_vm12, %v428_v23, %v1046_v62 }
  0x6d   :  { %v450_v3 = vsel %vm446_vm13, %v1041_v40, %v449_v25  ;;  %v500_v55 = vsel %vm499_vm6, 1, %v792_v34  ;;  %v569_v48 = vand.u32 2139095040, %v1099_v6  ;;  %v494_v50 = vshrl.u32 %v489_v43, 16 }
  0x6e   :  { %v502_v45 = vadd.s32 %v500_v55, %v498_v39  ;;  %v1116_v4 = vadd.s32 %v481_v29, %v472_v38  ;;  %v1118_v36 = vadd.s32 %v497_v31, %v493_v59  ;;  %vm761_vm7 = vcmp.lt.s32.totalorder %v760_v32, 0 }
  0x6f   :  { %v570_v30 = vshrl.u32 %v569_v48, 23  ;;  %v763_v52 = vadd.s32 4294967294, %v364_v44  ;;  %v451_v62 = vsel %vm445_vm14, %v448_v41, %v450_v3  ;;  %v213_v40 = vsel %vm761_vm7, 0, %v760_v32 }
  0x70   :  { %v503_v56 = vadd.s32 %v502_v45, %v492_v16  ;;  %v505_v24 = vmul.u32 %v1068_v42, %v451_v62  ;;  %vm507_vm8 = vc.u32 %v1116_v4, %v1118_v36  ;;  %v198_v2 = vadd.s32 %v984_v51, %v992_v53 }
  0x71   :  { %v768_v5 = vadd.s32 4294967169, %v570_v30  ;;  %vm764_vm9 = vcmp.lt.s32.totalorder %v763_v52, 0  ;;  %v214_v7 = vsub.s32 32, %v213_v40  ;;  %v218_v58 = vsub.s32 4294967266, %v213_v40 }
  0x72   :  { %v504_v9 = vadd.s32 %v503_v56, %v494_v50  ;;  %v367_v54 = vsel %vm764_vm9, 0, %v763_v52  ;;  %v566_v14 = vand.u32 2147483647, %v1099_v6  ;;  %v215_v42 = vshll.u32 %v1082_v1, %v213_v40 }
  0x73   :  { %v576_v27 = vadd.s32 1, %v768_v5  ;;  %v216_v18 = vshrl.u32 %v198_v2, %v214_v7  ;;  %v219_v22 = vadd.s32 127, %v218_v58  ;;  %v372_v23 = vsub.s32 4294967266, %v367_v54 }
  0x74   :  { %v508_v43 = vadd.s32 1, %v504_v9  ;;  %v573_v51 = vand.u32 8388607, %v566_v14  ;;  %v352_v32 = vadd.s32 %v1005_v63, %v1014_v35  ;;  %v368_v3 = vsub.s32 32, %v367_v54 }
  0x75   :  { %vm577_vm10 = vcmp.gt.s32.totalorder %v576_v27, 0  ;;  %v217_v39 = vor.u32 %v216_v18, %v215_v42  ;;  %v220_v41 = vshll.u32 %v219_v22, 23  ;;  %v373_v48 = vadd.s32 127, %v372_v23 }
  0x76   :  { %v509_v0 = vsel %vm507_vm8, %v508_v43, %v504_v9  ;;  %v578_v8 = vsel %vm577_vm10, %v576_v27, 0  ;;  %v574_v52 = vor.u32 8388608, %v573_v51  ;;  %vm106_vm5 = vcmp.lt.s32.totalorder %v815_v46, 0 }
  0x77   :  { %v510_v12 = vadd.s32 %v509_v0, %v505_v24  ;;  %v580_v33 = vand.u32 31, %v578_v8  ;;  %v1147_v16 = vshrl.u32 %v578_v8, 5  ;;  %v374_v40 = vshll.u32 %v373_v48, 23 }
  0x78   :  { %v1165_v43 = vshll.u32 %v574_v52, 8  ;;  %v224_v7 = vcvt.s32.f32 %v217_v39  ;;  %vm260_vm6 = vcmp.lt.s32.totalorder %v817_v49, 0  ;;  %vm1209_vm8 = vcmp.le.f32.partialorder %v104_v57, 0.7853982 }
  0x79   :  { %v511_v20 = vadd.s32 536870912, %v510_v12  ;;  %v1129_v59 = vsub.s32 32, %v580_v33  ;;  %v583_v53 = vshll.u32 %v786_v11, %v580_v33  ;;  %v586_v26 = vshll.u32 %v787_v13, %v580_v33 }
  0x7a   :  { %v592_v38 = vshll.u32 %v789_v17, %v580_v33  ;;  %v595_v45 = vshll.u32 %v790_v19, %v580_v33  ;;  %vm598_vm12 = vcmp.lt.s32.totalorder %v1147_v16, 1  ;;  %vm601_vm13 = vcmp.lt.s32.totalorder %v1147_v16, 4 }
  0x7b   :  { %v1131_v25 = vshrl.u32 %v511_v20, 30  ;;  %v584_v31 = vshrl.u32 %v787_v13, %v1129_v59  ;;  %v587_v1 = vshrl.u32 %v788_v15, %v1129_v59  ;;  %v593_v29 = vshrl.u32 %v790_v19, %v1129_v59 }
  0x7c   :  { %v589_v13 = vshll.u32 %v788_v15, %v580_v33  ;;  %v590_v55 = vshrl.u32 %v789_v17, %v1129_v59  ;;  %v596_v30 = vshrl.u32 %v791_v28, %v1129_v59  ;;  %v221_v15 = vor.u32 4788187, %v220_v41 }
  0x7d   :  { %v513_v44 = vshll.u32 %v1131_v25, 30  ;;  %v585_v63 = vor.u32 %v584_v31, %v583_v53  ;;  %v1155_v35 = vor.u32 %v587_v1, %v586_v26  ;;  %v594_v62 = vor.u32 %v593_v29, %v592_v38 }
  0x7e   :  { %v597_v5 = vor.u32 %v596_v30, %v595_v45  ;;  %v369_v17 = vshll.u32 %v1090_v47, %v367_v54  ;;  %v591_v9 = vor.u32 %v590_v55, %v589_v13  ;;  %v370_v19 = vshrl.u32 %v352_v32, %v368_v3 }
  0x7f   :  { %v514_v50 = vsub.s32 %v510_v12, %v513_v44  ;;  %vm600_vm14 = vcmp.lt.s32.totalorder %v1147_v16, 3  ;;  %vm599_vm15 = vcmp.lt.s32.totalorder %v1147_v16, 2  ;;  %v606_v27 = vsel %vm598_vm12, %v585_v63, %v1155_v35 }
  0x80   :  { %v607_v47 = vsel %vm601_vm13, %v594_v62, 920167782  ;;  %v611_v2 = vsel %vm601_vm13, %v597_v5, 1326507024  ;;  %v610_v8 = vsel %vm598_vm12, %v1155_v35, %v591_v9  ;;  %v222_v54 = vand.u32 2147483647, %v221_v15 }
  0x81   :  { %vm515_vm11 = vcmp.lt.s32.totalorder %v514_v50, 0  ;;  %v516_v56 = vsub.s32 0, %v514_v50  ;;  %v608_v0 = vsel %vm600_vm14, %v591_v9, %v607_v47  ;;  %v371_v12 = vor.u32 %v370_v19, %v369_v17 }
  0x82   :  { %v609_v33 = vsel %vm599_vm15, %v606_v27, %v608_v0  ;;  %v612_v42 = vsel %vm600_vm14, %v594_v62, %v611_v2  ;;  %v375_v18 = vor.u32 4788187, %v374_v40  ;;  %v506_v20 = vadd.s32 %v1118_v36, %v1116_v4 }
  0x83   :  { %v517_v24 = vsel %vm515_vm11, %v516_v56, %v514_v50  ;;  %v615_v22 = vand.u32 65535, %v1165_v43  ;;  %v613_v51 = vsel %vm599_vm15, %v610_v8, %v612_v42  ;;  %v616_v53 = vshrl.u32 %v1165_v43, 16 }
  0x84   :  { %v518_v28 = vclz %v517_v24  ;;  %v640_v26 = vshrl.u32 %v609_v33, 16  ;;  %v639_v29 = vand.u32 65535, %v609_v33  ;;  %v1186_v39 = vmul.f32 %v224_v7, %v222_v54 }
  0x85   :  { %v582_v32 = vshrl.u32 %v786_v11, %v1129_v59  ;;  %v617_v4 = vand.u32 65535, %v613_v51  ;;  %v618_v36 = vshrl.u32 %v613_v51, 16  ;;  %v378_v44 = vcvt.s32.f32 %v371_v12 }
  0x86   :  { %v766_v58 = vadd.s32 4294967294, %v518_v28  ;;  %v642_v13 = vmul.u32 %v640_v26, %v615_v22  ;;  %v376_v55 = vand.u32 2147483647, %v375_v18  ;;  %v643_v56 = vmul.u32 %v639_v29, %v616_v53 }
  0x87   :  { %v619_v48 = vmul.u32 %v617_v4, %v615_v22  ;;  %v620_v45 = vmul.u32 %v618_v36, %v615_v22  ;;  %v621_v30 = vmul.u32 %v617_v4, %v616_v53  ;;  %v602_v5 = vsel %vm598_vm12, %v582_v32, %v585_v63 }
  0x88   :  { %vm767_vm0 = vcmp.lt.s32.totalorder %v766_v58, 0  ;;  %v622_v15 = vmul.u32 %v618_v36, %v616_v53  ;;  %v603_v19 = vsel %vm601_vm13, %v591_v9, 2102212464  ;;  %v644_v40 = vmul.u32 %v640_v26, %v616_v53 }
  0x89   :  { %v521_v23 = vsel %vm767_vm0, 0, %v766_v58  ;;  %v623_v17 = vshll.u32 %v620_v45, 16  ;;  %v625_v11 = vshll.u32 %v621_v30, 16  ;;  %v645_v24 = vshll.u32 %v642_v13, 16 }
  0x8a   :  { %v522_v31 = vsub.s32 32, %v521_v23  ;;  %v523_v1 = vshll.u32 %v514_v50, %v521_v23  ;;  %v526_v38 = vsub.s32 4294967266, %v521_v23  ;;  %v641_v50 = vmul.u32 %v639_v29, %v615_v22 }
  0x8b   :  { %v624_v28 = vshrl.u32 %v620_v45, 16  ;;  %vm627_vm1 = vc.u32 %v619_v48, %v623_v17  ;;  %v629_v27 = vadd.s32 %v623_v17, %v619_v48  ;;  %v647_v47 = vshll.u32 %v643_v56, 16 }
  0x8c   :  { %v524_v41 = vshrl.u32 %v506_v20, %v522_v31  ;;  %v527_v3 = vadd.s32 127, %v526_v38  ;;  %v628_v7 = vsel %vm627_vm1, 1, %v792_v34  ;;  %vm649_vm2 = vc.u32 %v641_v50, %v645_v24 }
  0x8d   :  { %v651_v58 = vadd.s32 %v645_v24, %v641_v50  ;;  %v630_v0 = vadd.s32 %v628_v7, %v622_v15  ;;  %vm631_vm3 = vc.u32 %v629_v27, %v625_v11  ;;  %v646_v63 = vshrl.u32 %v642_v13, 16 }
  0x8e   :  { %v525_v52 = vor.u32 %v524_v41, %v523_v1  ;;  %v528_v62 = vshll.u32 %v527_v3, 23  ;;  %v650_v8 = vsel %vm649_vm2, 1, %v792_v34  ;;  %v632_v12 = vsel %vm631_vm3, 1, %v792_v34 }
  0x8f   :  { %v652_v9 = vadd.s32 %v650_v8, %v644_v40  ;;  %vm653_vm4 = vc.u32 %v651_v58, %v647_v47  ;;  %v604_v33 = vsel %vm600_vm14, %v1155_v35, %v603_v19  ;;  %v626_v42 = vshrl.u32 %v621_v30, 16 }
  0x90   :  { %v529_v59 = vor.u32 4788187, %v528_v62  ;;  %v532_v2 = vcvt.s32.f32 %v525_v52  ;;  %v634_v18 = vadd.s32 %v632_v12, %v630_v0  ;;  %v654_v20 = vsel %vm653_vm4, 1, %v792_v34 }
  0x91   :  { %v379_v22 = vmul.f32 %v378_v44, %v376_v55  ;;  %v648_v23 = vshrl.u32 %v643_v56, 16  ;;  %v656_v51 = vadd.s32 %v654_v20, %v652_v9  ;;  %v655_v26 = vadd.s32 %v651_v58, %v647_v47 }
  0x92   :  { %v530_v54 = vand.u32 2147483647, %v529_v59  ;;  %v635_v53 = vadd.s32 %v634_v18, %v624_v28  ;;  %v605_v1 = vsel %vm599_vm15, %v602_v5, %v604_v33  ;;  %v226_v29 = vxor.u32 2147483648, %v1186_v39 }
  0x93   :  { %v657_v38 = vadd.s32 %v656_v51, %v646_v63  ;;  %v380_v35 = vxor.u32 2147483648, %v379_v22  ;;  %v659_v34 = vmul.u32 %v1165_v43, %v605_v1  ;;  %vm414_vm9 = vcmp.lt.s32.totalorder %v822_v60, 0 }
  0x94   :  { %v533_v31 = vmul.f32 %v532_v2, %v530_v54  ;;  %v636_v32 = vadd.s32 %v635_v53, %v626_v42  ;;  %v227_v41 = vsel %vm106_vm5, %v226_v29, %v1186_v39  ;;  %vm1219_vm10 = vcmp.le.f32.partialorder %v258_v61, 0.7853982 }
  0x95   :  { %v658_v4 = vadd.s32 %v657_v38, %v648_v23  ;;  %v381_v43 = vsel %vm260_vm6, %v380_v35, %v379_v22  ;;  %v1228_v55 = vsel %vm1209_vm8, %v815_v46, %v227_v41  ;;  %vm1232_vm11 = vcmp.le.f32.partialorder %v412_v37, 0.7853982 }
  0x96   :  { %vm661_vm7 = vc.u32 %v636_v32, %v655_v26  ;;  %v534_v36 = vxor.u32 2147483648, %v533_v31  ;;  %v1241_v48 = vsel %vm1219_vm10, %v817_v49, %v381_v43  ;;  %v232_v30 = vmul.f32 %v1228_v55, %v1228_v55 }
  0x97   :  { %v662_v44 = vadd.s32 1, %v658_v4  ;;  %v386_v62 = vmul.f32 %v1241_v48, %v1241_v48  ;;  %v660_v12 = vadd.s32 %v655_v26, %v636_v32  ;;  %v228_v9 = vsub.s32 4, %v1049_v10 }
  0x98   :  { %v535_v61 = vsel %vm414_vm9, %v534_v36, %v533_v31  ;;  %v240_v5 = vmul.f32 -0.00019511016, %v232_v30  ;;  %v233_v11 = vmul.f32 -0.001358992, %v232_v30  ;;  %v382_v35 = vsub.s32 4, %v1071_v21 }
  0x99   :  { %v663_v13 = vsel %vm661_vm7, %v662_v44, %v658_v4  ;;  %v1248_v52 = vsel %vm1232_vm11, %v822_v60, %v535_v61  ;;  %v394_v17 = vmul.f32 -0.00019511016, %v386_v62  ;;  %v387_v24 = vmul.f32 -0.001358992, %v386_v62 }
  0x9a   :  { %v664_v57 = vadd.s32 %v663_v13, %v659_v34  ;;  %v1257_v56 = vmul.f32 %v1248_v52, %v1248_v52  ;;  %v241_v40 = vadd.f32 0.008332121, %v240_v5  ;;  %v234_v2 = vadd.f32 0.041655596, %v233_v11 }
  0x9b   :  { %v395_v27 = vadd.f32 0.008332121, %v394_v17  ;;  %v388_v8 = vadd.f32 0.041655596, %v387_v24  ;;  %v229_v26 = vsel %vm106_vm5, %v228_v9, %v1049_v10  ;;  %v536_v5 = vsub.s32 4, %v1131_v25 }
  0x9c   :  { %v665_v45 = vadd.s32 536870912, %v664_v57  ;;  %v548_v19 = vmul.f32 -0.00019511016, %v1257_v56  ;;  %v541_v7 = vmul.f32 -0.001358992, %v1257_v56  ;;  %v242_v63 = vmul.f32 %v241_v40, %v232_v30 }
  0x9d   :  { %v396_v54 = vmul.f32 %v395_v27, %v386_v62  ;;  %v235_v33 = vmul.f32 %v234_v2, %v232_v30  ;;  %v389_v31 = vmul.f32 %v388_v8, %v386_v62  ;;  %v383_v10 = vsel %vm260_vm6, %v382_v35, %v1071_v21 }
  0x9e   :  { %v1250_v37 = vshrl.u32 %v665_v45, 30  ;;  %v549_v58 = vadd.f32 0.008332121, %v548_v19  ;;  %v542_v42 = vadd.f32 0.041655596, %v541_v7  ;;  %v231_v45 = vsel %vm1209_vm8, 0, %v229_v26 }
  0x9f   :  { %v243_v53 = vadd.f32 -0.16666654, %v242_v63  ;;  %v397_v1 = vadd.f32 -0.16666654, %v396_v54  ;;  %v236_v32 = vadd.f32 -0.4999988, %v235_v33  ;;  %vm247_vm8 = vweird.f32 %v815_v46 }
  0xa0   :  { %v667_v50 = vshll.u32 %v1250_v37, 30  ;;  %v550_v20 = vmul.f32 %v549_v58, %v1257_v56  ;;  %v543_v4 = vmul.f32 %v542_v42, %v1257_v56  ;;  %v390_v43 = vadd.f32 -0.4999988, %v389_v31 }
  0xa1   :  { %v244_v41 = vmul.f32 %v243_v53, %v232_v30  ;;  %v398_v13 = vmul.f32 %v397_v1, %v386_v62  ;;  %v248_v40 = vand.u32 3, %v231_v45  ;;  %v385_v16 = vsel %vm1219_vm10, 0, %v383_v10 }
  0xa2   :  { %v668_v15 = vsub.s32 %v664_v57, %v667_v50  ;;  %v551_v34 = vadd.f32 -0.16666654, %v550_v20  ;;  %v237_v50 = vmul.f32 %v236_v32, %v232_v30  ;;  %v391_v19 = vmul.f32 %v390_v43, %v386_v62 }
  0xa3   :  { %v399_v24 = vadd.f32 1.0, %v398_v13  ;;  %v537_v30 = vsel %vm414_vm9, %v536_v5, %v1131_v25  ;;  %vm568_vm14 = vcmp.lt.s32.totalorder %v1099_v6, 0  ;;  %vm1284_vm15 = vcmp.le.f32.partialorder %v566_v14, 0.7853982 }
  0xa4   :  { %vm669_vm12 = vcmp.lt.s32.totalorder %v668_v15, 0  ;;  %v670_v59 = vsub.s32 0, %v668_v15  ;;  %v552_v17 = vmul.f32 %v551_v34, %v1257_v56  ;;  %v238_v27 = vadd.f32 1.0, %v237_v50 }
  0xa5   :  { %v392_v3 = vadd.f32 1.0, %v391_v19  ;;  %v400_v58 = vmul.f32 %v399_v24, %v1241_v48  ;;  %v539_v25 = vsel %vm1232_vm11, 0, %v537_v30  ;;  %vm249_vm0 = vcmp.lt.s32.totalorder %v248_v40, 2 }
  0xa6   :  { %v671_v28 = vsel %vm669_vm12, %v670_v59, %v668_v15  ;;  %v245_v59 = vadd.f32 1.0, %v244_v41  ;;  %v254_v63 = vxor.u32 2147483648, %v238_v27  ;;  %v690_v14 = vsub.s32 4, %v1250_v37 }
  0xa7   :  { %v672_v47 = vclz %v671_v28  ;;  %vm253_vm1 = vcmp.eq.s32.totalorder %v248_v40, 2  ;;  %vm250_vm2 = vcmp.eq.s32.totalorder %v248_v40, 0  ;;  %v408_v39 = vxor.u32 2147483648, %v392_v3 }
  0xa8   :  { %v246_v7 = vmul.f32 %v245_v59, %v1228_v55  ;;  %v556_v9 = vand.u32 3, %v539_v25  ;;  %v405_v33 = vxor.u32 2147483648, %v400_v58  ;;  %vm401_vm10 = vweird.f32 %v817_v49 }
  0xa9   :  { %v769_v0 = vadd.s32 4294967294, %v672_v47  ;;  %v553_v47 = vadd.f32 1.0, %v552_v17  ;;  %vm555_vm11 = vweird.f32 %v822_v60 }
  0xaa   :  { %v255_v20 = vsel %vm253_vm1, %v254_v63, %v246_v7  ;;  %vm558_vm6 = vcmp.eq.s32.totalorder %v556_v9, 0  ;;  %vm561_vm7 = vcmp.eq.s32.totalorder %v556_v9, 2  ;;  %vm557_vm9 = vcmp.lt.s32.totalorder %v556_v9, 2 }
  0xab   :  { %vm770_vm13 = vcmp.lt.s32.totalorder %v769_v0, 0  ;;  %v554_v54 = vmul.f32 %v553_v47, %v1248_v52  ;;  %vm709_vm1 = vweird.f32 %v1099_v6 }
  0xac   :  { %v675_v18 = vsel %vm770_vm13, 0, %v769_v0  ;;  %v402_v0 = vand.u32 3, %v385_v16 }
  0xad   :  { %v676_v22 = vsub.s32 32, %v675_v18  ;;  %v677_v23 = vshll.u32 %v668_v15, %v675_v18  ;;  %v680_v51 = vsub.s32 4294967266, %v675_v18  ;;  %v544_v15 = vadd.f32 -0.4999988, %v543_v4 }
  0xae   :  { %vm407_vm3 = vcmp.eq.s32.totalorder %v402_v0, 2  ;;  %vm403_vm4 = vcmp.lt.s32.totalorder %v402_v0, 2  ;;  %vm404_vm5 = vcmp.eq.s32.totalorder %v402_v0, 0 }
  0xaf   :  { %v678_v38 = vshrl.u32 %v660_v12, %v676_v22  ;;  %v681_v29 = vadd.s32 127, %v680_v51  ;;  %v545_v21 = vmul.f32 %v544_v15, %v1257_v56  ;;  %v251_v12 = vxor.u32 2147483648, %v246_v7 }
  0xb0   :  { %v691_v22 = vsel %vm568_vm14, %v690_v14, %v1250_v37  ;;  %v409_v1 = vsel %vm407_vm3, %v408_v39, %v400_v58  ;;  %vm735_vm3 = vcmask 1041408  }
  0xb1   :  { %v679_v36 = vor.u32 %v678_v38, %v677_v23  ;;  %v682_v44 = vshll.u32 %v681_v29, 23  ;;  %v546_v55 = vadd.f32 1.0, %v545_v21  ;;  %v559_v23 = vxor.u32 2147483648, %v554_v54 }
  0xb2   :  { %v252_v31 = vsel %vm250_vm2, %v238_v27, %v251_v12  ;;  %v406_v38 = vsel %vm404_vm5, %v392_v3, %v405_v33  ;;  %v693_v29 = vsel %vm1284_vm15, 0, %v691_v22  ;;  %vm737_vm2 = vcmask 1044484  }
  0xb3   :  { %v683_v57 = vor.u32 4788187, %v682_v44  ;;  %v686_v61 = vcvt.s32.f32 %v679_v36  ;;  %v562_v51 = vxor.u32 2147483648, %v546_v55  ;;  %v560_v35 = vsel %vm558_vm6, %v546_v55, %v559_v23 }
  0xb4   :  { %v256_v36 = vsel %vm249_vm0, %v252_v31, %v255_v20  ;;  %v410_v44 = vsel %vm403_vm4, %v406_v38, %v409_v1  ;;  %v710_v41 = vand.u32 3, %v693_v29  ;;  %vm733_vm0 = vcmask 1042434  }
  0xb5   :  { %v684_v11 = vand.u32 2147483647, %v683_v57  ;;  %v563_v37 = vsel %vm561_vm7, %v562_v51, %v554_v54  ;;  %v411_v45 = vsel %vm401_vm10, nan, %v410_v44  ;;  %vm739_vm4 = vcmask 1046534  }
  0xb6   :  { %v564_v57 = vsel %vm557_vm9, %v560_v35, %v563_v37  ;;  %vm715_vm12 = vcmp.eq.s32.totalorder %v710_v41, 2  ;;  %vm711_vm13 = vcmp.lt.s32.totalorder %v710_v41, 2  ;;  %v725_v49 = vrot.slane %v411_v45, 6 }
  0xb7   :  { %v687_v28 = vmul.f32 %v686_v61, %v684_v11  ;;  %v257_v61 = vsel %vm247_vm8, nan, %v256_v36  ;;  %v565_v5 = vsel %vm555_vm11, nan, %v564_v57  ;;  %v726_v11 = vrot.slane %v411_v45, 1 }
  0xb8   :  { %v724_v17 = vrot.slane %v257_v61, 3  ;;  %v727_v60 = vrot.slane %v565_v5, 4  ;;  %v728_v40 = vrot.slane %v565_v5, 7  ;;  %vm741_vm5 = vcmask 1045508  }
  0xb9   :  { %v688_v2 = vxor.u32 2147483648, %v687_v28  ;;  %v734_v16 = vsel %vm733_vm0, %v725_v49, %v726_v11  ;;  %vm743_vm6 = vcmask 1043456  }
  0xba   :  { %v738_v62 = vsel %vm737_vm2, %v727_v60, %v728_v40 }
  0xbb   :  { %v689_v56 = vsel %vm568_vm14, %v688_v2, %v687_v28  ;;  %vm712_vm14 = vcmp.eq.s32.totalorder %v710_v41, 0 }
  0xbc   :  { %v692_v8 = vsel %vm1284_vm15, %v1099_v6, %v689_v56  ;;  %vm731_vm15 = vcmask 1040384  }
  0xbd   :  { %v694_v48 = vmul.f32 %v692_v8, %v692_v8  ;;  %v732_v27 = vsel %vm731_vm15, %v257_v61, %v724_v17 }
  0xbe   :  { %v736_v2 = vsel %vm735_vm3, %v732_v27, %v734_v16 }
  0xbf   :  { %v695_v42 = vmul.f32 -0.001358992, %v694_v48  ;;  %v702_v18 = vmul.f32 -0.00019511016, %v694_v48 }
  0xc1   :  { %v696_v53 = vadd.f32 0.041655596, %v695_v42  ;;  %v703_v52 = vadd.f32 0.008332121, %v702_v18 }
  0xc3   :  { %v697_v26 = vmul.f32 %v696_v53, %v694_v48  ;;  %v704_v32 = vmul.f32 %v703_v52, %v694_v48 }
  0xc5   :  { %v698_v4 = vadd.f32 -0.4999988, %v697_v26  ;;  %v705_v34 = vadd.f32 -0.16666654, %v704_v32 }
  0xc7   :  { %v699_v43 = vmul.f32 %v698_v4, %v694_v48  ;;  %v706_v13 = vmul.f32 %v705_v34, %v694_v48 }
  0xc9   :  { %v700_v46 = vadd.f32 1.0, %v699_v43  ;;  %v707_v50 = vadd.f32 1.0, %v706_v13 }
  0xcb   :  { %v708_v10 = vmul.f32 %v707_v50, %v692_v8  ;;  %v716_v15 = vxor.u32 2147483648, %v700_v46 }
  0xcd   :  { %v713_v59 = vxor.u32 2147483648, %v708_v10  ;;  %v717_v19 = vsel %vm715_vm12, %v716_v15, %v708_v10 }
  0xcf   :  { %v714_v24 = vsel %vm712_vm14, %v700_v46, %v713_v59 }
  0xd0   :  { %v718_v28 = vsel %vm711_vm13, %v714_v24, %v717_v19 }
  0xd1   :  { %v719_v30 = vsel %vm709_vm1, nan, %v718_v28 }
  0xd2   :  { %v729_v21 = vrot.slane %v719_v30, 2  ;;  %v730_v47 = vrot.slane %v719_v30, 5 }
  0xd4   :  { %v740_v7 = vsel %vm739_vm4, %v729_v21, %v730_v47 }
  0xd5   :  { %v742_v3 = vsel %vm741_vm5, %v738_v62, %v740_v7 }
  0xd6   :  { %v744_v58 = vsel %vm743_vm6, %v736_v2, %v742_v3 }
  0xd7   :  { %746 = vst [vmem:[%s1315_s1] sm:$0xff] %v744_v58 }

// kernel: model_forward.20
= control target key start
LH: loop header
LB: loop body
LE: loop exit
PB: predicated region body
PF: predicated region fallthrough
CT: control target
= control target key end

     0   :  { %s758_s12 = smov 0   ;;  %s928_s0 = inlined_call_operand.vmem [shape: bf16[512,64], index: 0, kind: input, shape index: {}]   ;;  %s929_s1 = inlined_call_operand.vmem [shape: bf16[64,8], index: 1, kind: input, shape index: {}]   ;;  %s930_s2 = inlined_call_operand.vmem [shape: f32[1,8], index: 2, kind: input, shape index: {}]   ;;  %s931_s3 = inlined_call_operand.vmem [shape: f32[512,8], index: 3, kind: output, shape index: {}]  }
   0x1 LB: > { %s582_s13 = sadd.s32 4294967295, %s736_s12   ;;  %p586_p0 = scmp.ge.s32.totalorder %s736_s12, 1  ;;  %s736_s12 = sphi %s758_s12, %s13_s12  }
   0x2   : > { %p138_p1 = scmp.lt.s32.totalorder %s736_s12, 3 }
   0x4   : > { %p139_p2 = pnand %p586_p0, %p138_p1 }
   0x5   : > { %s587_s16 = sshll.u32 (!%p139_p2), %s582_s13, 5 }
   0x6   : > { %142 = sbr.rel (%p139_p2) target bundleno = 222 (0xde), region = 32  ;;  %p163_p3 = scmp.lt.s32.totalorder (!%p139_p2), %s587_s16, 63 }
   0xb   : > { %v708_v0 = vld [vmem:[%s929_s1 + $0x18] sm:$0xff]  ;;  %v707_v1 = vld [vmem:[%s929_s1 + $0x10] sm:$0xff]  ;;  %s933_s16 = smov (!%p163_p3, %s587_s16), 63  ;;  %v706_v2 = vld [vmem:[%s929_s1 + $0x8] sm:$0xff]  ;;  %vm323_vm0 = vcmask 523264   ;;  %vm493_vm1 = vcmask 64512  }
   0xc   : > { %376 = vmatpush.bf16.msra.mxu0 %v708_v0  ;;  %709 = vmatpush.bf16.msra.mxu1 %v708_v0  ;;  %s588_s21 = sshll.u32 %s933_s16, 2  ;;  %v705_v3 = vld [vmem:[%s929_s1] sm:$0xff]  ;;  %s590_s29 = sshll.u32 %s933_s16, 3 }
   0xd   : > { %710 = vmatpush.bf16.msra.mxu2 %v708_v0  ;;  %711 = vmatpush.bf16.msra.mxu3 %v708_v0  ;;  %s784_s26 = scalar_lea.vmem %s928_s0, %s588_s21  ;;  %v821_v20 = vld [vmem:[%s930_s2] ss:$0 sm:$0xff]  ;;  %s829_s5 = scalar_lea.vmem %s931_s3, %s590_s29 }
   0xe   : > { %v689_v4 = vld [vmem:[%s784_s26] sm:$0xff]  ;;  %v690_v8 = vld [vmem:[%s784_s26 + $0x8] sm:$0xff]  ;;  %v691_v12 = vld [vmem:[%s784_s26 + $0x10] sm:$0xff] }
   0xf   : > { %v693_v5 = vld [vmem:[%s784_s26 + $0x20] sm:$0xff]  ;;  %v694_v9 = vld [vmem:[%s784_s26 + $0x28] sm:$0xff]  ;;  %v695_v13 = vld [vmem:[%s784_s26 + $0x30] sm:$0xff] }
  0x10   : > { %377 = vmatpush.bf16.msra.mxu0 %v707_v1  ;;  %712 = vmatpush.bf16.msra.mxu1 %v707_v1  ;;  %v697_v6 = vld [vmem:[%s784_s26 + $0x40] sm:$0xff]  ;;  %v698_v10 = vld [vmem:[%s784_s26 + $0x48] sm:$0xff]  ;;  %v699_v14 = vld [vmem:[%s784_s26 + $0x50] sm:$0xff] }
  0x11   : > { %713 = vmatpush.bf16.msra.mxu2 %v707_v1  ;;  %714 = vmatpush.bf16.msra.mxu3 %v707_v1  ;;  %v701_v7 = vld [vmem:[%s784_s26 + $0x60] sm:$0xff]  ;;  %v702_v11 = vld [vmem:[%s784_s26 + $0x68] sm:$0xff]  ;;  %v703_v15 = vld [vmem:[%s784_s26 + $0x70] sm:$0xff] }
  0x12   : > { %v692_v16 = vld [vmem:[%s784_s26 + $0x18] sm:$0xff] }
  0x13   : > { %v696_v17 = vld [vmem:[%s784_s26 + $0x38] sm:$0xff] }
  0x14   : > { %378 = vmatpush.bf16.msra.mxu0 %v706_v2  ;;  %715 = vmatpush.bf16.msra.mxu1 %v706_v2  ;;  %v700_v18 = vld [vmem:[%s784_s26 + $0x58] sm:$0xff] }
  0x15   : > { %716 = vmatpush.bf16.msra.mxu2 %v706_v2  ;;  %717 = vmatpush.bf16.msra.mxu3 %v706_v2  ;;  %v704_v19 = vld [vmem:[%s784_s26 + $0x78] sm:$0xff] }
  0x18   : > { %379 = vmatpush.bf16.msra.mxu0 %v705_v3  ;;  %718 = vmatpush.bf16.msra.mxu1 %v705_v3 }
  0x19   : > { %719 = vmatpush.bf16.msra.mxu2 %v705_v3  ;;  %720 = vmatpush.bf16.msra.mxu3 %v705_v3 }
  0x1b   : > { %671 = vmatmul.msk.bf16.vlgmr.msra.gmra.mxu0 %vm323_vm0, %v689_v4  ;;  %675 = vmatmul.msk.bf16.vlgmr.msra.gmra.mxu1 %vm323_vm0, %v693_v5 }
  0x1c   : > { %679 = vmatmul.msk.bf16.vlgmr.msra.gmra.mxu2 %vm323_vm0, %v697_v6  ;;  %683 = vmatmul.msk.bf16.vlgmr.msra.gmra.mxu3 %vm323_vm0, %v701_v7 }
  0x2b   : > { %672 = vmatmul.msk.bf16.gmra.mxu0 %vm323_vm0, %v690_v8  ;;  %676 = vmatmul.msk.bf16.gmra.mxu1 %vm323_vm0, %v694_v9 }
  0x2c   : > { %680 = vmatmul.msk.bf16.gmra.mxu2 %vm323_vm0, %v698_v10  ;;  %684 = vmatmul.msk.bf16.gmra.mxu3 %vm323_vm0, %v702_v11 }
  0x3b   : > { %673 = vmatmul.msk.bf16.gmra.mxu0 %vm323_vm0, %v691_v12  ;;  %677 = vmatmul.msk.bf16.gmra.mxu1 %vm323_vm0, %v695_v13 }
  0x3c   : > { %681 = vmatmul.msk.bf16.gmra.mxu2 %vm323_vm0, %v699_v14  ;;  %685 = vmatmul.msk.bf16.gmra.mxu3 %vm323_vm0, %v703_v15 }
  0x4b   : > { %674 = vmatmul.msk.bf16.gmra.mxu0 %vm323_vm0, %v692_v16  ;;  %678 = vmatmul.msk.bf16.gmra.mxu1 %vm323_vm0, %v696_v17 }
  0x4c   : > { %682 = vmatmul.msk.bf16.gmra.mxu2 %vm323_vm0, %v700_v18  ;;  %686 = vmatmul.msk.bf16.gmra.mxu3 %vm323_vm0, %v704_v19 }
  0x98   : > { %v381_v21 = vpop.f32.mrf.mxu0  ;;  %v401_v22 = vpop.f32.mrf.mxu1 }
  0x99   : > { %v382_v23 = vadd.f32 %v821_v20, %v381_v21  ;;  %v402_v24 = vadd.f32 %v821_v20, %v401_v22 }
  0x9b   : > { %v461_v25 = vmax.f32 %v382_v23, 0.0  ;;  %v469_v26 = vmax.f32 %v402_v24, 0.0 }
  0x9d   : > { %494 = vst.msk [vmem:[%s829_s5] sm:$0xff] %vm493_vm1, %v461_v25 }
  0x9e   : > { %502 = vst.msk [vmem:[%s829_s5 + $0x40] sm:$0xff] %vm493_vm1, %v469_v26 }
  0x9f   : > { %v421_v27 = vpop.f32.mrf.mxu2  ;;  %v441_v28 = vpop.f32.mrf.mxu3 }
  0xa0   : > { %v422_v29 = vadd.f32 %v821_v20, %v421_v27  ;;  %v442_v30 = vadd.f32 %v821_v20, %v441_v28  ;;  %v383_v31 = vpop.f32.mrf.mxu0  ;;  %v403_v32 = vpop.f32.mrf.mxu1 }
  0xa1   : > { %v384_v33 = vadd.f32 %v821_v20, %v383_v31  ;;  %v404_v34 = vadd.f32 %v821_v20, %v403_v32 }
  0xa2   : > { %v477_v35 = vmax.f32 %v422_v29, 0.0  ;;  %v485_v36 = vmax.f32 %v442_v30, 0.0 }
  0xa3   : > { %v462_v37 = vmax.f32 %v384_v33, 0.0  ;;  %v470_v38 = vmax.f32 %v404_v34, 0.0 }
  0xa4   : > { %510 = vst.msk [vmem:[%s829_s5 + $0x80] sm:$0xff] %vm493_vm1, %v477_v35 }
  0xa5   : > { %518 = vst.msk [vmem:[%s829_s5 + $0xc0] sm:$0xff] %vm493_vm1, %v485_v36 }
  0xa6   : > { %495 = vst.msk [vmem:[%s829_s5 + $0x8] sm:$0xff] %vm493_vm1, %v462_v37 }
  0xa7   : > { %503 = vst.msk [vmem:[%s829_s5 + $0x48] sm:$0xff] %vm493_vm1, %v470_v38  ;;  %v423_v39 = vpop.f32.mrf.mxu2  ;;  %v443_v40 = vpop.f32.mrf.mxu3 }
  0xa8   : > { %v424_v41 = vadd.f32 %v821_v20, %v423_v39  ;;  %v444_v42 = vadd.f32 %v821_v20, %v443_v40  ;;  %v386_v43 = vpop.f32.mrf.mxu0  ;;  %v406_v44 = vpop.f32.mrf.mxu1 }
  0xa9   : > { %v387_v45 = vadd.f32 %v821_v20, %v386_v43  ;;  %v407_v46 = vadd.f32 %v821_v20, %v406_v44 }
  0xaa   : > { %v478_v47 = vmax.f32 %v424_v41, 0.0  ;;  %v486_v48 = vmax.f32 %v444_v42, 0.0 }
  0xab   : > { %v463_v49 = vmax.f32 %v387_v45, 0.0  ;;  %v471_v50 = vmax.f32 %v407_v46, 0.0 }
  0xac   : > { %511 = vst.msk [vmem:[%s829_s5 + $0x88] sm:$0xff] %vm493_vm1, %v478_v47 }
  0xad   : > { %519 = vst.msk [vmem:[%s829_s5 + $0xc8] sm:$0xff] %vm493_vm1, %v486_v48 }
  0xae   : > { %496 = vst.msk [vmem:[%s829_s5 + $0x10] sm:$0xff] %vm493_vm1, %v463_v49 }
  0xaf   : > { %504 = vst.msk [vmem:[%s829_s5 + $0x50] sm:$0xff] %vm493_vm1, %v471_v50  ;;  %v426_v51 = vpop.f32.mrf.mxu2  ;;  %v446_v52 = vpop.f32.mrf.mxu3 }
  0xb0   : > { %v427_v53 = vadd.f32 %v821_v20, %v426_v51  ;;  %v447_v54 = vadd.f32 %v821_v20, %v446_v52  ;;  %v388_v55 = vpop.f32.mrf.mxu0  ;;  %v408_v56 = vpop.f32.mrf.mxu1 }
  0xb1   : > { %v389_v57 = vadd.f32 %v821_v20, %v388_v55  ;;  %v409_v58 = vadd.f32 %v821_v20, %v408_v56 }
  0xb2   : > { %v479_v59 = vmax.f32 %v427_v53, 0.0  ;;  %v487_v60 = vmax.f32 %v447_v54, 0.0 }
  0xb3   : > { %v464_v61 = vmax.f32 %v389_v57, 0.0  ;;  %v472_v62 = vmax.f32 %v409_v58, 0.0 }
  0xb4   : > { %512 = vst.msk [vmem:[%s829_s5 + $0x90] sm:$0xff] %vm493_vm1, %v479_v59 }
  0xb5   : > { %520 = vst.msk [vmem:[%s829_s5 + $0xd0] sm:$0xff] %vm493_vm1, %v487_v60 }
  0xb6   : > { %497 = vst.msk [vmem:[%s829_s5 + $0x18] sm:$0xff] %vm493_vm1, %v464_v61 }
  0xb7   : > { %505 = vst.msk [vmem:[%s829_s5 + $0x58] sm:$0xff] %vm493_vm1, %v472_v62  ;;  %v428_v63 = vpop.f32.mrf.mxu2  ;;  %v448_v0 = vpop.f32.mrf.mxu3 }
  0xb8   : > { %v429_v1 = vadd.f32 %v821_v20, %v428_v63  ;;  %v449_v2 = vadd.f32 %v821_v20, %v448_v0  ;;  %v391_v3 = vpop.f32.mrf.mxu0  ;;  %v411_v4 = vpop.f32.mrf.mxu1 }
  0xb9   : > { %v392_v5 = vadd.f32 %v821_v20, %v391_v3  ;;  %v412_v6 = vadd.f32 %v821_v20, %v411_v4 }
  0xba   : > { %v480_v7 = vmax.f32 %v429_v1, 0.0  ;;  %v488_v8 = vmax.f32 %v449_v2, 0.0 }
  0xbb   : > { %v465_v9 = vmax.f32 %v392_v5, 0.0  ;;  %v473_v10 = vmax.f32 %v412_v6, 0.0 }
  0xbc   : > { %513 = vst.msk [vmem:[%s829_s5 + $0x98] sm:$0xff] %vm493_vm1, %v480_v7 }
  0xbd   : > { %521 = vst.msk [vmem:[%s829_s5 + $0xd8] sm:$0xff] %vm493_vm1, %v488_v8 }
  0xbe   : > { %498 = vst.msk [vmem:[%s829_s5 + $0x20] sm:$0xff] %vm493_vm1, %v465_v9 }
  0xbf   : > { %506 = vst.msk [vmem:[%s829_s5 + $0x60] sm:$0xff] %vm493_vm1, %v473_v10  ;;  %v431_v11 = vpop.f32.mrf.mxu2  ;;  %v451_v12 = vpop.f32.mrf.mxu3 }
  0xc0   : > { %v432_v13 = vadd.f32 %v821_v20, %v431_v11  ;;  %v452_v14 = vadd.f32 %v821_v20, %v451_v12  ;;  %v393_v15 = vpop.f32.mrf.mxu0  ;;  %v413_v16 = vpop.f32.mrf.mxu1 }
  0xc1   : > { %v394_v17 = vadd.f32 %v821_v20, %v393_v15  ;;  %v414_v18 = vadd.f32 %v821_v20, %v413_v16 }
  0xc2   : > { %v481_v19 = vmax.f32 %v432_v13, 0.0  ;;  %v489_v21 = vmax.f32 %v452_v14, 0.0 }
  0xc3   : > { %v466_v22 = vmax.f32 %v394_v17, 0.0  ;;  %v474_v23 = vmax.f32 %v414_v18, 0.0 }
  0xc4   : > { %514 = vst.msk [vmem:[%s829_s5 + $0xa0] sm:$0xff] %vm493_vm1, %v481_v19 }
  0xc5   : > { %522 = vst.msk [vmem:[%s829_s5 + $0xe0] sm:$0xff] %vm493_vm1, %v489_v21 }
  0xc6   : > { %499 = vst.msk [vmem:[%s829_s5 + $0x28] sm:$0xff] %vm493_vm1, %v466_v22 }
  0xc7   : > { %507 = vst.msk [vmem:[%s829_s5 + $0x68] sm:$0xff] %vm493_vm1, %v474_v23  ;;  %v433_v24 = vpop.f32.mrf.mxu2  ;;  %v453_v25 = vpop.f32.mrf.mxu3 }
  0xc8   : > { %v434_v26 = vadd.f32 %v821_v20, %v433_v24  ;;  %v454_v27 = vadd.f32 %v821_v20, %v453_v25  ;;  %v396_v28 = vpop.f32.mrf.mxu0  ;;  %v416_v29 = vpop.f32.mrf.mxu1 }
  0xc9   : > { %v397_v30 = vadd.f32 %v821_v20, %v396_v28  ;;  %v417_v31 = vadd.f32 %v821_v20, %v416_v29 }
  0xca   : > { %v482_v32 = vmax.f32 %v434_v26, 0.0  ;;  %v490_v33 = vmax.f32 %v454_v27, 0.0 }
  0xcb   : > { %v467_v34 = vmax.f32 %v397_v30, 0.0  ;;  %v475_v35 = vmax.f32 %v417_v31, 0.0 }
  0xcc   : > { %515 = vst.msk [vmem:[%s829_s5 + $0xa8] sm:$0xff] %vm493_vm1, %v482_v32 }
  0xcd   : > { %523 = vst.msk [vmem:[%s829_s5 + $0xe8] sm:$0xff] %vm493_vm1, %v490_v33 }
  0xce   : > { %500 = vst.msk [vmem:[%s829_s5 + $0x30] sm:$0xff] %vm493_vm1, %v467_v34 }
  0xcf   : > { %508 = vst.msk [vmem:[%s829_s5 + $0x70] sm:$0xff] %vm493_vm1, %v475_v35  ;;  %v436_v36 = vpop.f32.mrf.mxu2  ;;  %v456_v37 = vpop.f32.mrf.mxu3 }
  0xd0   : > { %v437_v38 = vadd.f32 %v821_v20, %v436_v36  ;;  %v457_v39 = vadd.f32 %v821_v20, %v456_v37  ;;  %v398_v40 = vpop.f32.mrf.mxu0  ;;  %v418_v41 = vpop.f32.mrf.mxu1 }
  0xd1   : > { %v399_v42 = vadd.f32 %v821_v20, %v398_v40  ;;  %v419_v43 = vadd.f32 %v821_v20, %v418_v41 }
  0xd2   : > { %v483_v44 = vmax.f32 %v437_v38, 0.0  ;;  %v491_v45 = vmax.f32 %v457_v39, 0.0 }
  0xd3   : > { %v468_v46 = vmax.f32 %v399_v42, 0.0  ;;  %v476_v47 = vmax.f32 %v419_v43, 0.0 }
  0xd4   : > { %516 = vst.msk [vmem:[%s829_s5 + $0xb0] sm:$0xff] %vm493_vm1, %v483_v44 }
  0xd5   : > { %524 = vst.msk [vmem:[%s829_s5 + $0xf0] sm:$0xff] %vm493_vm1, %v491_v45 }
  0xd6   : > { %501 = vst.msk [vmem:[%s829_s5 + $0x38] sm:$0xff] %vm493_vm1, %v468_v46 }
  0xd7   : > { %509 = vst.msk [vmem:[%s829_s5 + $0x78] sm:$0xff] %vm493_vm1, %v476_v47  ;;  %v438_v48 = vpop.f32.mrf.mxu2  ;;  %v458_v49 = vpop.f32.mrf.mxu3 }
  0xd8   : > { %v439_v50 = vadd.f32 %v821_v20, %v438_v48  ;;  %v459_v51 = vadd.f32 %v821_v20, %v458_v49 }
  0xda   : > { %v484_v52 = vmax.f32 %v439_v50, 0.0  ;;  %v492_v53 = vmax.f32 %v459_v51, 0.0 }
  0xdc   : > { %517 = vst.msk [vmem:[%s829_s5 + $0xb8] sm:$0xff] %vm493_vm1, %v484_v52 }
  0xdd   : > { %525 = vst.msk [vmem:[%s829_s5 + $0xf8] sm:$0xff] %vm493_vm1, %v492_v53 }
  0xde PF: > { %s13_s12 = sadd.s32 1, %s736_s12  }
  0xdf   : > { %p10_p4 = scmp.ge.s32.totalorder %s13_s12, 4  }
  0xe1   :  { %12 = sbr.rel (!%p10_p4) target bundleno = 1 (0x1), region = 62 }

// kernel: model_forward.21
= control target key start
LH: loop header
LB: loop body
LE: loop exit
PB: predicated region body
PF: predicated region fallthrough
CT: control target
= control target key end

     0   :  { %vm115_vm0 = vcmask 654336   ;;  %vm205_vm1 = vcmask 64512   ;;  %s449_s1 = inlined_call_operand.vmem [shape: bf16[80,8], index: 1, kind: input, shape index: {}]   ;;  %s450_s2 = inlined_call_operand.vmem [shape: f32[1,8], index: 2, kind: input, shape index: {}]   ;;  %s451_s0 = inlined_call_operand.vmem [shape: bf16[128,80], index: 0, kind: input, shape index: {}]   ;;  %s452_s3 = inlined_call_operand.vmem [shape: f32[128,8], index: 3, kind: output, shape index: {}]  }
   0x1   :  { %v298_v0 = vld [vmem:[%s449_s1 + $0x20] sm:$0xff]  ;;  %v297_v1 = vld [vmem:[%s449_s1 + $0x18] sm:$0xff]  ;;  %v296_v2 = vld [vmem:[%s449_s1 + $0x10] sm:$0xff] }
   0x2   :  { %143 = vmatpush.bf16.msra.mxu0 %v298_v0  ;;  %299 = vmatpush.bf16.msra.mxu1 %v298_v0  ;;  %v295_v3 = vld [vmem:[%s449_s1 + $0x8] sm:$0xff]  ;;  %v294_v4 = vld [vmem:[%s449_s1] sm:$0xff]  ;;  %v288_v6 = vld [vmem:[%s451_s0 + $0x10] sm:$0xff] }
   0x3   :  { %300 = vmatpush.bf16.msra.mxu2 %v298_v0  ;;  %301 = vmatpush.bf16.msra.mxu3 %v298_v0  ;;  %v286_v5 = vld [vmem:[%s451_s0] sm:$0xff]  ;;  %v292_v8 = vld [vmem:[%s451_s0 + $0x30] sm:$0xff]  ;;  %v287_v9 = vld [vmem:[%s451_s0 + $0x8] sm:$0xff] }
   0x4   :  { %v290_v7 = vld [vmem:[%s451_s0 + $0x20] sm:$0xff]  ;;  %v289_v10 = vld [vmem:[%s451_s0 + $0x18] sm:$0xff]  ;;  %v291_v11 = vld [vmem:[%s451_s0 + $0x28] sm:$0xff] }
   0x5   :  { %v293_v12 = vld [vmem:[%s451_s0 + $0x38] sm:$0xff]  ;;  %v314_v13 = vld [vmem:[%s450_s2] ss:$0 sm:$0xff] }
   0x6   :  { %144 = vmatpush.bf16.msra.mxu0 %v297_v1  ;;  %302 = vmatpush.bf16.msra.mxu1 %v297_v1 }
   0x7   :  { %303 = vmatpush.bf16.msra.mxu2 %v297_v1  ;;  %304 = vmatpush.bf16.msra.mxu3 %v297_v1 }
   0xa   :  { %145 = vmatpush.bf16.msra.mxu0 %v296_v2  ;;  %305 = vmatpush.bf16.msra.mxu1 %v296_v2 }
   0xb   :  { %306 = vmatpush.bf16.msra.mxu2 %v296_v2  ;;  %307 = vmatpush.bf16.msra.mxu3 %v296_v2 }
   0xe   :  { %146 = vmatpush.bf16.msra.mxu0 %v295_v3  ;;  %308 = vmatpush.bf16.msra.mxu1 %v295_v3 }
   0xf   :  { %309 = vmatpush.bf16.msra.mxu2 %v295_v3  ;;  %310 = vmatpush.bf16.msra.mxu3 %v295_v3 }
  0x12   :  { %147 = vmatpush.bf16.msra.mxu0 %v294_v4  ;;  %311 = vmatpush.bf16.msra.mxu1 %v294_v4 }
  0x13   :  { %312 = vmatpush.bf16.msra.mxu2 %v294_v4  ;;  %313 = vmatpush.bf16.msra.mxu3 %v294_v4 }
  0x15   :  { %278 = vmatmul.msk.bf16.vlgmr.msra.gmra.mxu0 %vm115_vm0, %v286_v5  ;;  %280 = vmatmul.msk.bf16.vlgmr.msra.gmra.mxu1 %vm115_vm0, %v288_v6 }
  0x16   :  { %282 = vmatmul.msk.bf16.vlgmr.msra.gmra.mxu2 %vm115_vm0, %v290_v7  ;;  %284 = vmatmul.msk.bf16.vlgmr.msra.gmra.mxu3 %vm115_vm0, %v292_v8 }
  0x25   :  { %279 = vmatmul.msk.bf16.gmra.mxu0 %vm115_vm0, %v287_v9  ;;  %281 = vmatmul.msk.bf16.gmra.mxu1 %vm115_vm0, %v289_v10 }
  0x26   :  { %283 = vmatmul.msk.bf16.gmra.mxu2 %vm115_vm0, %v291_v11  ;;  %285 = vmatmul.msk.bf16.gmra.mxu3 %vm115_vm0, %v293_v12 }
  0x92   :  { %v149_v14 = vpop.f32.mrf.mxu0  ;;  %v159_v15 = vpop.f32.mrf.mxu1 }
  0x93   :  { %v150_v16 = vadd.f32 %v314_v13, %v149_v14  ;;  %v160_v17 = vadd.f32 %v314_v13, %v159_v15 }
  0x95   :  { %v189_v18 = vmax.f32 %v150_v16, 0.0  ;;  %v193_v19 = vmax.f32 %v160_v17, 0.0 }
  0x97   :  { %206 = vst.msk [vmem:[%s452_s3] sm:$0xff] %vm205_vm1, %v189_v18 }
  0x98   :  { %210 = vst.msk [vmem:[%s452_s3 + $0x20] sm:$0xff] %vm205_vm1, %v193_v19 }
  0x99   :  { %v169_v20 = vpop.f32.mrf.mxu2  ;;  %v179_v21 = vpop.f32.mrf.mxu3 }
  0x9a   :  { %v170_v22 = vadd.f32 %v314_v13, %v169_v20  ;;  %v180_v23 = vadd.f32 %v314_v13, %v179_v21  ;;  %v151_v24 = vpop.f32.mrf.mxu0  ;;  %v161_v25 = vpop.f32.mrf.mxu1 }
  0x9b   :  { %v152_v26 = vadd.f32 %v314_v13, %v151_v24  ;;  %v162_v27 = vadd.f32 %v314_v13, %v161_v25 }
  0x9c   :  { %v197_v28 = vmax.f32 %v170_v22, 0.0  ;;  %v201_v29 = vmax.f32 %v180_v23, 0.0 }
  0x9d   :  { %v190_v30 = vmax.f32 %v152_v26, 0.0  ;;  %v194_v31 = vmax.f32 %v162_v27, 0.0 }
  0x9e   :  { %214 = vst.msk [vmem:[%s452_s3 + $0x40] sm:$0xff] %vm205_vm1, %v197_v28 }
  0x9f   :  { %218 = vst.msk [vmem:[%s452_s3 + $0x60] sm:$0xff] %vm205_vm1, %v201_v29 }
  0xa0   :  { %207 = vst.msk [vmem:[%s452_s3 + $0x8] sm:$0xff] %vm205_vm1, %v190_v30 }
  0xa1   :  { %211 = vst.msk [vmem:[%s452_s3 + $0x28] sm:$0xff] %vm205_vm1, %v194_v31  ;;  %v171_v32 = vpop.f32.mrf.mxu2  ;;  %v181_v33 = vpop.f32.mrf.mxu3 }
  0xa2   :  { %v172_v34 = vadd.f32 %v314_v13, %v171_v32  ;;  %v182_v35 = vadd.f32 %v314_v13, %v181_v33  ;;  %v154_v36 = vpop.f32.mrf.mxu0  ;;  %v164_v37 = vpop.f32.mrf.mxu1 }
  0xa3   :  { %v155_v38 = vadd.f32 %v314_v13, %v154_v36  ;;  %v165_v39 = vadd.f32 %v314_v13, %v164_v37 }
  0xa4   :  { %v198_v40 = vmax.f32 %v172_v34, 0.0  ;;  %v202_v41 = vmax.f32 %v182_v35, 0.0 }
  0xa5   :  { %v191_v42 = vmax.f32 %v155_v38, 0.0  ;;  %v195_v43 = vmax.f32 %v165_v39, 0.0 }
  0xa6   :  { %215 = vst.msk [vmem:[%s452_s3 + $0x48] sm:$0xff] %vm205_vm1, %v198_v40 }
  0xa7   :  { %219 = vst.msk [vmem:[%s452_s3 + $0x68] sm:$0xff] %vm205_vm1, %v202_v41 }
  0xa8   :  { %208 = vst.msk [vmem:[%s452_s3 + $0x10] sm:$0xff] %vm205_vm1, %v191_v42 }
  0xa9   :  { %212 = vst.msk [vmem:[%s452_s3 + $0x30] sm:$0xff] %vm205_vm1, %v195_v43  ;;  %v174_v44 = vpop.f32.mrf.mxu2  ;;  %v184_v45 = vpop.f32.mrf.mxu3 }
  0xaa   :  { %v175_v46 = vadd.f32 %v314_v13, %v174_v44  ;;  %v185_v47 = vadd.f32 %v314_v13, %v184_v45  ;;  %v156_v48 = vpop.f32.mrf.mxu0  ;;  %v166_v49 = vpop.f32.mrf.mxu1 }
  0xab   :  { %v157_v50 = vadd.f32 %v314_v13, %v156_v48  ;;  %v167_v51 = vadd.f32 %v314_v13, %v166_v49 }
  0xac   :  { %v199_v52 = vmax.f32 %v175_v46, 0.0  ;;  %v203_v53 = vmax.f32 %v185_v47, 0.0 }
  0xad   :  { %v192_v54 = vmax.f32 %v157_v50, 0.0  ;;  %v196_v55 = vmax.f32 %v167_v51, 0.0 }
  0xae   :  { %216 = vst.msk [vmem:[%s452_s3 + $0x50] sm:$0xff] %vm205_vm1, %v199_v52 }
  0xaf   :  { %220 = vst.msk [vmem:[%s452_s3 + $0x70] sm:$0xff] %vm205_vm1, %v203_v53 }
  0xb0   :  { %209 = vst.msk [vmem:[%s452_s3 + $0x18] sm:$0xff] %vm205_vm1, %v192_v54 }
  0xb1   :  { %213 = vst.msk [vmem:[%s452_s3 + $0x38] sm:$0xff] %vm205_vm1, %v196_v55  ;;  %v176_v56 = vpop.f32.mrf.mxu2  ;;  %v186_v57 = vpop.f32.mrf.mxu3 }
  0xb2   :  { %v177_v58 = vadd.f32 %v314_v13, %v176_v56  ;;  %v187_v59 = vadd.f32 %v314_v13, %v186_v57 }
  0xb4   :  { %v200_v60 = vmax.f32 %v177_v58, 0.0  ;;  %v204_v61 = vmax.f32 %v187_v59, 0.0 }
  0xb6   :  { %217 = vst.msk [vmem:[%s452_s3 + $0x58] sm:$0xff] %vm205_vm1, %v200_v60 }
  0xb7   :  { %221 = vst.msk [vmem:[%s452_s3 + $0x78] sm:$0xff] %vm205_vm1, %v204_v61 }

// kernel: model_forward.22
= control target key start
LH: loop header
LB: loop body
LE: loop exit
PB: predicated region body
PF: predicated region fallthrough
CT: control target
= control target key end

     0   :  { %vm118_vm0 = vcmask 654336   ;;  %vm240_vm1 = vcmask 64512   ;;  %s555_s1 = inlined_call_operand.vmem [shape: bf16[80,8], index: 1, kind: input, shape index: {}]   ;;  %s556_s2 = inlined_call_operand.vmem [shape: f32[1,8], index: 2, kind: input, shape index: {}]   ;;  %s557_s0 = inlined_call_operand.vmem [shape: bf16[128,80], index: 0, kind: input, shape index: {}]   ;;  %s558_s3 = inlined_call_operand.vmem [shape: f32[128,8], index: 3, kind: input, shape index: {}]   ;;  %s559_s4 = inlined_call_operand.vmem [shape: f32[128,8], index: 4, kind: output, shape index: {}]  }
   0x1   :  { %v333_v0 = vld [vmem:[%s555_s1 + $0x20] sm:$0xff]  ;;  %v332_v1 = vld [vmem:[%s555_s1 + $0x18] sm:$0xff]  ;;  %v331_v2 = vld [vmem:[%s555_s1 + $0x10] sm:$0xff] }
   0x2   :  { %146 = vmatpush.bf16.msra.mxu0 %v333_v0  ;;  %334 = vmatpush.bf16.msra.mxu1 %v333_v0  ;;  %v330_v3 = vld [vmem:[%s555_s1 + $0x8] sm:$0xff]  ;;  %v329_v4 = vld [vmem:[%s555_s1] sm:$0xff]  ;;  %v323_v6 = vld [vmem:[%s557_s0 + $0x10] sm:$0xff] }
   0x3   :  { %335 = vmatpush.bf16.msra.mxu2 %v333_v0  ;;  %336 = vmatpush.bf16.msra.mxu3 %v333_v0  ;;  %v321_v5 = vld [vmem:[%s557_s0] sm:$0xff]  ;;  %v327_v8 = vld [vmem:[%s557_s0 + $0x30] sm:$0xff]  ;;  %v322_v9 = vld [vmem:[%s557_s0 + $0x8] sm:$0xff] }
   0x4   :  { %v325_v7 = vld [vmem:[%s557_s0 + $0x20] sm:$0xff]  ;;  %v324_v10 = vld [vmem:[%s557_s0 + $0x18] sm:$0xff]  ;;  %v326_v11 = vld [vmem:[%s557_s0 + $0x28] sm:$0xff] }
   0x5   :  { %v328_v12 = vld [vmem:[%s557_s0 + $0x38] sm:$0xff]  ;;  %v425_v13 = vld [vmem:[%s556_s2] ss:$0 sm:$0xff]  ;;  %v193_v31 = vld [vmem:[%s558_s3 + $0x8] sm:$0xff] }
   0x6   :  { %147 = vmatpush.bf16.msra.mxu0 %v332_v1  ;;  %337 = vmatpush.bf16.msra.mxu1 %v332_v1  ;;  %v192_v15 = vld [vmem:[%s558_s3] sm:$0xff]  ;;  %v197_v33 = vld [vmem:[%s558_s3 + $0x28] sm:$0xff]  ;;  %v194_v51 = vld [vmem:[%s558_s3 + $0x10] sm:$0xff] }
   0x7   :  { %338 = vmatpush.bf16.msra.mxu2 %v332_v1  ;;  %339 = vmatpush.bf16.msra.mxu3 %v332_v1  ;;  %v196_v17 = vld [vmem:[%s558_s3 + $0x20] sm:$0xff]  ;;  %v201_v45 = vld [vmem:[%s558_s3 + $0x48] sm:$0xff]  ;;  %v198_v53 = vld [vmem:[%s558_s3 + $0x30] sm:$0xff] }
   0x8   :  { %v200_v25 = vld [vmem:[%s558_s3 + $0x40] sm:$0xff]  ;;  %v205_v47 = vld [vmem:[%s558_s3 + $0x68] sm:$0xff]  ;;  %v202_v1 = vld [vmem:[%s558_s3 + $0x50] sm:$0xff] }
   0x9   :  { %v204_v27 = vld [vmem:[%s558_s3 + $0x60] sm:$0xff] }
   0xa   :  { %148 = vmatpush.bf16.msra.mxu0 %v331_v2  ;;  %340 = vmatpush.bf16.msra.mxu1 %v331_v2 }
   0xb   :  { %341 = vmatpush.bf16.msra.mxu2 %v331_v2  ;;  %342 = vmatpush.bf16.msra.mxu3 %v331_v2 }
   0xe   :  { %149 = vmatpush.bf16.msra.mxu0 %v330_v3  ;;  %343 = vmatpush.bf16.msra.mxu1 %v330_v3 }
   0xf   :  { %344 = vmatpush.bf16.msra.mxu2 %v330_v3  ;;  %345 = vmatpush.bf16.msra.mxu3 %v330_v3  ;;  %v206_v3 = vld [vmem:[%s558_s3 + $0x70] sm:$0xff] }
  0x12   :  { %150 = vmatpush.bf16.msra.mxu0 %v329_v4  ;;  %346 = vmatpush.bf16.msra.mxu1 %v329_v4 }
  0x13   :  { %347 = vmatpush.bf16.msra.mxu2 %v329_v4  ;;  %348 = vmatpush.bf16.msra.mxu3 %v329_v4 }
  0x15   :  { %313 = vmatmul.msk.bf16.vlgmr.msra.gmra.mxu0 %vm118_vm0, %v321_v5  ;;  %315 = vmatmul.msk.bf16.vlgmr.msra.gmra.mxu1 %vm118_vm0, %v323_v6 }
  0x16   :  { %317 = vmatmul.msk.bf16.vlgmr.msra.gmra.mxu2 %vm118_vm0, %v325_v7  ;;  %319 = vmatmul.msk.bf16.vlgmr.msra.gmra.mxu3 %vm118_vm0, %v327_v8  ;;  %v195_v7 = vld [vmem:[%s558_s3 + $0x18] sm:$0xff] }
  0x25   :  { %314 = vmatmul.msk.bf16.gmra.mxu0 %vm118_vm0, %v322_v9  ;;  %316 = vmatmul.msk.bf16.gmra.mxu1 %vm118_vm0, %v324_v10  ;;  %v199_v9 = vld [vmem:[%s558_s3 + $0x38] sm:$0xff] }
  0x26   :  { %318 = vmatmul.msk.bf16.gmra.mxu2 %vm118_vm0, %v326_v11  ;;  %320 = vmatmul.msk.bf16.gmra.mxu3 %vm118_vm0, %v328_v12 }
  0x92   :  { %v152_v14 = vpop.f32.mrf.mxu0  ;;  %v162_v16 = vpop.f32.mrf.mxu1 }
  0x93   :  { %v153_v18 = vadd.f32 %v425_v13, %v152_v14  ;;  %v163_v19 = vadd.f32 %v425_v13, %v162_v16 }
  0x95   :  { %v208_v20 = vadd.f32 %v192_v15, %v153_v18  ;;  %v212_v21 = vadd.f32 %v196_v17, %v163_v19 }
  0x97   :  { %v224_v22 = vmax.f32 %v208_v20, 0.0  ;;  %v228_v23 = vmax.f32 %v212_v21, 0.0 }
  0x99   :  { %241 = vst.msk [vmem:[%s559_s4] sm:$0xff] %vm240_vm1, %v224_v22  ;;  %v172_v24 = vpop.f32.mrf.mxu2  ;;  %v182_v26 = vpop.f32.mrf.mxu3  ;;  %v203_v22 = vld [vmem:[%s558_s3 + $0x58] sm:$0xff] }
  0x9a   :  { %245 = vst.msk [vmem:[%s559_s4 + $0x20] sm:$0xff] %vm240_vm1, %v228_v23  ;;  %v173_v28 = vadd.f32 %v425_v13, %v172_v24  ;;  %v183_v29 = vadd.f32 %v425_v13, %v182_v26  ;;  %v154_v30 = vpop.f32.mrf.mxu0  ;;  %v164_v32 = vpop.f32.mrf.mxu1  ;;  %v207_v24 = vld [vmem:[%s558_s3 + $0x78] sm:$0xff] }
  0x9b   :  { %v155_v34 = vadd.f32 %v425_v13, %v154_v30  ;;  %v165_v35 = vadd.f32 %v425_v13, %v164_v32 }
  0x9c   :  { %v216_v36 = vadd.f32 %v200_v25, %v173_v28  ;;  %v220_v37 = vadd.f32 %v204_v27, %v183_v29 }
  0x9d   :  { %v209_v38 = vadd.f32 %v193_v31, %v155_v34  ;;  %v213_v39 = vadd.f32 %v197_v33, %v165_v35 }
  0x9e   :  { %v232_v40 = vmax.f32 %v216_v36, 0.0  ;;  %v236_v41 = vmax.f32 %v220_v37, 0.0 }
  0x9f   :  { %v225_v42 = vmax.f32 %v209_v38, 0.0  ;;  %v229_v43 = vmax.f32 %v213_v39, 0.0 }
  0xa0   :  { %249 = vst.msk [vmem:[%s559_s4 + $0x40] sm:$0xff] %vm240_vm1, %v232_v40 }
  0xa1   :  { %253 = vst.msk [vmem:[%s559_s4 + $0x60] sm:$0xff] %vm240_vm1, %v236_v41  ;;  %v174_v44 = vpop.f32.mrf.mxu2  ;;  %v184_v46 = vpop.f32.mrf.mxu3 }
  0xa2   :  { %242 = vst.msk [vmem:[%s559_s4 + $0x8] sm:$0xff] %vm240_vm1, %v225_v42  ;;  %v175_v48 = vadd.f32 %v425_v13, %v174_v44  ;;  %v185_v49 = vadd.f32 %v425_v13, %v184_v46  ;;  %v157_v50 = vpop.f32.mrf.mxu0  ;;  %v167_v52 = vpop.f32.mrf.mxu1 }
  0xa3   :  { %246 = vst.msk [vmem:[%s559_s4 + $0x28] sm:$0xff] %vm240_vm1, %v229_v43  ;;  %v158_v54 = vadd.f32 %v425_v13, %v157_v50  ;;  %v168_v55 = vadd.f32 %v425_v13, %v167_v52 }
  0xa4   :  { %v217_v56 = vadd.f32 %v201_v45, %v175_v48  ;;  %v221_v57 = vadd.f32 %v205_v47, %v185_v49 }
  0xa5   :  { %v210_v58 = vadd.f32 %v194_v51, %v158_v54  ;;  %v214_v59 = vadd.f32 %v198_v53, %v168_v55 }
  0xa6   :  { %v233_v60 = vmax.f32 %v217_v56, 0.0  ;;  %v237_v61 = vmax.f32 %v221_v57, 0.0 }
  0xa7   :  { %v226_v62 = vmax.f32 %v210_v58, 0.0  ;;  %v230_v63 = vmax.f32 %v214_v59, 0.0 }
  0xa8   :  { %250 = vst.msk [vmem:[%s559_s4 + $0x48] sm:$0xff] %vm240_vm1, %v233_v60 }
  0xa9   :  { %254 = vst.msk [vmem:[%s559_s4 + $0x68] sm:$0xff] %vm240_vm1, %v237_v61  ;;  %v177_v0 = vpop.f32.mrf.mxu2  ;;  %v187_v2 = vpop.f32.mrf.mxu3 }
  0xaa   :  { %243 = vst.msk [vmem:[%s559_s4 + $0x10] sm:$0xff] %vm240_vm1, %v226_v62  ;;  %v178_v4 = vadd.f32 %v425_v13, %v177_v0  ;;  %v188_v5 = vadd.f32 %v425_v13, %v187_v2  ;;  %v159_v6 = vpop.f32.mrf.mxu0  ;;  %v169_v8 = vpop.f32.mrf.mxu1 }
  0xab   :  { %247 = vst.msk [vmem:[%s559_s4 + $0x30] sm:$0xff] %vm240_vm1, %v230_v63  ;;  %v160_v10 = vadd.f32 %v425_v13, %v159_v6  ;;  %v170_v11 = vadd.f32 %v425_v13, %v169_v8 }
  0xac   :  { %v218_v12 = vadd.f32 %v202_v1, %v178_v4  ;;  %v222_v14 = vadd.f32 %v206_v3, %v188_v5 }
  0xad   :  { %v211_v15 = vadd.f32 %v195_v7, %v160_v10  ;;  %v215_v16 = vadd.f32 %v199_v9, %v170_v11 }
  0xae   :  { %v234_v17 = vmax.f32 %v218_v12, 0.0  ;;  %v238_v18 = vmax.f32 %v222_v14, 0.0 }
  0xaf   :  { %v227_v19 = vmax.f32 %v211_v15, 0.0  ;;  %v231_v20 = vmax.f32 %v215_v16, 0.0 }
  0xb0   :  { %251 = vst.msk [vmem:[%s559_s4 + $0x50] sm:$0xff] %vm240_vm1, %v234_v17 }
  0xb1   :  { %255 = vst.msk [vmem:[%s559_s4 + $0x70] sm:$0xff] %vm240_vm1, %v238_v18  ;;  %v179_v21 = vpop.f32.mrf.mxu2  ;;  %v189_v23 = vpop.f32.mrf.mxu3 }
  0xb2   :  { %244 = vst.msk [vmem:[%s559_s4 + $0x18] sm:$0xff] %vm240_vm1, %v227_v19  ;;  %v180_v25 = vadd.f32 %v425_v13, %v179_v21  ;;  %v190_v26 = vadd.f32 %v425_v13, %v189_v23 }
  0xb3   :  { %248 = vst.msk [vmem:[%s559_s4 + $0x38] sm:$0xff] %vm240_vm1, %v231_v20 }
  0xb4   :  { %v219_v27 = vadd.f32 %v203_v22, %v180_v25  ;;  %v223_v28 = vadd.f32 %v207_v24, %v190_v26 }
  0xb6   :  { %v235_v29 = vmax.f32 %v219_v27, 0.0  ;;  %v239_v30 = vmax.f32 %v223_v28, 0.0 }
  0xb8   :  { %252 = vst.msk [vmem:[%s559_s4 + $0x58] sm:$0xff] %vm240_vm1, %v235_v29 }
  0xb9   :  { %256 = vst.msk [vmem:[%s559_s4 + $0x78] sm:$0xff] %vm240_vm1, %v239_v30 }

// kernel: model_forward.25
= control target key start
LH: loop header
LB: loop body
LE: loop exit
PB: predicated region body
PF: predicated region fallthrough
CT: control target
= control target key end

     0   :  { %vm73_vm0 = vcmask 654336   ;;  %vm103_vm1 = vcmask 130048   ;;  %s211_s1 = inlined_call_operand.vmem [shape: bf16[80,16], index: 1, kind: input, shape index: {}]   ;;  %s212_s2 = inlined_call_operand.vmem [shape: f32[1,16], index: 2, kind: input, shape index: {}]   ;;  %s213_s0 = inlined_call_operand.vmem [shape: bf16[32,80], index: 0, kind: input, shape index: {}]   ;;  %s214_s3 = inlined_call_operand.vmem [shape: f32[32,16], index: 3, kind: output, shape index: {}]  }
   0x1   :  { %v148_v0 = vld [vmem:[%s211_s1 + $0x20] sm:$0xff]  ;;  %v147_v1 = vld [vmem:[%s211_s1 + $0x18] sm:$0xff]  ;;  %v146_v2 = vld [vmem:[%s211_s1 + $0x10] sm:$0xff] }
   0x2   :  { %83 = vmatpush.bf16.msra.mxu0 %v148_v0  ;;  %149 = vmatpush.bf16.msra.mxu1 %v148_v0  ;;  %v145_v3 = vld [vmem:[%s211_s1 + $0x8] sm:$0xff]  ;;  %v144_v4 = vld [vmem:[%s211_s1] sm:$0xff] }
   0x3   :  { %v142_v5 = vld [vmem:[%s213_s0] sm:$0xff]  ;;  %v143_v6 = vld [vmem:[%s213_s0 + $0x8] sm:$0xff] }
   0x4   :  { %v154_v7 = vld [vmem:[%s212_s2] ss:$0 sm:$0xff] }
   0x6   :  { %84 = vmatpush.bf16.msra.mxu0 %v147_v1  ;;  %150 = vmatpush.bf16.msra.mxu1 %v147_v1 }
   0xa   :  { %85 = vmatpush.bf16.msra.mxu0 %v146_v2  ;;  %151 = vmatpush.bf16.msra.mxu1 %v146_v2 }
   0xe   :  { %86 = vmatpush.bf16.msra.mxu0 %v145_v3  ;;  %152 = vmatpush.bf16.msra.mxu1 %v145_v3 }
  0x12   :  { %87 = vmatpush.bf16.msra.mxu0 %v144_v4  ;;  %153 = vmatpush.bf16.msra.mxu1 %v144_v4 }
  0x15   :  { %140 = vmatmul.msk.bf16.vlgmr.msra.gmra.mxu0 %vm73_vm0, %v142_v5  ;;  %141 = vmatmul.msk.bf16.vlgmr.msra.gmra.mxu1 %vm73_vm0, %v143_v6 }
  0x92   :  { %v89_v8 = vpop.f32.mrf.mxu0  ;;  %v94_v9 = vpop.f32.mrf.mxu1 }
  0x93   :  { %v90_v10 = vadd.f32 %v154_v7, %v89_v8  ;;  %v95_v11 = vadd.f32 %v154_v7, %v94_v9 }
  0x95   :  { %v99_v12 = vmax.f32 %v90_v10, 0.0  ;;  %v101_v13 = vmax.f32 %v95_v11, 0.0 }
  0x97   :  { %104 = vst.msk [vmem:[%s214_s3] sm:$0xff] %vm103_vm1, %v99_v12 }
  0x98   :  { %106 = vst.msk [vmem:[%s214_s3 + $0x10] sm:$0xff] %vm103_vm1, %v101_v13 }
  0x9a   :  { %v91_v14 = vpop.f32.mrf.mxu0  ;;  %v96_v15 = vpop.f32.mrf.mxu1 }
  0x9b   :  { %v92_v16 = vadd.f32 %v154_v7, %v91_v14  ;;  %v97_v17 = vadd.f32 %v154_v7, %v96_v15 }
  0x9d   :  { %v100_v18 = vmax.f32 %v92_v16, 0.0  ;;  %v102_v19 = vmax.f32 %v97_v17, 0.0 }
  0x9f   :  { %105 = vst.msk [vmem:[%s214_s3 + $0x8] sm:$0xff] %vm103_vm1, %v100_v18 }
  0xa0   :  { %107 = vst.msk [vmem:[%s214_s3 + $0x18] sm:$0xff] %vm103_vm1, %v102_v19 }

// kernel: model_forward.26
= control target key start
LH: loop header
LB: loop body
LE: loop exit
PB: predicated region body
PF: predicated region fallthrough
CT: control target
= control target key end

     0   :  { %vm65_vm0 = vcmask 130048   ;;  %s433_s1 = inlined_call_operand.vmem [shape: bf16[144,16], index: 1, kind: input, shape index: {}]   ;;  %s434_s0 = inlined_call_operand.vmem [shape: bf16[32,144], index: 0, kind: input, shape index: {}]   ;;  %s435_s3 = inlined_call_operand.vmem [shape: bf16[16,16], index: 3, kind: input, shape index: {}]   ;;  %s436_s2 = inlined_call_operand.vmem [shape: bf16[32,16], index: 2, kind: input, shape index: {}]   ;;  %s437_s4 = inlined_call_operand.vmem [shape: f32[1,16], index: 4, kind: input, shape index: {}]   ;;  %s438_s5 = inlined_call_operand.vmem [shape: f32[32,16], index: 5, kind: output, shape index: {}]  }
   0x1   :  { %v306_v0 = vld [vmem:[%s433_s1 + $0x38] sm:$0xff]  ;;  %v307_v1 = vld [vmem:[%s433_s1 + $0x40] sm:$0xff]  ;;  %v245_v3 = vld [vmem:[%s434_s0 + $0x8] sm:$0xf0] }
   0x2   :  { %v295_v2 = vld [vmem:[%s434_s0 + $0x4] sm:$0xf]  ;;  %169 = vmatpush.bf16.msra.mxu1 %v306_v0  ;;  %311 = vmatpush.bf16.msra.mxu3 %v306_v0  ;;  %v305_v4 = vld [vmem:[%s433_s1 + $0x30] sm:$0xff]  ;;  %v304_v8 = vld [vmem:[%s433_s1 + $0x28] sm:$0xff] }
   0x3   :  { %v310_v5 = vld [vmem:[%s435_s3] sm:$0xff]  ;;  %195 = vmatpush.bf16.msra.mxu2 %v307_v1  ;;  %v248_v6 = vor.u32 %v295_v2, %v245_v3  ;;  %v302_v10 = vld [vmem:[%s433_s1 + $0x18] sm:$0xff]  ;;  %v297_v11 = vld [vmem:[%s434_s0 + $0x14] sm:$0xf] }
   0x4   :  { %v308_v7 = vld [vmem:[%s436_s2] sm:$0xff]  ;;  %79 = vmatpush.bf16.msra.mxu0 %v310_v5  ;;  %v253_v12 = vld [vmem:[%s434_s0 + $0x18] sm:$0xf0]  ;;  %v301_v13 = vld [vmem:[%s433_s1 + $0x10] sm:$0xff] }
   0x5   :  { %v303_v9 = vld [vmem:[%s433_s1 + $0x20] sm:$0xff]  ;;  %v256_v14 = vor.u32 %v297_v11, %v253_v12  ;;  %v309_v15 = vld [vmem:[%s436_s2 + $0x8] sm:$0xff]  ;;  %v251_v20 = vld [vmem:[%s434_s0 + $0x10] sm:$0xf] }
   0x6   :  { %170 = vmatpush.bf16.msra.mxu1 %v305_v4  ;;  %312 = vmatpush.bf16.msra.mxu3 %v305_v4  ;;  %v300_v16 = vld [vmem:[%s433_s1 + $0x8] sm:$0xff]  ;;  %v299_v17 = vld [vmem:[%s433_s1] sm:$0xff]  ;;  %v298_v21 = vld [vmem:[%s434_s0 + $0x14] sm:$0xf0] }
   0x7   :  { %293 = vmatmul.msk.bf16.vlgmr.msra.gmra.mxu2 %vm65_vm0, %v248_v6  ;;  %239 = vmatmul.msk.bf16.vlgmr.msra.gmra.mxu0 %vm65_vm0, %v308_v7  ;;  %v243_v18 = vld [vmem:[%s434_s0] sm:$0xf]  ;;  %v296_v19 = vld [vmem:[%s434_s0 + $0x4] sm:$0xf0]  ;;  %v252_v23 = vor.u32 %v298_v21, %v251_v20 }
   0x8   :  { %v244_v22 = vor.u32 %v296_v19, %v243_v18  ;;  %v319_v30 = vld [vmem:[%s437_s4] ss:$0 sm:$0xff] }
   0xa   :  { %171 = vmatpush.bf16.msra.mxu1 %v304_v8  ;;  %313 = vmatpush.bf16.msra.mxu3 %v304_v8 }
   0xe   :  { %172 = vmatpush.bf16.msra.mxu1 %v303_v9  ;;  %314 = vmatpush.bf16.msra.mxu3 %v303_v9 }
  0x12   :  { %173 = vmatpush.bf16.msra.mxu1 %v302_v10  ;;  %315 = vmatpush.bf16.msra.mxu3 %v302_v10 }
  0x16   :  { %174 = vmatpush.bf16.msra.mxu1 %v301_v13  ;;  %316 = vmatpush.bf16.msra.mxu3 %v301_v13 }
  0x17   :  { %294 = vmatmul.msk.bf16.gmra.mxu2 %vm65_vm0, %v256_v14  ;;  %240 = vmatmul.msk.bf16.gmra.mxu0 %vm65_vm0, %v309_v15 }
  0x1a   :  { %175 = vmatpush.bf16.msra.mxu1 %v300_v16  ;;  %317 = vmatpush.bf16.msra.mxu3 %v300_v16 }
  0x1e   :  { %176 = vmatpush.bf16.msra.mxu1 %v299_v17  ;;  %318 = vmatpush.bf16.msra.mxu3 %v299_v17 }
  0x21   :  { %177 = vmatmul.bf16.vlgmr.msra.gmra.mxu1 %v244_v22  ;;  %182 = vmatmul.bf16.vlgmr.msra.gmra.mxu3 %v252_v23 }
  0x84   :  { %v81_v24 = vpop.f32.mrf.mxu0 }
  0x8a   :  { %v197_v25 = vpop.f32.mrf.mxu2 }
  0x8c   :  { %v83_v26 = vpop.f32.mrf.mxu0 }
  0x92   :  { %v199_v27 = vpop.f32.mrf.mxu2 }
  0x94   :  { %v86_v32 = vpop.f32.mrf.mxu0 }
  0x9a   :  { %v202_v34 = vpop.f32.mrf.mxu2 }
  0x9c   :  { %v88_v45 = vpop.f32.mrf.mxu0 }
  0x9e   :  { %v178_v28 = vpop.f32.mrf.mxu1 }
  0x9f   :  { %v179_v29 = vadd.f32 %v178_v28, %v81_v24 }
  0xa1   :  { %v198_v31 = vadd.f32 %v197_v25, %v179_v29 }
  0xa2   :  { %v204_v49 = vpop.f32.mrf.mxu2 }
  0xa3   :  { %v211_v33 = vadd.f32 %v319_v30, %v198_v31 }
  0xa4   :  { %v183_v35 = vpop.f32.mrf.mxu3 }
  0xa5   :  { %v215_v36 = vmax.f32 %v211_v33, 0.0  ;;  %v184_v37 = vadd.f32 %v183_v35, %v86_v32 }
  0xa6   :  { %v180_v38 = vpop.f32.mrf.mxu1 }
  0xa7   :  { %219 = vst.msk [vmem:[%s438_s5] sm:$0xff] %vm65_vm0, %v215_v36  ;;  %v203_v39 = vadd.f32 %v202_v34, %v184_v37  ;;  %v181_v40 = vadd.f32 %v180_v38, %v83_v26 }
  0xa9   :  { %v213_v41 = vadd.f32 %v319_v30, %v203_v39  ;;  %v200_v42 = vadd.f32 %v199_v27, %v181_v40 }
  0xab   :  { %v217_v43 = vmax.f32 %v213_v41, 0.0  ;;  %v212_v44 = vadd.f32 %v319_v30, %v200_v42 }
  0xac   :  { %v185_v46 = vpop.f32.mrf.mxu3 }
  0xad   :  { %221 = vst.msk [vmem:[%s438_s5 + $0x10] sm:$0xff] %vm65_vm0, %v217_v43  ;;  %v216_v47 = vmax.f32 %v212_v44, 0.0  ;;  %v186_v48 = vadd.f32 %v185_v46, %v88_v45 }
  0xaf   :  { %220 = vst.msk [vmem:[%s438_s5 + $0x8] sm:$0xff] %vm65_vm0, %v216_v47  ;;  %v205_v50 = vadd.f32 %v204_v49, %v186_v48 }
  0xb1   :  { %v214_v51 = vadd.f32 %v319_v30, %v205_v50 }
  0xb3   :  { %v218_v52 = vmax.f32 %v214_v51, 0.0 }
  0xb5   :  { %222 = vst.msk [vmem:[%s438_s5 + $0x18] sm:$0xff] %vm65_vm0, %v218_v52 }

// kernel: model_forward.28
= control target key start
LH: loop header
LB: loop body
LE: loop exit
PB: predicated region body
PF: predicated region fallthrough
CT: control target
= control target key end

     0   :  { %vm116_vm0 = vcmask 130048   ;;  %s366_s1 = inlined_call_operand.vmem [shape: bf16[144,16], index: 1, kind: input, shape index: {}]   ;;  %s367_s0 = inlined_call_operand.vmem [shape: bf16[32,144], index: 0, kind: input, shape index: {}]   ;;  %s368_s2 = inlined_call_operand.vmem [shape: f32[1,16], index: 2, kind: input, shape index: {}]   ;;  %s369_s3 = inlined_call_operand.vmem [shape: f32[32,16], index: 3, kind: input, shape index: {}]   ;;  %s370_s4 = inlined_call_operand.vmem [shape: f32[32,16], index: 4, kind: output, shape index: {}]  }
   0x1   :  { %v246_v0 = vld [vmem:[%s366_s1 + $0x38] sm:$0xff]  ;;  %v247_v1 = vld [vmem:[%s366_s1 + $0x40] sm:$0xff]  ;;  %v245_v3 = vld [vmem:[%s366_s1 + $0x30] sm:$0xff] }
   0x2   :  { %v235_v2 = vld [vmem:[%s367_s0 + $0x4] sm:$0xf]  ;;  %123 = vmatpush.bf16.msra.mxu0 %v246_v0  ;;  %248 = vmatpush.bf16.msra.mxu2 %v246_v0  ;;  %v185_v4 = vld [vmem:[%s367_s0 + $0x8] sm:$0xf0]  ;;  %v242_v8 = vld [vmem:[%s366_s1 + $0x18] sm:$0xff] }
   0x3   :  { %149 = vmatpush.bf16.msra.mxu1 %v247_v1  ;;  %v188_v5 = vor.u32 %v235_v2, %v185_v4  ;;  %v244_v6 = vld [vmem:[%s366_s1 + $0x28] sm:$0xff]  ;;  %v243_v7 = vld [vmem:[%s366_s1 + $0x20] sm:$0xff]  ;;  %v237_v9 = vld [vmem:[%s367_s0 + $0x14] sm:$0xf] }
   0x4   :  { %v193_v10 = vld [vmem:[%s367_s0 + $0x18] sm:$0xf0]  ;;  %v241_v11 = vld [vmem:[%s366_s1 + $0x10] sm:$0xff]  ;;  %v240_v13 = vld [vmem:[%s366_s1 + $0x8] sm:$0xff] }
   0x5   :  { %v196_v12 = vor.u32 %v237_v9, %v193_v10  ;;  %v239_v14 = vld [vmem:[%s366_s1] sm:$0xff]  ;;  %v236_v16 = vld [vmem:[%s367_s0 + $0x4] sm:$0xf0]  ;;  %v191_v17 = vld [vmem:[%s367_s0 + $0x10] sm:$0xf] }
   0x6   :  { %124 = vmatpush.bf16.msra.mxu0 %v245_v3  ;;  %249 = vmatpush.bf16.msra.mxu2 %v245_v3  ;;  %v183_v15 = vld [vmem:[%s367_s0] sm:$0xf]  ;;  %v238_v18 = vld [vmem:[%s367_s0 + $0x14] sm:$0xf0]  ;;  %v163_v33 = vld [vmem:[%s369_s3 + $0x10] sm:$0xff] }
   0x7   :  { %233 = vmatmul.msk.bf16.vlgmr.msra.gmra.mxu1 %vm116_vm0, %v188_v5  ;;  %v184_v19 = vor.u32 %v236_v16, %v183_v15  ;;  %v192_v20 = vor.u32 %v238_v18, %v191_v17  ;;  %v256_v23 = vld [vmem:[%s368_s2] ss:$0 sm:$0xff]  ;;  %v162_v37 = vld [vmem:[%s369_s3 + $0x8] sm:$0xff]  ;;  %v164_v46 = vld [vmem:[%s369_s3 + $0x18] sm:$0xff] }
   0x8   :  { %v161_v26 = vld [vmem:[%s369_s3] sm:$0xff] }
   0xa   :  { %125 = vmatpush.bf16.msra.mxu0 %v244_v6  ;;  %250 = vmatpush.bf16.msra.mxu2 %v244_v6 }
   0xe   :  { %126 = vmatpush.bf16.msra.mxu0 %v243_v7  ;;  %251 = vmatpush.bf16.msra.mxu2 %v243_v7 }
  0x12   :  { %127 = vmatpush.bf16.msra.mxu0 %v242_v8  ;;  %252 = vmatpush.bf16.msra.mxu2 %v242_v8 }
  0x16   :  { %128 = vmatpush.bf16.msra.mxu0 %v241_v11  ;;  %253 = vmatpush.bf16.msra.mxu2 %v241_v11 }
  0x17   :  { %234 = vmatmul.msk.bf16.gmra.mxu1 %vm116_vm0, %v196_v12 }
  0x1a   :  { %129 = vmatpush.bf16.msra.mxu0 %v240_v13  ;;  %254 = vmatpush.bf16.msra.mxu2 %v240_v13 }
  0x1e   :  { %130 = vmatpush.bf16.msra.mxu0 %v239_v14  ;;  %255 = vmatpush.bf16.msra.mxu2 %v239_v14 }
  0x21   :  { %131 = vmatmul.bf16.vlgmr.msra.gmra.mxu0 %v184_v19  ;;  %136 = vmatmul.bf16.vlgmr.msra.gmra.mxu2 %v192_v20 }
  0x84   :  { %v151_v21 = vpop.f32.mrf.mxu1 }
  0x8c   :  { %v153_v22 = vpop.f32.mrf.mxu1 }
  0x94   :  { %v156_v29 = vpop.f32.mrf.mxu1 }
  0x9c   :  { %v158_v45 = vpop.f32.mrf.mxu1 }
  0x9e   :  { %v132_v24 = vpop.f32.mrf.mxu0 }
  0x9f   :  { %v133_v25 = vadd.f32 %v256_v23, %v132_v24 }
  0xa1   :  { %v152_v27 = vadd.f32 %v151_v21, %v133_v25 }
  0xa3   :  { %v165_v28 = vadd.f32 %v161_v26, %v152_v27 }
  0xa4   :  { %v137_v30 = vpop.f32.mrf.mxu2 }
  0xa5   :  { %v169_v31 = vmax.f32 %v165_v28, 0.0  ;;  %v138_v32 = vadd.f32 %v256_v23, %v137_v30 }
  0xa6   :  { %v134_v34 = vpop.f32.mrf.mxu0 }
  0xa7   :  { %173 = vst.msk [vmem:[%s370_s4] sm:$0xff] %vm116_vm0, %v169_v31  ;;  %v157_v35 = vadd.f32 %v156_v29, %v138_v32  ;;  %v135_v36 = vadd.f32 %v256_v23, %v134_v34 }
  0xa9   :  { %v167_v38 = vadd.f32 %v163_v33, %v157_v35  ;;  %v154_v39 = vadd.f32 %v153_v22, %v135_v36 }
  0xab   :  { %v171_v40 = vmax.f32 %v167_v38, 0.0  ;;  %v166_v41 = vadd.f32 %v162_v37, %v154_v39 }
  0xac   :  { %v139_v42 = vpop.f32.mrf.mxu2 }
  0xad   :  { %175 = vst.msk [vmem:[%s370_s4 + $0x10] sm:$0xff] %vm116_vm0, %v171_v40  ;;  %v170_v43 = vmax.f32 %v166_v41, 0.0  ;;  %v140_v44 = vadd.f32 %v256_v23, %v139_v42 }
  0xaf   :  { %174 = vst.msk [vmem:[%s370_s4 + $0x8] sm:$0xff] %vm116_vm0, %v170_v43  ;;  %v159_v47 = vadd.f32 %v158_v45, %v140_v44 }
  0xb1   :  { %v168_v48 = vadd.f32 %v164_v46, %v159_v47 }
  0xb3   :  { %v172_v49 = vmax.f32 %v168_v48, 0.0 }
  0xb5   :  { %176 = vst.msk [vmem:[%s370_s4 + $0x18] sm:$0xff] %vm116_vm0, %v172_v49 }

// kernel: model_forward.27
= control target key start
LH: loop header
LB: loop body
LE: loop exit
PB: predicated region body
PF: predicated region fallthrough
CT: control target
= control target key end

     0   :  { %vm113_vm0 = vcmask 130048   ;;  %s338_s1 = inlined_call_operand.vmem [shape: bf16[144,16], index: 1, kind: input, shape index: {}]   ;;  %s339_s0 = inlined_call_operand.vmem [shape: bf16[32,144], index: 0, kind: input, shape index: {}]   ;;  %s340_s2 = inlined_call_operand.vmem [shape: f32[1,16], index: 2, kind: input, shape index: {}]   ;;  %s341_s3 = inlined_call_operand.vmem [shape: f32[32,16], index: 3, kind: output, shape index: {}]  }
   0x1   :  { %v235_v0 = vld [vmem:[%s338_s1 + $0x38] sm:$0xff]  ;;  %v236_v1 = vld [vmem:[%s338_s1 + $0x40] sm:$0xff]  ;;  %v234_v3 = vld [vmem:[%s338_s1 + $0x30] sm:$0xff] }
   0x2   :  { %v224_v2 = vld [vmem:[%s339_s0 + $0x4] sm:$0xf]  ;;  %120 = vmatpush.bf16.msra.mxu0 %v235_v0  ;;  %237 = vmatpush.bf16.msra.mxu2 %v235_v0  ;;  %v174_v4 = vld [vmem:[%s339_s0 + $0x8] sm:$0xf0]  ;;  %v231_v8 = vld [vmem:[%s338_s1 + $0x18] sm:$0xff] }
   0x3   :  { %146 = vmatpush.bf16.msra.mxu1 %v236_v1  ;;  %v177_v5 = vor.u32 %v224_v2, %v174_v4  ;;  %v233_v6 = vld [vmem:[%s338_s1 + $0x28] sm:$0xff]  ;;  %v232_v7 = vld [vmem:[%s338_s1 + $0x20] sm:$0xff]  ;;  %v226_v9 = vld [vmem:[%s339_s0 + $0x14] sm:$0xf] }
   0x4   :  { %v182_v10 = vld [vmem:[%s339_s0 + $0x18] sm:$0xf0]  ;;  %v230_v11 = vld [vmem:[%s338_s1 + $0x10] sm:$0xff]  ;;  %v229_v13 = vld [vmem:[%s338_s1 + $0x8] sm:$0xff] }
   0x5   :  { %v185_v12 = vor.u32 %v226_v9, %v182_v10  ;;  %v228_v14 = vld [vmem:[%s338_s1] sm:$0xff]  ;;  %v225_v16 = vld [vmem:[%s339_s0 + $0x4] sm:$0xf0]  ;;  %v180_v17 = vld [vmem:[%s339_s0 + $0x10] sm:$0xf] }
   0x6   :  { %121 = vmatpush.bf16.msra.mxu0 %v234_v3  ;;  %238 = vmatpush.bf16.msra.mxu2 %v234_v3  ;;  %v172_v15 = vld [vmem:[%s339_s0] sm:$0xf]  ;;  %v227_v18 = vld [vmem:[%s339_s0 + $0x14] sm:$0xf0] }
   0x7   :  { %222 = vmatmul.msk.bf16.vlgmr.msra.gmra.mxu1 %vm113_vm0, %v177_v5  ;;  %v173_v19 = vor.u32 %v225_v16, %v172_v15  ;;  %v181_v20 = vor.u32 %v227_v18, %v180_v17  ;;  %v245_v23 = vld [vmem:[%s340_s2] ss:$0 sm:$0xff] }
   0xa   :  { %122 = vmatpush.bf16.msra.mxu0 %v233_v6  ;;  %239 = vmatpush.bf16.msra.mxu2 %v233_v6 }
   0xe   :  { %123 = vmatpush.bf16.msra.mxu0 %v232_v7  ;;  %240 = vmatpush.bf16.msra.mxu2 %v232_v7 }
  0x12   :  { %124 = vmatpush.bf16.msra.mxu0 %v231_v8  ;;  %241 = vmatpush.bf16.msra.mxu2 %v231_v8 }
  0x16   :  { %125 = vmatpush.bf16.msra.mxu0 %v230_v11  ;;  %242 = vmatpush.bf16.msra.mxu2 %v230_v11 }
  0x17   :  { %223 = vmatmul.msk.bf16.gmra.mxu1 %vm113_vm0, %v185_v12 }
  0x1a   :  { %126 = vmatpush.bf16.msra.mxu0 %v229_v13  ;;  %243 = vmatpush.bf16.msra.mxu2 %v229_v13 }
  0x1e   :  { %127 = vmatpush.bf16.msra.mxu0 %v228_v14  ;;  %244 = vmatpush.bf16.msra.mxu2 %v228_v14 }
  0x21   :  { %128 = vmatmul.bf16.vlgmr.msra.gmra.mxu0 %v173_v19  ;;  %133 = vmatmul.bf16.vlgmr.msra.gmra.mxu2 %v181_v20 }
  0x84   :  { %v148_v21 = vpop.f32.mrf.mxu1 }
  0x8c   :  { %v150_v22 = vpop.f32.mrf.mxu1 }
  0x94   :  { %v153_v28 = vpop.f32.mrf.mxu1 }
  0x9c   :  { %v155_v39 = vpop.f32.mrf.mxu1 }
  0x9e   :  { %v129_v24 = vpop.f32.mrf.mxu0 }
  0x9f   :  { %v130_v25 = vadd.f32 %v245_v23, %v129_v24 }
  0xa1   :  { %v149_v26 = vadd.f32 %v148_v21, %v130_v25 }
  0xa3   :  { %v158_v27 = vmax.f32 %v149_v26, 0.0 }
  0xa4   :  { %v134_v29 = vpop.f32.mrf.mxu2 }
  0xa5   :  { %162 = vst.msk [vmem:[%s341_s3] sm:$0xff] %vm113_vm0, %v158_v27  ;;  %v135_v30 = vadd.f32 %v245_v23, %v134_v29 }
  0xa6   :  { %v131_v31 = vpop.f32.mrf.mxu0 }
  0xa7   :  { %v154_v32 = vadd.f32 %v153_v28, %v135_v30  ;;  %v132_v33 = vadd.f32 %v245_v23, %v131_v31 }
  0xa9   :  { %v160_v34 = vmax.f32 %v154_v32, 0.0  ;;  %v151_v35 = vadd.f32 %v150_v22, %v132_v33 }
  0xab   :  { %164 = vst.msk [vmem:[%s341_s3 + $0x10] sm:$0xff] %vm113_vm0, %v160_v34  ;;  %v159_v36 = vmax.f32 %v151_v35, 0.0 }
  0xac   :  { %v136_v37 = vpop.f32.mrf.mxu2 }
  0xad   :  { %163 = vst.msk [vmem:[%s341_s3 + $0x8] sm:$0xff] %vm113_vm0, %v159_v36  ;;  %v137_v38 = vadd.f32 %v245_v23, %v136_v37 }
  0xaf   :  { %v156_v40 = vadd.f32 %v155_v39, %v137_v38 }
  0xb1   :  { %v161_v41 = vmax.f32 %v156_v40, 0.0 }
  0xb3   :  { %165 = vst.msk [vmem:[%s341_s3 + $0x18] sm:$0xff] %vm113_vm0, %v161_v41 }

// kernel: model_forward.29
= control target key start
LH: loop header
LB: loop body
LE: loop exit
PB: predicated region body
PF: predicated region fallthrough
CT: control target
= control target key end

     0   :  { %vm98_vm0 = vcmask 130048   ;;  %vm129_vm1 = vcmask 261120   ;;  %s238_s1 = inlined_call_operand.vmem [shape: bf16[144,32], index: 1, kind: input, shape index: {}]   ;;  %s239_s0 = inlined_call_operand.vmem [shape: bf16[8,144], index: 0, kind: input, shape index: {}]   ;;  %s240_s2 = inlined_call_operand.vmem [shape: f32[1,32], index: 2, kind: input, shape index: {}]   ;;  %s241_s3 = inlined_call_operand.vmem [shape: f32[8,32], index: 3, kind: output, shape index: {}]  }
   0x1   :  { %v179_v0 = vld [vmem:[%s238_s1 + $0x38] sm:$0xff]  ;;  %v178_v1 = vld [vmem:[%s238_s1 + $0x30] sm:$0xff]  ;;  %v180_v2 = vld [vmem:[%s238_s1 + $0x40] sm:$0xff] }
   0x2   :  { %102 = vmatpush.bf16.msra.mxu0 %v179_v0  ;;  %v15_v3 = vld [vmem:[%s239_s0] sm:$0xff]  ;;  %122 = vmatpush.bf16.msra.mxu1 %v180_v2  ;;  %v177_v6 = vld [vmem:[%s238_s1 + $0x28] sm:$0xff]  ;;  %v175_v8 = vld [vmem:[%s238_s1 + $0x18] sm:$0xff] }
   0x3   :  { %v40_v4 = vunpack.c.h.b16 %v15_v3  ;;  %v176_v7 = vld [vmem:[%s238_s1 + $0x20] sm:$0xff]  ;;  %v174_v9 = vld [vmem:[%s238_s1 + $0x10] sm:$0xff]  ;;  %v173_v10 = vld [vmem:[%s238_s1 + $0x8] sm:$0xff]  ;;  %v39_v11 = vunpack.c.l.b16 %v15_v3 }
   0x4   :  { %v172_v12 = vld [vmem:[%s238_s1] sm:$0xff] }
   0x5   :  { %v42_v5 = vpack.c.b16 %v40_v4, %v40_v4  ;;  %v41_v13 = vpack.c.b16 %v39_v11, %v39_v11  ;;  %v181_v16 = vld [vmem:[%s240_s2] ss:$0 sm:$0xff] }
   0x6   :  { %103 = vmatpush.bf16.msra.mxu0 %v178_v1 }
   0x7   :  { %171 = vmatmul.msk.bf16.vlgmr.msra.gmra.mxu1 %vm98_vm0, %v42_v5 }
   0xa   :  { %104 = vmatpush.bf16.msra.mxu0 %v177_v6 }
   0xe   :  { %105 = vmatpush.bf16.msra.mxu0 %v176_v7 }
  0x12   :  { %106 = vmatpush.bf16.msra.mxu0 %v175_v8 }
  0x16   :  { %107 = vmatpush.bf16.msra.mxu0 %v174_v9 }
  0x1a   :  { %108 = vmatpush.bf16.msra.mxu0 %v173_v10 }
  0x1e   :  { %109 = vmatpush.bf16.msra.mxu0 %v172_v12 }
  0x21   :  { %110 = vmatmul.bf16.vlgmr.msra.gmra.mxu0 %v41_v13 }
  0x84   :  { %v124_v14 = vpop.f32.mrf.mxu1 }
  0x8c   :  { %v126_v15 = vpop.f32.mrf.mxu1 }
  0x9e   :  { %v111_v17 = vpop.f32.mrf.mxu0 }
  0x9f   :  { %v112_v18 = vadd.f32 %v181_v16, %v111_v17 }
  0xa1   :  { %v125_v19 = vadd.f32 %v124_v14, %v112_v18 }
  0xa3   :  { %v128_v20 = vmax.f32 %v125_v19, 0.0 }
  0xa5   :  { %130 = vst.msk [vmem:[%s241_s3] sm:$0xff] %vm129_vm1, %v128_v20 }
  0xa6   :  { %v113_v21 = vpop.f32.mrf.mxu0 }

// kernel: model_forward.31
= control target key start
LH: loop header
LB: loop body
LE: loop exit
PB: predicated region body
PF: predicated region fallthrough
CT: control target
= control target key end

     0   :  { %vm175_vm0 = vcmask 261120   ;;  %s404_s1 = inlined_call_operand.vmem [shape: bf16[288,32], index: 1, kind: input, shape index: {}]   ;;  %s405_s0 = inlined_call_operand.vmem [shape: bf16[8,288], index: 0, kind: input, shape index: {}]   ;;  %s406_s2 = inlined_call_operand.vmem [shape: f32[1,32], index: 2, kind: input, shape index: {}]   ;;  %s407_s3 = inlined_call_operand.vmem [shape: f32[8,32], index: 3, kind: output, shape index: {}]  }
   0x1   :  { %v304_v0 = vld [vmem:[%s404_s1 + $0x38] sm:$0xff]  ;;  %v303_v2 = vld [vmem:[%s404_s1 + $0x30] sm:$0xff]  ;;  %v314_v4 = vld [vmem:[%s404_s1 + $0x88] sm:$0xff] }
   0x2   :  { %v312_v1 = vld [vmem:[%s404_s1 + $0x78] sm:$0xff]  ;;  %179 = vmatpush.bf16.msra.mxu0 %v304_v0  ;;  %v311_v3 = vld [vmem:[%s404_s1 + $0x70] sm:$0xff]  ;;  %211 = vmatpush.bf16.msra.mxu2 %v314_v4  ;;  %v313_v5 = vld [vmem:[%s404_s1 + $0x80] sm:$0xff] }
   0x3   :  { %192 = vmatpush.bf16.msra.mxu1 %v312_v1  ;;  %v16_v6 = vld [vmem:[%s405_s0 + $0x8] sm:$0xf]  ;;  %v301_v11 = vld [vmem:[%s404_s1 + $0x20] sm:$0xff]  ;;  %v300_v13 = vld [vmem:[%s404_s1 + $0x18] sm:$0xff] }
   0x4   :  { %v61_v7 = vunpack.c.l.b16 %v16_v6  ;;  %v302_v8 = vld [vmem:[%s404_s1 + $0x28] sm:$0xff]  ;;  %v309_v12 = vld [vmem:[%s404_s1 + $0x60] sm:$0xff]  ;;  %v308_v14 = vld [vmem:[%s404_s1 + $0x58] sm:$0xff] }
   0x5   :  { %v310_v9 = vld [vmem:[%s404_s1 + $0x68] sm:$0xff]  ;;  %v299_v15 = vld [vmem:[%s404_s1 + $0x10] sm:$0xff]  ;;  %v15_v19 = vld [vmem:[%s405_s0] sm:$0xff] }
   0x6   :  { %180 = vmatpush.bf16.msra.mxu0 %v303_v2  ;;  %v64_v10 = vpack.c.b16 %v61_v7, %v61_v7  ;;  %212 = vmatpush.bf16.msra.mxu2 %v313_v5  ;;  %v307_v16 = vld [vmem:[%s404_s1 + $0x50] sm:$0xff]  ;;  %v298_v17 = vld [vmem:[%s404_s1 + $0x8] sm:$0xff]  ;;  %v59_v20 = vunpack.c.l.b16 %v15_v19  ;;  %v60_v21 = vunpack.c.h.b16 %v15_v19  ;;  %v297_v22 = vld [vmem:[%s404_s1] sm:$0xff] }
   0x7   :  { %193 = vmatpush.bf16.msra.mxu1 %v311_v3  ;;  %v306_v18 = vld [vmem:[%s404_s1 + $0x48] sm:$0xff]  ;;  %v305_v23 = vld [vmem:[%s404_s1 + $0x40] sm:$0xff] }
   0x8   :  { %v62_v24 = vpack.c.b16 %v59_v20, %v59_v20  ;;  %v63_v25 = vpack.c.b16 %v60_v21, %v60_v21  ;;  %v315_v28 = vld [vmem:[%s406_s2] ss:$0 sm:$0xff] }
   0x9   :  { %296 = vmatmul.msk.bf16.vlgmr.msra.gmra.mxu2 %vm175_vm0, %v64_v10 }
   0xa   :  { %181 = vmatpush.bf16.msra.mxu0 %v302_v8 }
   0xb   :  { %194 = vmatpush.bf16.msra.mxu1 %v310_v9 }
   0xe   :  { %182 = vmatpush.bf16.msra.mxu0 %v301_v11 }
   0xf   :  { %195 = vmatpush.bf16.msra.mxu1 %v309_v12 }
  0x12   :  { %183 = vmatpush.bf16.msra.mxu0 %v300_v13 }
  0x13   :  { %196 = vmatpush.bf16.msra.mxu1 %v308_v14 }
  0x16   :  { %184 = vmatpush.bf16.msra.mxu0 %v299_v15 }
  0x17   :  { %197 = vmatpush.bf16.msra.mxu1 %v307_v16 }
  0x1a   :  { %185 = vmatpush.bf16.msra.mxu0 %v298_v17 }
  0x1b   :  { %198 = vmatpush.bf16.msra.mxu1 %v306_v18 }
  0x1e   :  { %186 = vmatpush.bf16.msra.mxu0 %v297_v22 }
  0x1f   :  { %199 = vmatpush.bf16.msra.mxu1 %v305_v23 }
  0x21   :  { %187 = vmatmul.bf16.vlgmr.msra.gmra.mxu0 %v62_v24 }
  0x22   :  { %200 = vmatmul.bf16.vlgmr.msra.gmra.mxu1 %v63_v25 }
  0x8c   :  { %v214_v26 = vpop.f32.mrf.mxu2 }
  0x94   :  { %v216_v27 = vpop.f32.mrf.mxu2 }
  0x9e   :  { %v188_v29 = vpop.f32.mrf.mxu0 }
  0x9f   :  { %v201_v30 = vpop.f32.mrf.mxu1  ;;  %v189_v31 = vadd.f32 %v315_v28, %v188_v29 }
  0xa1   :  { %v202_v32 = vadd.f32 %v201_v30, %v189_v31 }
  0xa3   :  { %v215_v33 = vadd.f32 %v214_v26, %v202_v32 }
  0xa5   :  { %v218_v34 = vmax.f32 %v215_v33, 0.0 }
  0xa6   :  { %v190_v35 = vpop.f32.mrf.mxu0 }
  0xa7   :  { %v203_v36 = vpop.f32.mrf.mxu1  ;;  %219 = vst.msk [vmem:[%s407_s3] sm:$0xff] %vm175_vm0, %v218_v34 }

// kernel: model_forward.30
= control target key start
LH: loop header
LB: loop body
LE: loop exit
PB: predicated region body
PF: predicated region fallthrough
CT: control target
= control target key end

     0   :  { %vm68_vm0 = vcmask 130048   ;;  %vm203_vm1 = vcmask 261120   ;;  %s459_s1 = inlined_call_operand.vmem [shape: bf16[288,32], index: 1, kind: input, shape index: {}]   ;;  %s460_s3 = inlined_call_operand.vmem [shape: bf16[16,32], index: 3, kind: input, shape index: {}]   ;;  %s461_s0 = inlined_call_operand.vmem [shape: bf16[8,288], index: 0, kind: input, shape index: {}]   ;;  %s462_s2 = inlined_call_operand.vmem [shape: bf16[8,16], index: 2, kind: input, shape index: {}]   ;;  %s463_s4 = inlined_call_operand.vmem [shape: f32[1,32], index: 4, kind: input, shape index: {}]   ;;  %s464_s5 = inlined_call_operand.vmem [shape: f32[8,32], index: 5, kind: output, shape index: {}]  }
   0x1   :  { %v342_v0 = vld [vmem:[%s459_s1 + $0x38] sm:$0xff]  ;;  %v341_v2 = vld [vmem:[%s459_s1 + $0x30] sm:$0xff]  ;;  %v352_v4 = vld [vmem:[%s459_s1 + $0x88] sm:$0xff] }
   0x2   :  { %v350_v1 = vld [vmem:[%s459_s1 + $0x78] sm:$0xff]  ;;  %207 = vmatpush.bf16.msra.mxu1 %v342_v0  ;;  %v349_v3 = vld [vmem:[%s459_s1 + $0x70] sm:$0xff]  ;;  %v353_v5 = vld [vmem:[%s460_s3] sm:$0xff]  ;;  %239 = vmatpush.bf16.msra.mxu3 %v352_v4 }
   0x3   :  { %220 = vmatpush.bf16.msra.mxu2 %v350_v1  ;;  %v351_v6 = vld [vmem:[%s459_s1 + $0x80] sm:$0xff]  ;;  %v22_v7 = vld [vmem:[%s461_s0 + $0x8] sm:$0xf]  ;;  %79 = vmatpush.bf16.msra.mxu0 %v353_v5  ;;  %v338_v15 = vld [vmem:[%s459_s1 + $0x18] sm:$0xff] }
   0x4   :  { %v340_v8 = vld [vmem:[%s459_s1 + $0x28] sm:$0xff]  ;;  %v89_v10 = vunpack.c.l.b16 %v22_v7  ;;  %v59_v12 = vld [vmem:[%s462_s2] sm:$0xf]  ;;  %v346_v16 = vld [vmem:[%s459_s1 + $0x58] sm:$0xff] }
   0x5   :  { %v348_v9 = vld [vmem:[%s459_s1 + $0x68] sm:$0xff]  ;;  %v339_v13 = vld [vmem:[%s459_s1 + $0x20] sm:$0xff]  ;;  %v337_v17 = vld [vmem:[%s459_s1 + $0x10] sm:$0xff] }
   0x6   :  { %208 = vmatpush.bf16.msra.mxu1 %v341_v2  ;;  %v92_v11 = vpack.c.b16 %v89_v10, %v89_v10  ;;  %240 = vmatpush.bf16.msra.mxu3 %v351_v6  ;;  %v347_v14 = vld [vmem:[%s459_s1 + $0x60] sm:$0xff]  ;;  %v345_v18 = vld [vmem:[%s459_s1 + $0x50] sm:$0xff]  ;;  %v336_v19 = vld [vmem:[%s459_s1 + $0x8] sm:$0xff] }
   0x7   :  { %221 = vmatpush.bf16.msra.mxu2 %v349_v3  ;;  %261 = vmatmul.msk.bf16.vlgmr.msra.gmra.mxu0 %vm68_vm0, %v59_v12  ;;  %v344_v20 = vld [vmem:[%s459_s1 + $0x48] sm:$0xff]  ;;  %v21_v21 = vld [vmem:[%s461_s0] sm:$0xff] }
   0x8   :  { %v87_v22 = vunpack.c.l.b16 %v21_v21  ;;  %v88_v23 = vunpack.c.h.b16 %v21_v21  ;;  %v335_v24 = vld [vmem:[%s459_s1] sm:$0xff] }
   0x9   :  { %334 = vmatmul.msk.bf16.vlgmr.msra.gmra.mxu3 %vm203_vm1, %v92_v11  ;;  %v343_v25 = vld [vmem:[%s459_s1 + $0x40] sm:$0xff] }
   0xa   :  { %209 = vmatpush.bf16.msra.mxu1 %v340_v8  ;;  %v90_v26 = vpack.c.b16 %v87_v22, %v87_v22  ;;  %v91_v27 = vpack.c.b16 %v88_v23, %v88_v23  ;;  %v354_v36 = vld [vmem:[%s463_s4] ss:$0 sm:$0xff] }
   0xb   :  { %222 = vmatpush.bf16.msra.mxu2 %v348_v9 }
   0xe   :  { %210 = vmatpush.bf16.msra.mxu1 %v339_v13 }
   0xf   :  { %223 = vmatpush.bf16.msra.mxu2 %v347_v14 }
  0x12   :  { %211 = vmatpush.bf16.msra.mxu1 %v338_v15 }
  0x13   :  { %224 = vmatpush.bf16.msra.mxu2 %v346_v16 }
  0x16   :  { %212 = vmatpush.bf16.msra.mxu1 %v337_v17 }
  0x17   :  { %225 = vmatpush.bf16.msra.mxu2 %v345_v18 }
  0x1a   :  { %213 = vmatpush.bf16.msra.mxu1 %v336_v19 }
  0x1b   :  { %226 = vmatpush.bf16.msra.mxu2 %v344_v20 }
  0x1e   :  { %214 = vmatpush.bf16.msra.mxu1 %v335_v24 }
  0x1f   :  { %227 = vmatpush.bf16.msra.mxu2 %v343_v25 }
  0x21   :  { %215 = vmatmul.bf16.vlgmr.msra.gmra.mxu1 %v90_v26 }
  0x22   :  { %228 = vmatmul.bf16.vlgmr.msra.gmra.mxu2 %v91_v27 }
  0x84   :  { %v81_v28 = vpop.f32.mrf.mxu0 }
  0x8c   :  { %v242_v29 = vpop.f32.mrf.mxu3  ;;  %v83_v30 = vpop.f32.mrf.mxu0 }
  0x94   :  { %v244_v31 = vpop.f32.mrf.mxu3 }
  0x9e   :  { %v216_v32 = vpop.f32.mrf.mxu1 }
  0x9f   :  { %v217_v33 = vadd.f32 %v216_v32, %v81_v28 }
  0xa5   :  { %v229_v34 = vpop.f32.mrf.mxu2 }
  0xa6   :  { %v230_v35 = vadd.f32 %v229_v34, %v217_v33  ;;  %v218_v37 = vpop.f32.mrf.mxu1 }
  0xa8   :  { %v243_v38 = vadd.f32 %v242_v29, %v230_v35 }
  0xaa   :  { %v250_v39 = vadd.f32 %v354_v36, %v243_v38 }
  0xac   :  { %v251_v40 = vmax.f32 %v250_v39, 0.0 }
  0xad   :  { %v231_v41 = vpop.f32.mrf.mxu2 }
  0xae   :  { %252 = vst.msk [vmem:[%s464_s5] sm:$0xff] %vm203_vm1, %v251_v40 }

// kernel: model_forward.32
= control target key start
LH: loop header
LB: loop body
LE: loop exit
PB: predicated region body
PF: predicated region fallthrough
CT: control target
= control target key end

     0   :  { %vm178_vm0 = vcmask 261120   ;;  %s417_s1 = inlined_call_operand.vmem [shape: bf16[288,32], index: 1, kind: input, shape index: {}]   ;;  %s418_s0 = inlined_call_operand.vmem [shape: bf16[8,288], index: 0, kind: input, shape index: {}]   ;;  %s419_s2 = inlined_call_operand.vmem [shape: f32[1,32], index: 2, kind: input, shape index: {}]   ;;  %s420_s3 = inlined_call_operand.vmem [shape: f32[8,32], index: 3, kind: input, shape index: {}]   ;;  %s421_s4 = inlined_call_operand.vmem [shape: f32[8,32], index: 4, kind: output, shape index: {}]  }
   0x1   :  { %v309_v0 = vld [vmem:[%s417_s1 + $0x38] sm:$0xff]  ;;  %v308_v2 = vld [vmem:[%s417_s1 + $0x30] sm:$0xff]  ;;  %v319_v4 = vld [vmem:[%s417_s1 + $0x88] sm:$0xff] }
   0x2   :  { %v317_v1 = vld [vmem:[%s417_s1 + $0x78] sm:$0xff]  ;;  %182 = vmatpush.bf16.msra.mxu0 %v309_v0  ;;  %v316_v3 = vld [vmem:[%s417_s1 + $0x70] sm:$0xff]  ;;  %214 = vmatpush.bf16.msra.mxu2 %v319_v4  ;;  %v318_v5 = vld [vmem:[%s417_s1 + $0x80] sm:$0xff] }
   0x3   :  { %195 = vmatpush.bf16.msra.mxu1 %v317_v1  ;;  %v19_v6 = vld [vmem:[%s418_s0 + $0x8] sm:$0xf]  ;;  %v306_v11 = vld [vmem:[%s417_s1 + $0x20] sm:$0xff]  ;;  %v305_v13 = vld [vmem:[%s417_s1 + $0x18] sm:$0xff] }
   0x4   :  { %v64_v7 = vunpack.c.l.b16 %v19_v6  ;;  %v307_v8 = vld [vmem:[%s417_s1 + $0x28] sm:$0xff]  ;;  %v314_v12 = vld [vmem:[%s417_s1 + $0x60] sm:$0xff]  ;;  %v313_v14 = vld [vmem:[%s417_s1 + $0x58] sm:$0xff] }
   0x5   :  { %v315_v9 = vld [vmem:[%s417_s1 + $0x68] sm:$0xff]  ;;  %v304_v15 = vld [vmem:[%s417_s1 + $0x10] sm:$0xff]  ;;  %v18_v19 = vld [vmem:[%s418_s0] sm:$0xff] }
   0x6   :  { %183 = vmatpush.bf16.msra.mxu0 %v308_v2  ;;  %v67_v10 = vpack.c.b16 %v64_v7, %v64_v7  ;;  %215 = vmatpush.bf16.msra.mxu2 %v318_v5  ;;  %v312_v16 = vld [vmem:[%s417_s1 + $0x50] sm:$0xff]  ;;  %v303_v17 = vld [vmem:[%s417_s1 + $0x8] sm:$0xff]  ;;  %v62_v20 = vunpack.c.l.b16 %v18_v19  ;;  %v63_v21 = vunpack.c.h.b16 %v18_v19  ;;  %v302_v22 = vld [vmem:[%s417_s1] sm:$0xff] }
   0x7   :  { %196 = vmatpush.bf16.msra.mxu1 %v316_v3  ;;  %v311_v18 = vld [vmem:[%s417_s1 + $0x48] sm:$0xff]  ;;  %v310_v23 = vld [vmem:[%s417_s1 + $0x40] sm:$0xff] }
   0x8   :  { %v65_v24 = vpack.c.b16 %v62_v20, %v62_v20  ;;  %v66_v25 = vpack.c.b16 %v63_v21, %v63_v21  ;;  %v320_v28 = vld [vmem:[%s419_s2] ss:$0 sm:$0xff] }
   0x9   :  { %301 = vmatmul.msk.bf16.vlgmr.msra.gmra.mxu2 %vm178_vm0, %v67_v10  ;;  %v221_v33 = vld [vmem:[%s420_s3] sm:$0xff] }
   0xa   :  { %184 = vmatpush.bf16.msra.mxu0 %v307_v8 }
   0xb   :  { %197 = vmatpush.bf16.msra.mxu1 %v315_v9 }
   0xe   :  { %185 = vmatpush.bf16.msra.mxu0 %v306_v11 }
   0xf   :  { %198 = vmatpush.bf16.msra.mxu1 %v314_v12 }
  0x12   :  { %186 = vmatpush.bf16.msra.mxu0 %v305_v13 }
  0x13   :  { %199 = vmatpush.bf16.msra.mxu1 %v313_v14 }
  0x16   :  { %187 = vmatpush.bf16.msra.mxu0 %v304_v15 }
  0x17   :  { %200 = vmatpush.bf16.msra.mxu1 %v312_v16 }
  0x1a   :  { %188 = vmatpush.bf16.msra.mxu0 %v303_v17 }
  0x1b   :  { %201 = vmatpush.bf16.msra.mxu1 %v311_v18 }
  0x1e   :  { %189 = vmatpush.bf16.msra.mxu0 %v302_v22 }
  0x1f   :  { %202 = vmatpush.bf16.msra.mxu1 %v310_v23 }
  0x21   :  { %190 = vmatmul.bf16.vlgmr.msra.gmra.mxu0 %v65_v24 }
  0x22   :  { %203 = vmatmul.bf16.vlgmr.msra.gmra.mxu1 %v66_v25 }
  0x8c   :  { %v217_v26 = vpop.f32.mrf.mxu2 }
  0x94   :  { %v219_v27 = vpop.f32.mrf.mxu2 }
  0x9e   :  { %v191_v29 = vpop.f32.mrf.mxu0 }
  0x9f   :  { %v204_v30 = vpop.f32.mrf.mxu1  ;;  %v192_v31 = vadd.f32 %v320_v28, %v191_v29 }
  0xa1   :  { %v205_v32 = vadd.f32 %v204_v30, %v192_v31 }
  0xa3   :  { %v218_v34 = vadd.f32 %v217_v26, %v205_v32 }
  0xa5   :  { %v222_v35 = vadd.f32 %v221_v33, %v218_v34 }
  0xa6   :  { %v193_v36 = vpop.f32.mrf.mxu0 }
  0xa7   :  { %v206_v37 = vpop.f32.mrf.mxu1  ;;  %v223_v38 = vmax.f32 %v222_v35, 0.0 }
  0xa9   :  { %224 = vst.msk [vmem:[%s421_s4] sm:$0xff] %vm178_vm0, %v223_v38 }

// kernel: model_forward.33
= control target key start
LH: loop header
LB: loop body
LE: loop exit
PB: predicated region body
PF: predicated region fallthrough
CT: control target
= control target key end

     0   :  { %vm175_vm0 = vcmask 261120   ;;  %vm219_vm1 = vcmask 523264   ;;  %s403_s1 = inlined_call_operand.vmem [shape: bf16[288,64], index: 1, kind: input, shape index: {}]   ;;  %s404_s0 = inlined_call_operand.vmem [shape: bf16[8,288], index: 0, kind: input, shape index: {}]   ;;  %s405_s2 = inlined_call_operand.vmem [shape: f32[1,64], index: 2, kind: input, shape index: {}]   ;;  %s406_s3 = inlined_call_operand.vmem [shape: f32[8,64], index: 3, kind: output, shape index: {}]  }
   0x1   :  { %v305_v0 = vld [vmem:[%s403_s1 + $0x38] sm:$0xff]  ;;  %v304_v2 = vld [vmem:[%s403_s1 + $0x30] sm:$0xff]  ;;  %v315_v4 = vld [vmem:[%s403_s1 + $0x88] sm:$0xff] }
   0x2   :  { %v313_v1 = vld [vmem:[%s403_s1 + $0x78] sm:$0xff]  ;;  %179 = vmatpush.bf16.msra.mxu0 %v305_v0  ;;  %v312_v3 = vld [vmem:[%s403_s1 + $0x70] sm:$0xff]  ;;  %211 = vmatpush.bf16.msra.mxu2 %v315_v4  ;;  %v314_v5 = vld [vmem:[%s403_s1 + $0x80] sm:$0xff] }
   0x3   :  { %192 = vmatpush.bf16.msra.mxu1 %v313_v1  ;;  %v16_v6 = vld [vmem:[%s404_s0 + $0x8] sm:$0xf]  ;;  %v302_v11 = vld [vmem:[%s403_s1 + $0x20] sm:$0xff]  ;;  %v301_v13 = vld [vmem:[%s403_s1 + $0x18] sm:$0xff] }
   0x4   :  { %v61_v7 = vunpack.c.l.b16 %v16_v6  ;;  %v303_v8 = vld [vmem:[%s403_s1 + $0x28] sm:$0xff]  ;;  %v310_v12 = vld [vmem:[%s403_s1 + $0x60] sm:$0xff]  ;;  %v309_v14 = vld [vmem:[%s403_s1 + $0x58] sm:$0xff] }
   0x5   :  { %v311_v9 = vld [vmem:[%s403_s1 + $0x68] sm:$0xff]  ;;  %v300_v15 = vld [vmem:[%s403_s1 + $0x10] sm:$0xff]  ;;  %v15_v19 = vld [vmem:[%s404_s0] sm:$0xff] }
   0x6   :  { %180 = vmatpush.bf16.msra.mxu0 %v304_v2  ;;  %v64_v10 = vpack.c.b16 %v61_v7, %v61_v7  ;;  %212 = vmatpush.bf16.msra.mxu2 %v314_v5  ;;  %v308_v16 = vld [vmem:[%s403_s1 + $0x50] sm:$0xff]  ;;  %v299_v17 = vld [vmem:[%s403_s1 + $0x8] sm:$0xff]  ;;  %v59_v20 = vunpack.c.l.b16 %v15_v19  ;;  %v60_v21 = vunpack.c.h.b16 %v15_v19  ;;  %v298_v22 = vld [vmem:[%s403_s1] sm:$0xff] }
   0x7   :  { %193 = vmatpush.bf16.msra.mxu1 %v312_v3  ;;  %v307_v18 = vld [vmem:[%s403_s1 + $0x48] sm:$0xff]  ;;  %v306_v23 = vld [vmem:[%s403_s1 + $0x40] sm:$0xff] }
   0x8   :  { %v62_v24 = vpack.c.b16 %v59_v20, %v59_v20  ;;  %v63_v25 = vpack.c.b16 %v60_v21, %v60_v21  ;;  %v316_v28 = vld [vmem:[%s405_s2] ss:$0 sm:$0xff] }
   0x9   :  { %297 = vmatmul.msk.bf16.vlgmr.msra.gmra.mxu2 %vm175_vm0, %v64_v10 }
   0xa   :  { %181 = vmatpush.bf16.msra.mxu0 %v303_v8 }
   0xb   :  { %194 = vmatpush.bf16.msra.mxu1 %v311_v9 }
   0xe   :  { %182 = vmatpush.bf16.msra.mxu0 %v302_v11 }
   0xf   :  { %195 = vmatpush.bf16.msra.mxu1 %v310_v12 }
  0x12   :  { %183 = vmatpush.bf16.msra.mxu0 %v301_v13 }
  0x13   :  { %196 = vmatpush.bf16.msra.mxu1 %v309_v14 }
  0x16   :  { %184 = vmatpush.bf16.msra.mxu0 %v300_v15 }
  0x17   :  { %197 = vmatpush.bf16.msra.mxu1 %v308_v16 }
  0x1a   :  { %185 = vmatpush.bf16.msra.mxu0 %v299_v17 }
  0x1b   :  { %198 = vmatpush.bf16.msra.mxu1 %v307_v18 }
  0x1e   :  { %186 = vmatpush.bf16.msra.mxu0 %v298_v22 }
  0x1f   :  { %199 = vmatpush.bf16.msra.mxu1 %v306_v23 }
  0x21   :  { %187 = vmatmul.bf16.vlgmr.msra.gmra.mxu0 %v62_v24 }
  0x22   :  { %200 = vmatmul.bf16.vlgmr.msra.gmra.mxu1 %v63_v25 }
  0x8c   :  { %v214_v26 = vpop.f32.mrf.mxu2 }
  0x94   :  { %v216_v27 = vpop.f32.mrf.mxu2 }
  0x9e   :  { %v188_v29 = vpop.f32.mrf.mxu0 }
  0x9f   :  { %v201_v30 = vpop.f32.mrf.mxu1  ;;  %v189_v31 = vadd.f32 %v316_v28, %v188_v29 }
  0xa1   :  { %v202_v32 = vadd.f32 %v201_v30, %v189_v31 }
  0xa3   :  { %v215_v33 = vadd.f32 %v214_v26, %v202_v32 }
  0xa5   :  { %v218_v34 = vmax.f32 %v215_v33, 0.0 }
  0xa6   :  { %v190_v35 = vpop.f32.mrf.mxu0 }
  0xa7   :  { %v203_v36 = vpop.f32.mrf.mxu1  ;;  %220 = vst.msk [vmem:[%s406_s3] sm:$0xff] %vm219_vm1, %v218_v34 }

// kernel: model_forward.35
= control target key start
LH: loop header
LB: loop body
LE: loop exit
PB: predicated region body
PF: predicated region fallthrough
CT: control target
= control target key end

     0   :  { %vm327_vm0 = vcmask 523264   ;;  %s729_s1 = inlined_call_operand.vmem [shape: bf16[576,64], index: 1, kind: input, shape index: {}]   ;;  %s730_s2 = inlined_call_operand.vmem [shape: f32[1,64], index: 2, kind: input, shape index: {}]   ;;  %s731_s0 = inlined_call_operand.vmem [shape: bf16[8,576], index: 0, kind: input, shape index: {}]   ;;  %s732_s3 = inlined_call_operand.vmem [shape: f32[8,64], index: 3, kind: output, shape index: {}]  }
   0x1   :  { %v554_v0 = vld [vmem:[%s729_s1 + $0x38] sm:$0xff]  ;;  %v553_v4 = vld [vmem:[%s729_s1 + $0x30] sm:$0xff]  ;;  %v552_v8 = vld [vmem:[%s729_s1 + $0x28] sm:$0xff] }
   0x2   :  { %v570_v1 = vld [vmem:[%s729_s1 + $0xb8] sm:$0xff]  ;;  %331 = vmatpush.bf16.msra.mxu0 %v554_v0  ;;  %v569_v5 = vld [vmem:[%s729_s1 + $0xb0] sm:$0xff]  ;;  %v568_v9 = vld [vmem:[%s729_s1 + $0xa8] sm:$0xff] }
   0x3   :  { %v562_v2 = vld [vmem:[%s729_s1 + $0x78] sm:$0xff]  ;;  %357 = vmatpush.bf16.msra.mxu2 %v570_v1  ;;  %v561_v6 = vld [vmem:[%s729_s1 + $0x70] sm:$0xff]  ;;  %v560_v10 = vld [vmem:[%s729_s1 + $0x68] sm:$0xff] }
   0x4   :  { %v578_v3 = vld [vmem:[%s729_s1 + $0xf8] sm:$0xff]  ;;  %344 = vmatpush.bf16.msra.mxu1 %v562_v2  ;;  %v577_v7 = vld [vmem:[%s729_s1 + $0xf0] sm:$0xff]  ;;  %v576_v11 = vld [vmem:[%s729_s1 + $0xe8] sm:$0xff] }
   0x5   :  { %370 = vmatpush.bf16.msra.mxu3 %v578_v3  ;;  %v551_v12 = vld [vmem:[%s729_s1 + $0x20] sm:$0xff]  ;;  %v550_v16 = vld [vmem:[%s729_s1 + $0x18] sm:$0xff]  ;;  %v549_v20 = vld [vmem:[%s729_s1 + $0x10] sm:$0xff] }
   0x6   :  { %332 = vmatpush.bf16.msra.mxu0 %v553_v4  ;;  %v567_v13 = vld [vmem:[%s729_s1 + $0xa0] sm:$0xff]  ;;  %v566_v17 = vld [vmem:[%s729_s1 + $0x98] sm:$0xff]  ;;  %v565_v21 = vld [vmem:[%s729_s1 + $0x90] sm:$0xff] }
   0x7   :  { %358 = vmatpush.bf16.msra.mxu2 %v569_v5  ;;  %v559_v14 = vld [vmem:[%s729_s1 + $0x60] sm:$0xff]  ;;  %v558_v18 = vld [vmem:[%s729_s1 + $0x58] sm:$0xff]  ;;  %v557_v22 = vld [vmem:[%s729_s1 + $0x50] sm:$0xff] }
   0x8   :  { %345 = vmatpush.bf16.msra.mxu1 %v561_v6  ;;  %v575_v15 = vld [vmem:[%s729_s1 + $0xe0] sm:$0xff]  ;;  %v574_v19 = vld [vmem:[%s729_s1 + $0xd8] sm:$0xff]  ;;  %v573_v23 = vld [vmem:[%s729_s1 + $0xd0] sm:$0xff] }
   0x9   :  { %371 = vmatpush.bf16.msra.mxu3 %v577_v7  ;;  %v548_v24 = vld [vmem:[%s729_s1 + $0x8] sm:$0xff]  ;;  %v15_v26 = vld [vmem:[%s731_s0] sm:$0xff]  ;;  %v582_v38 = vld [vmem:[%s729_s1 + $0x118] sm:$0xff] }
   0xa   :  { %333 = vmatpush.bf16.msra.mxu0 %v552_v8  ;;  %v564_v25 = vld [vmem:[%s729_s1 + $0x88] sm:$0xff]  ;;  %v97_v30 = vunpack.c.l.b16 %v15_v26  ;;  %v547_v32 = vld [vmem:[%s729_s1] sm:$0xff]  ;;  %v98_v34 = vunpack.c.h.b16 %v15_v26  ;;  %v581_v43 = vld [vmem:[%s729_s1 + $0x110] sm:$0xff] }
   0xb   :  { %359 = vmatpush.bf16.msra.mxu2 %v568_v9  ;;  %v16_v27 = vld [vmem:[%s731_s0 + $0x8] sm:$0xff]  ;;  %v563_v33 = vld [vmem:[%s729_s1 + $0x80] sm:$0xff]  ;;  %v17_v45 = vld [vmem:[%s731_s0 + $0x10] sm:$0xf] }
   0xc   :  { %346 = vmatpush.bf16.msra.mxu1 %v560_v10  ;;  %v556_v28 = vld [vmem:[%s729_s1 + $0x48] sm:$0xff]  ;;  %v99_v31 = vunpack.c.l.b16 %v16_v27  ;;  %v100_v35 = vunpack.c.h.b16 %v16_v27  ;;  %v555_v36 = vld [vmem:[%s729_s1 + $0x40] sm:$0xff]  ;;  %v102_v39 = vpack.c.b16 %v97_v30, %v97_v30  ;;  %v103_v41 = vpack.c.b16 %v98_v34, %v98_v34 }
   0xd   :  { %372 = vmatpush.bf16.msra.mxu3 %v576_v11  ;;  %v572_v29 = vld [vmem:[%s729_s1 + $0xc8] sm:$0xff]  ;;  %v571_v37 = vld [vmem:[%s729_s1 + $0xc0] sm:$0xff]  ;;  %v101_v47 = vunpack.c.l.b16 %v17_v45 }
   0xe   :  { %334 = vmatpush.bf16.msra.mxu0 %v551_v12  ;;  %v104_v40 = vpack.c.b16 %v99_v31, %v99_v31  ;;  %v105_v42 = vpack.c.b16 %v100_v35, %v100_v35  ;;  %v580_v44 = vld [vmem:[%s729_s1 + $0x108] sm:$0xff]  ;;  %v579_v46 = vld [vmem:[%s729_s1 + $0x100] sm:$0xff] }
   0xf   :  { %360 = vmatpush.bf16.msra.mxu2 %v567_v13  ;;  %v106_v48 = vpack.c.b16 %v101_v47, %v101_v47  ;;  %v583_v50 = vld [vmem:[%s730_s2] ss:$0 sm:$0xff] }
  0x10   :  { %347 = vmatpush.bf16.msra.mxu1 %v559_v14 }
  0x11   :  { %373 = vmatpush.bf16.msra.mxu3 %v575_v15 }
  0x12   :  { %335 = vmatpush.bf16.msra.mxu0 %v550_v16 }
  0x13   :  { %361 = vmatpush.bf16.msra.mxu2 %v566_v17 }
  0x14   :  { %348 = vmatpush.bf16.msra.mxu1 %v558_v18 }
  0x15   :  { %374 = vmatpush.bf16.msra.mxu3 %v574_v19 }
  0x16   :  { %336 = vmatpush.bf16.msra.mxu0 %v549_v20 }
  0x17   :  { %362 = vmatpush.bf16.msra.mxu2 %v565_v21 }
  0x18   :  { %349 = vmatpush.bf16.msra.mxu1 %v557_v22 }
  0x19   :  { %375 = vmatpush.bf16.msra.mxu3 %v573_v23 }
  0x1a   :  { %337 = vmatpush.bf16.msra.mxu0 %v548_v24 }
  0x1b   :  { %363 = vmatpush.bf16.msra.mxu2 %v564_v25 }
  0x1c   :  { %350 = vmatpush.bf16.msra.mxu1 %v556_v28 }
  0x1d   :  { %376 = vmatpush.bf16.msra.mxu3 %v572_v29 }
  0x1e   :  { %338 = vmatpush.bf16.msra.mxu0 %v547_v32 }
  0x1f   :  { %364 = vmatpush.bf16.msra.mxu2 %v563_v33 }
  0x20   :  { %351 = vmatpush.bf16.msra.mxu1 %v555_v36 }
  0x21   :  { %377 = vmatpush.bf16.msra.mxu3 %v571_v37  ;;  %339 = vmatmul.bf16.vlgmr.msra.gmra.mxu0 %v102_v39 }
  0x22   :  { %387 = vmatpush.bf16.msrb.mxu0 %v582_v38  ;;  %365 = vmatmul.bf16.vlgmr.msra.gmra.mxu2 %v104_v40 }
  0x23   :  { %352 = vmatmul.bf16.vlgmr.msra.gmra.mxu1 %v103_v41 }
  0x24   :  { %378 = vmatmul.bf16.vlgmr.msra.gmra.mxu3 %v105_v42 }
  0x26   :  { %388 = vmatpush.bf16.msrb.mxu0 %v581_v43 }
  0x2a   :  { %389 = vmatpush.bf16.msrb.mxu0 %v580_v44 }
  0x2e   :  { %390 = vmatpush.bf16.msrb.mxu0 %v579_v46 }
  0x31   :  { %546 = vmatmul.msk.bf16.vlgmr.msrb.gmra.mxu0 %vm327_vm0, %v106_v48 }
  0x9e   :  { %v340_v49 = vpop.f32.mrf.mxu0 }
  0x9f   :  { %v341_v52 = vadd.f32 %v583_v50, %v340_v49 }
  0xa0   :  { %v353_v51 = vpop.f32.mrf.mxu1 }
  0xa1   :  { %v354_v56 = vadd.f32 %v353_v51, %v341_v52 }
  0xa5   :  { %v366_v53 = vpop.f32.mrf.mxu2 }
  0xa6   :  { %v342_v55 = vpop.f32.mrf.mxu0  ;;  %v367_v58 = vadd.f32 %v366_v53, %v354_v56 }
  0xa7   :  { %v379_v54 = vpop.f32.mrf.mxu3 }
  0xa8   :  { %v355_v57 = vpop.f32.mrf.mxu1  ;;  %v380_v60 = vadd.f32 %v379_v54, %v367_v58 }
  0xad   :  { %v368_v59 = vpop.f32.mrf.mxu2 }
  0xae   :  { %v392_v62 = vpop.f32.mrf.mxu0 }
  0xaf   :  { %v381_v61 = vpop.f32.mrf.mxu3  ;;  %v393_v63 = vadd.f32 %v392_v62, %v380_v60 }
  0xb1   :  { %v396_v0 = vmax.f32 %v393_v63, 0.0 }
  0xb3   :  { %397 = vst.msk [vmem:[%s732_s3] sm:$0xff] %vm327_vm0, %v396_v0 }
  0xb6   :  { %v394_v1 = vpop.f32.mrf.mxu0 }

// kernel: model_forward.34
= control target key start
LH: loop header
LB: loop body
LE: loop exit
PB: predicated region body
PF: predicated region fallthrough
CT: control target
= control target key end

     0   :  { %vm113_vm0 = vcmask 261120   ;;  %vm363_vm1 = vcmask 523264   ;;  %s800_s1 = inlined_call_operand.vmem [shape: bf16[576,64], index: 1, kind: input, shape index: {}]   ;;  %s801_s3 = inlined_call_operand.vmem [shape: bf16[32,64], index: 3, kind: input, shape index: {}]   ;;  %s802_s2 = inlined_call_operand.vmem [shape: bf16[8,32], index: 2, kind: input, shape index: {}]   ;;  %s803_s0 = inlined_call_operand.vmem [shape: bf16[8,576], index: 0, kind: input, shape index: {}]   ;;  %s804_s4 = inlined_call_operand.vmem [shape: f32[1,64], index: 4, kind: input, shape index: {}]   ;;  %s805_s5 = inlined_call_operand.vmem [shape: f32[8,64], index: 5, kind: output, shape index: {}]  }
   0x1   :  { %v604_v0 = vld [vmem:[%s800_s1 + $0x38] sm:$0xff]  ;;  %v634_v3 = vld [vmem:[%s801_s3 + $0x8] sm:$0xff]  ;;  %v603_v4 = vld [vmem:[%s800_s1 + $0x30] sm:$0xff] }
   0x2   :  { %v612_v1 = vld [vmem:[%s800_s1 + $0x78] sm:$0xff]  ;;  %367 = vmatpush.bf16.msra.mxu1 %v604_v0  ;;  %v611_v5 = vld [vmem:[%s800_s1 + $0x70] sm:$0xff]  ;;  %123 = vmatpush.bf16.msra.mxu0 %v634_v3  ;;  %v633_v7 = vld [vmem:[%s801_s3] sm:$0xff] }
   0x3   :  { %v620_v2 = vld [vmem:[%s800_s1 + $0xb8] sm:$0xff]  ;;  %380 = vmatpush.bf16.msra.mxu2 %v612_v1  ;;  %v619_v6 = vld [vmem:[%s800_s1 + $0xb0] sm:$0xff]  ;;  %v602_v9 = vld [vmem:[%s800_s1 + $0x28] sm:$0xff] }
   0x4   :  { %393 = vmatpush.bf16.msra.mxu3 %v620_v2  ;;  %v628_v8 = vld [vmem:[%s800_s1 + $0xf8] sm:$0xff]  ;;  %v610_v10 = vld [vmem:[%s800_s1 + $0x68] sm:$0xff]  ;;  %v627_v12 = vld [vmem:[%s800_s1 + $0xf0] sm:$0xff] }
   0x5   :  { %v618_v11 = vld [vmem:[%s800_s1 + $0xa8] sm:$0xff]  ;;  %v96_v13 = vld [vmem:[%s802_s2] sm:$0xf]  ;;  %v600_v18 = vld [vmem:[%s800_s1 + $0x18] sm:$0xff] }
   0x6   :  { %368 = vmatpush.bf16.msra.mxu1 %v603_v4  ;;  %124 = vmatpush.bf16.msra.mxu0 %v633_v7  ;;  %v601_v14 = vld [vmem:[%s800_s1 + $0x20] sm:$0xff]  ;;  %v626_v17 = vld [vmem:[%s800_s1 + $0xe8] sm:$0xff]  ;;  %v608_v19 = vld [vmem:[%s800_s1 + $0x58] sm:$0xff] }
   0x7   :  { %381 = vmatpush.bf16.msra.mxu2 %v611_v5  ;;  %v609_v15 = vld [vmem:[%s800_s1 + $0x60] sm:$0xff]  ;;  %v616_v20 = vld [vmem:[%s800_s1 + $0x98] sm:$0xff]  ;;  %v599_v22 = vld [vmem:[%s800_s1 + $0x10] sm:$0xff] }
   0x8   :  { %394 = vmatpush.bf16.msra.mxu3 %v619_v6  ;;  %v617_v16 = vld [vmem:[%s800_s1 + $0xa0] sm:$0xff]  ;;  %v607_v23 = vld [vmem:[%s800_s1 + $0x50] sm:$0xff]  ;;  %v624_v25 = vld [vmem:[%s800_s1 + $0xd8] sm:$0xff] }
   0x9   :  { %451 = vmatmul.msk.bf16.vlgmr.msra.gmra.mxu0 %vm113_vm0, %v96_v13  ;;  %v625_v21 = vld [vmem:[%s800_s1 + $0xe0] sm:$0xff]  ;;  %v615_v24 = vld [vmem:[%s800_s1 + $0x90] sm:$0xff]  ;;  %v598_v26 = vld [vmem:[%s800_s1 + $0x8] sm:$0xff] }
   0xa   :  { %406 = vmatpush.bf16.msrb.mxu0 %v628_v8  ;;  %369 = vmatpush.bf16.msra.mxu1 %v602_v9  ;;  %v606_v27 = vld [vmem:[%s800_s1 + $0x48] sm:$0xff]  ;;  %v21_v28 = vld [vmem:[%s803_s0] sm:$0xff]  ;;  %v623_v31 = vld [vmem:[%s800_s1 + $0xd0] sm:$0xff] }
   0xb   :  { %382 = vmatpush.bf16.msra.mxu2 %v610_v10  ;;  %v614_v29 = vld [vmem:[%s800_s1 + $0x88] sm:$0xff]  ;;  %v133_v32 = vunpack.c.l.b16 %v21_v28  ;;  %v134_v33 = vunpack.c.h.b16 %v21_v28  ;;  %v597_v34 = vld [vmem:[%s800_s1] sm:$0xff]  ;;  %v632_v38 = vld [vmem:[%s800_s1 + $0x118] sm:$0xff] }
   0xc   :  { %395 = vmatpush.bf16.msra.mxu3 %v618_v11  ;;  %v22_v30 = vld [vmem:[%s803_s0 + $0x8] sm:$0xff]  ;;  %v605_v35 = vld [vmem:[%s800_s1 + $0x40] sm:$0xff]  ;;  %v631_v44 = vld [vmem:[%s800_s1 + $0x110] sm:$0xff] }
   0xd   :  { %v135_v36 = vunpack.c.l.b16 %v22_v30  ;;  %v613_v37 = vld [vmem:[%s800_s1 + $0x80] sm:$0xff]  ;;  %v622_v39 = vld [vmem:[%s800_s1 + $0xc8] sm:$0xff]  ;;  %v138_v40 = vpack.c.b16 %v133_v32, %v133_v32  ;;  %v139_v41 = vpack.c.b16 %v134_v33, %v134_v33  ;;  %v136_v43 = vunpack.c.h.b16 %v22_v30  ;;  %v23_v48 = vld [vmem:[%s803_s0 + $0x10] sm:$0xf] }
   0xe   :  { %407 = vmatpush.bf16.msrb.mxu0 %v627_v12  ;;  %370 = vmatpush.bf16.msra.mxu1 %v601_v14  ;;  %v621_v45 = vld [vmem:[%s800_s1 + $0xc0] sm:$0xff]  ;;  %v630_v47 = vld [vmem:[%s800_s1 + $0x108] sm:$0xff]  ;;  %v137_v50 = vunpack.c.l.b16 %v23_v48 }
   0xf   :  { %383 = vmatpush.bf16.msra.mxu2 %v609_v15  ;;  %v140_v42 = vpack.c.b16 %v135_v36, %v135_v36  ;;  %v141_v46 = vpack.c.b16 %v136_v43, %v136_v43  ;;  %v629_v49 = vld [vmem:[%s800_s1 + $0x100] sm:$0xff] }
  0x10   :  { %396 = vmatpush.bf16.msra.mxu3 %v617_v16  ;;  %v142_v51 = vpack.c.b16 %v137_v50, %v137_v50  ;;  %v635_v2 = vld [vmem:[%s804_s4] ss:$0 sm:$0xff] }
  0x12   :  { %408 = vmatpush.bf16.msrb.mxu0 %v626_v17  ;;  %371 = vmatpush.bf16.msra.mxu1 %v600_v18 }
  0x13   :  { %384 = vmatpush.bf16.msra.mxu2 %v608_v19 }
  0x14   :  { %397 = vmatpush.bf16.msra.mxu3 %v616_v20 }
  0x16   :  { %409 = vmatpush.bf16.msrb.mxu0 %v625_v21  ;;  %372 = vmatpush.bf16.msra.mxu1 %v599_v22 }
  0x17   :  { %385 = vmatpush.bf16.msra.mxu2 %v607_v23 }
  0x18   :  { %398 = vmatpush.bf16.msra.mxu3 %v615_v24 }
  0x1a   :  { %410 = vmatpush.bf16.msrb.mxu0 %v624_v25  ;;  %373 = vmatpush.bf16.msra.mxu1 %v598_v26 }
  0x1b   :  { %386 = vmatpush.bf16.msra.mxu2 %v606_v27 }
  0x1c   :  { %399 = vmatpush.bf16.msra.mxu3 %v614_v29 }
  0x1e   :  { %411 = vmatpush.bf16.msrb.mxu0 %v623_v31  ;;  %374 = vmatpush.bf16.msra.mxu1 %v597_v34 }
  0x1f   :  { %387 = vmatpush.bf16.msra.mxu2 %v605_v35 }
  0x20   :  { %400 = vmatpush.bf16.msra.mxu3 %v613_v37 }
  0x21   :  { %375 = vmatmul.bf16.vlgmr.msra.gmra.mxu1 %v138_v40 }
  0x22   :  { %423 = vmatpush.bf16.msrb.mxu1 %v632_v38  ;;  %412 = vmatpush.bf16.msrb.mxu0 %v622_v39 }
  0x23   :  { %388 = vmatmul.bf16.vlgmr.msra.gmra.mxu2 %v139_v41  ;;  %401 = vmatmul.bf16.vlgmr.msra.gmra.mxu3 %v140_v42 }
  0x26   :  { %424 = vmatpush.bf16.msrb.mxu1 %v631_v44  ;;  %413 = vmatpush.bf16.msrb.mxu0 %v621_v45 }
  0x29   :  { %414 = vmatmul.bf16.vlgmr.msrb.gmra.mxu0 %v141_v46 }
  0x2a   :  { %425 = vmatpush.bf16.msrb.mxu1 %v630_v47 }
  0x2e   :  { %426 = vmatpush.bf16.msrb.mxu1 %v629_v49 }
  0x31   :  { %596 = vmatmul.msk.bf16.vlgmr.msrb.gmra.mxu1 %vm363_vm1, %v142_v51 }
  0x86   :  { %v126_v52 = vpop.f32.mrf.mxu0 }
  0x8e   :  { %v128_v53 = vpop.f32.mrf.mxu0 }
  0x9e   :  { %v376_v54 = vpop.f32.mrf.mxu1 }
  0x9f   :  { %v377_v55 = vadd.f32 %v376_v54, %v126_v52 }
  0xa6   :  { %v389_v56 = vpop.f32.mrf.mxu2  ;;  %v415_v57 = vpop.f32.mrf.mxu0 }
  0xa7   :  { %v390_v58 = vadd.f32 %v389_v56, %v377_v55  ;;  %v402_v59 = vpop.f32.mrf.mxu3  ;;  %v378_v60 = vpop.f32.mrf.mxu1 }
  0xa9   :  { %v403_v61 = vadd.f32 %v402_v59, %v390_v58 }
  0xab   :  { %v416_v0 = vadd.f32 %v415_v57, %v403_v61 }
  0xae   :  { %v391_v62 = vpop.f32.mrf.mxu2  ;;  %v417_v63 = vpop.f32.mrf.mxu0 }
  0xaf   :  { %v404_v1 = vpop.f32.mrf.mxu3  ;;  %v428_v3 = vpop.f32.mrf.mxu1 }
  0xb0   :  { %v429_v4 = vadd.f32 %v428_v3, %v416_v0 }
  0xb2   :  { %v436_v5 = vadd.f32 %v635_v2, %v429_v4 }
  0xb4   :  { %v437_v6 = vmax.f32 %v436_v5, 0.0 }
  0xb6   :  { %438 = vst.msk [vmem:[%s805_s5] sm:$0xff] %vm363_vm1, %v437_v6 }
  0xb7   :  { %v430_v7 = vpop.f32.mrf.mxu1 }

// kernel: model_forward.36
= control target key start
LH: loop header
LB: loop body
LE: loop exit
PB: predicated region body
PF: predicated region fallthrough
CT: control target
= control target key end

     0   :  { %vm330_vm0 = vcmask 523264   ;;  %s742_s1 = inlined_call_operand.vmem [shape: bf16[576,64], index: 1, kind: input, shape index: {}]   ;;  %s743_s2 = inlined_call_operand.vmem [shape: f32[1,64], index: 2, kind: input, shape index: {}]   ;;  %s744_s0 = inlined_call_operand.vmem [shape: bf16[8,576], index: 0, kind: input, shape index: {}]   ;;  %s745_s3 = inlined_call_operand.vmem [shape: f32[8,64], index: 3, kind: input, shape index: {}]   ;;  %s746_s4 = inlined_call_operand.vmem [shape: f32[8,64], index: 4, kind: output, shape index: {}]  }
   0x1   :  { %v559_v0 = vld [vmem:[%s742_s1 + $0x38] sm:$0xff]  ;;  %v558_v4 = vld [vmem:[%s742_s1 + $0x30] sm:$0xff]  ;;  %v557_v8 = vld [vmem:[%s742_s1 + $0x28] sm:$0xff] }
   0x2   :  { %v575_v1 = vld [vmem:[%s742_s1 + $0xb8] sm:$0xff]  ;;  %334 = vmatpush.bf16.msra.mxu0 %v559_v0  ;;  %v574_v5 = vld [vmem:[%s742_s1 + $0xb0] sm:$0xff]  ;;  %v573_v9 = vld [vmem:[%s742_s1 + $0xa8] sm:$0xff] }
   0x3   :  { %v583_v2 = vld [vmem:[%s742_s1 + $0xf8] sm:$0xff]  ;;  %360 = vmatpush.bf16.msra.mxu2 %v575_v1  ;;  %v582_v6 = vld [vmem:[%s742_s1 + $0xf0] sm:$0xff]  ;;  %v581_v10 = vld [vmem:[%s742_s1 + $0xe8] sm:$0xff] }
   0x4   :  { %v567_v3 = vld [vmem:[%s742_s1 + $0x78] sm:$0xff]  ;;  %373 = vmatpush.bf16.msra.mxu3 %v583_v2  ;;  %v566_v7 = vld [vmem:[%s742_s1 + $0x70] sm:$0xff]  ;;  %v565_v11 = vld [vmem:[%s742_s1 + $0x68] sm:$0xff] }
   0x5   :  { %347 = vmatpush.bf16.msra.mxu1 %v567_v3  ;;  %v556_v12 = vld [vmem:[%s742_s1 + $0x20] sm:$0xff]  ;;  %v555_v16 = vld [vmem:[%s742_s1 + $0x18] sm:$0xff]  ;;  %v554_v20 = vld [vmem:[%s742_s1 + $0x10] sm:$0xff] }
   0x6   :  { %335 = vmatpush.bf16.msra.mxu0 %v558_v4  ;;  %v572_v13 = vld [vmem:[%s742_s1 + $0xa0] sm:$0xff]  ;;  %v571_v17 = vld [vmem:[%s742_s1 + $0x98] sm:$0xff]  ;;  %v570_v21 = vld [vmem:[%s742_s1 + $0x90] sm:$0xff] }
   0x7   :  { %361 = vmatpush.bf16.msra.mxu2 %v574_v5  ;;  %v580_v14 = vld [vmem:[%s742_s1 + $0xe0] sm:$0xff]  ;;  %v579_v18 = vld [vmem:[%s742_s1 + $0xd8] sm:$0xff]  ;;  %v578_v22 = vld [vmem:[%s742_s1 + $0xd0] sm:$0xff] }
   0x8   :  { %374 = vmatpush.bf16.msra.mxu3 %v582_v6  ;;  %v564_v15 = vld [vmem:[%s742_s1 + $0x60] sm:$0xff]  ;;  %v563_v19 = vld [vmem:[%s742_s1 + $0x58] sm:$0xff]  ;;  %v562_v23 = vld [vmem:[%s742_s1 + $0x50] sm:$0xff] }
   0x9   :  { %348 = vmatpush.bf16.msra.mxu1 %v566_v7  ;;  %v553_v24 = vld [vmem:[%s742_s1 + $0x8] sm:$0xff]  ;;  %v18_v26 = vld [vmem:[%s744_s0] sm:$0xff]  ;;  %v587_v38 = vld [vmem:[%s742_s1 + $0x118] sm:$0xff] }
   0xa   :  { %336 = vmatpush.bf16.msra.mxu0 %v557_v8  ;;  %v569_v25 = vld [vmem:[%s742_s1 + $0x88] sm:$0xff]  ;;  %v100_v30 = vunpack.c.l.b16 %v18_v26  ;;  %v552_v32 = vld [vmem:[%s742_s1] sm:$0xff]  ;;  %v101_v35 = vunpack.c.h.b16 %v18_v26  ;;  %v586_v43 = vld [vmem:[%s742_s1 + $0x110] sm:$0xff] }
   0xb   :  { %362 = vmatpush.bf16.msra.mxu2 %v573_v9  ;;  %v19_v27 = vld [vmem:[%s744_s0 + $0x8] sm:$0xff]  ;;  %v568_v33 = vld [vmem:[%s742_s1 + $0x80] sm:$0xff]  ;;  %v20_v45 = vld [vmem:[%s744_s0 + $0x10] sm:$0xf] }
   0xc   :  { %375 = vmatpush.bf16.msra.mxu3 %v581_v10  ;;  %v577_v28 = vld [vmem:[%s742_s1 + $0xc8] sm:$0xff]  ;;  %v102_v31 = vunpack.c.l.b16 %v19_v27  ;;  %v103_v34 = vunpack.c.h.b16 %v19_v27  ;;  %v576_v36 = vld [vmem:[%s742_s1 + $0xc0] sm:$0xff]  ;;  %v105_v39 = vpack.c.b16 %v100_v30, %v100_v30  ;;  %v106_v42 = vpack.c.b16 %v101_v35, %v101_v35 }
   0xd   :  { %349 = vmatpush.bf16.msra.mxu1 %v565_v11  ;;  %v561_v29 = vld [vmem:[%s742_s1 + $0x48] sm:$0xff]  ;;  %v560_v37 = vld [vmem:[%s742_s1 + $0x40] sm:$0xff]  ;;  %v104_v47 = vunpack.c.l.b16 %v20_v45 }
   0xe   :  { %337 = vmatpush.bf16.msra.mxu0 %v556_v12  ;;  %v107_v40 = vpack.c.b16 %v102_v31, %v102_v31  ;;  %v108_v41 = vpack.c.b16 %v103_v34, %v103_v34  ;;  %v585_v44 = vld [vmem:[%s742_s1 + $0x108] sm:$0xff]  ;;  %v584_v46 = vld [vmem:[%s742_s1 + $0x100] sm:$0xff] }
   0xf   :  { %363 = vmatpush.bf16.msra.mxu2 %v572_v13  ;;  %v109_v48 = vpack.c.b16 %v104_v47, %v104_v47  ;;  %v588_v50 = vld [vmem:[%s743_s2] ss:$0 sm:$0xff] }
  0x10   :  { %376 = vmatpush.bf16.msra.mxu3 %v580_v14  ;;  %v399_v63 = vld [vmem:[%s745_s3] sm:$0xff] }
  0x11   :  { %350 = vmatpush.bf16.msra.mxu1 %v564_v15 }
  0x12   :  { %338 = vmatpush.bf16.msra.mxu0 %v555_v16 }
  0x13   :  { %364 = vmatpush.bf16.msra.mxu2 %v571_v17 }
  0x14   :  { %377 = vmatpush.bf16.msra.mxu3 %v579_v18 }
  0x15   :  { %351 = vmatpush.bf16.msra.mxu1 %v563_v19 }
  0x16   :  { %339 = vmatpush.bf16.msra.mxu0 %v554_v20 }
  0x17   :  { %365 = vmatpush.bf16.msra.mxu2 %v570_v21 }
  0x18   :  { %378 = vmatpush.bf16.msra.mxu3 %v578_v22 }
  0x19   :  { %352 = vmatpush.bf16.msra.mxu1 %v562_v23 }
  0x1a   :  { %340 = vmatpush.bf16.msra.mxu0 %v553_v24 }
  0x1b   :  { %366 = vmatpush.bf16.msra.mxu2 %v569_v25 }
  0x1c   :  { %379 = vmatpush.bf16.msra.mxu3 %v577_v28 }
  0x1d   :  { %353 = vmatpush.bf16.msra.mxu1 %v561_v29 }
  0x1e   :  { %341 = vmatpush.bf16.msra.mxu0 %v552_v32 }
  0x1f   :  { %367 = vmatpush.bf16.msra.mxu2 %v568_v33 }
  0x20   :  { %380 = vmatpush.bf16.msra.mxu3 %v576_v36 }
  0x21   :  { %354 = vmatpush.bf16.msra.mxu1 %v560_v37  ;;  %342 = vmatmul.bf16.vlgmr.msra.gmra.mxu0 %v105_v39 }
  0x22   :  { %390 = vmatpush.bf16.msrb.mxu0 %v587_v38  ;;  %368 = vmatmul.bf16.vlgmr.msra.gmra.mxu2 %v107_v40 }
  0x23   :  { %381 = vmatmul.bf16.vlgmr.msra.gmra.mxu3 %v108_v41 }
  0x24   :  { %355 = vmatmul.bf16.vlgmr.msra.gmra.mxu1 %v106_v42 }
  0x26   :  { %391 = vmatpush.bf16.msrb.mxu0 %v586_v43 }
  0x2a   :  { %392 = vmatpush.bf16.msrb.mxu0 %v585_v44 }
  0x2e   :  { %393 = vmatpush.bf16.msrb.mxu0 %v584_v46 }
  0x31   :  { %551 = vmatmul.msk.bf16.vlgmr.msrb.gmra.mxu0 %vm330_vm0, %v109_v48 }
  0x9e   :  { %v343_v49 = vpop.f32.mrf.mxu0 }
  0x9f   :  { %v344_v52 = vadd.f32 %v588_v50, %v343_v49 }
  0xa1   :  { %v356_v51 = vpop.f32.mrf.mxu1 }
  0xa2   :  { %v357_v56 = vadd.f32 %v356_v51, %v344_v52 }
  0xa5   :  { %v369_v53 = vpop.f32.mrf.mxu2 }
  0xa6   :  { %v382_v54 = vpop.f32.mrf.mxu3  ;;  %v345_v55 = vpop.f32.mrf.mxu0  ;;  %v370_v58 = vadd.f32 %v369_v53, %v357_v56 }
  0xa8   :  { %v383_v60 = vadd.f32 %v382_v54, %v370_v58 }
  0xa9   :  { %v358_v57 = vpop.f32.mrf.mxu1 }
  0xad   :  { %v371_v59 = vpop.f32.mrf.mxu2 }
  0xae   :  { %v384_v61 = vpop.f32.mrf.mxu3  ;;  %v395_v62 = vpop.f32.mrf.mxu0 }
  0xaf   :  { %v396_v0 = vadd.f32 %v395_v62, %v383_v60 }
  0xb1   :  { %v400_v1 = vadd.f32 %v399_v63, %v396_v0 }
  0xb3   :  { %v401_v2 = vmax.f32 %v400_v1, 0.0 }
  0xb5   :  { %402 = vst.msk [vmem:[%s746_s4] sm:$0xff] %vm330_vm0, %v401_v2 }
  0xb6   :  { %v397_v3 = vpop.f32.mrf.mxu0 }

// kernel: model_forward.37
= control target key start
LH: loop header
LB: loop body
LE: loop exit
PB: predicated region body
PF: predicated region fallthrough
CT: control target
= control target key end

     0   :  { %vm66_vm0 = vcmask 523264   ;;  %vm89_vm1 = vcmask 490496   ;;  %s171_s1 = inlined_call_operand.vmem [shape: f32[64,60], index: 1, kind: input, shape index: {}]   ;;  %s172_s0 = inlined_call_operand.vmem [shape: f32[8,1,64], index: 0, kind: input, shape index: {}]   ;;  %s173_s2 = inlined_call_operand.vmem [shape: f32[1,60], index: 2, kind: input, shape index: {}]   ;;  %s174_s3 = inlined_call_operand.vmem [shape: f32[8,60], index: 3, kind: output, shape index: {}]  }
   0x1   :  { %v37_v0 = vld [vmem:[%s171_s1 + $0x38] sm:$0xff]  ;;  %v36_v1 = vld [vmem:[%s171_s1 + $0x30] sm:$0xff]  ;;  %v35_v2 = vld [vmem:[%s171_s1 + $0x28] sm:$0xff] }
   0x2   :  { %77 = vmatpush.msra.mxu0 %v37_v0  ;;  %v14_v3 = vld [vmem:[%s172_s0] sm:$0x1]  ;;  %v15_v4 = vld [vmem:[%s172_s0 + $0x1] sm:$0x1]  ;;  %v16_v6 = vld [vmem:[%s172_s0 + $0x2] sm:$0x1] }
   0x3   :  { %v34_v5 = vld [vmem:[%s171_s1 + $0x20] sm:$0xff]  ;;  %50 = vst [vmem:[#allocation1] ss:$9 sm:$0xff] %v14_v3  ;;  %v33_v8 = vld [vmem:[%s171_s1 + $0x18] sm:$0xff]  ;;  %v32_v11 = vld [vmem:[%s171_s1 + $0x10] sm:$0xff] }
   0x4   :  { %78 = vmatpush.msra.mxu0 %v36_v1  ;;  %v17_v7 = vld [vmem:[%s172_s0 + $0x3] sm:$0x1]  ;;  %v18_v9 = vld [vmem:[%s172_s0 + $0x4] sm:$0x1]  ;;  %52 = vst [vmem:[#allocation1 + $0x1] ss:$9 sm:$0xff] %v15_v4 }
   0x5   :  { %v19_v10 = vld [vmem:[%s172_s0 + $0x5] sm:$0x1]  ;;  %54 = vst [vmem:[#allocation1 + $0x2] ss:$9 sm:$0xff] %v16_v6  ;;  %v20_v12 = vld [vmem:[%s172_s0 + $0x6] sm:$0x1] }
   0x6   :  { %79 = vmatpush.msra.mxu0 %v35_v2  ;;  %56 = vst [vmem:[#allocation1 + $0x3] ss:$9 sm:$0xff] %v17_v7  ;;  %v21_v13 = vld [vmem:[%s172_s0 + $0x7] sm:$0x1]  ;;  %v31_v14 = vld [vmem:[%s171_s1 + $0x8] sm:$0xff] }
   0x7   :  { %58 = vst [vmem:[#allocation1 + $0x4] ss:$9 sm:$0xff] %v18_v9  ;;  %v30_v15 = vld [vmem:[%s171_s1] sm:$0xff] }
   0x8   :  { %80 = vmatpush.msra.mxu0 %v34_v5  ;;  %60 = vst [vmem:[#allocation1 + $0x5] ss:$9 sm:$0xff] %v19_v10  ;;  %v96_v17 = vld [vmem:[%s173_s2] ss:$0 sm:$0xff] }
   0x9   :  { %62 = vst [vmem:[#allocation1 + $0x6] ss:$9 sm:$0xff] %v20_v12 }
   0xa   :  { %81 = vmatpush.msra.mxu0 %v33_v8  ;;  %64 = vst [vmem:[#allocation1 + $0x7] ss:$9 sm:$0xff] %v21_v13 }
   0xc   :  { %82 = vmatpush.msra.mxu0 %v32_v11 }
   0xe   :  { %83 = vmatpush.msra.mxu0 %v31_v14 }
  0x10   :  { %84 = vmatpush.msra.mxu0 %v30_v15 }
  0x11   :  { %v65_v16 = vld [vmem:[#allocation1] sm:$0xff] }
  0x12   :  { %95 = vmatmul.msk.f32.vlgmr.msra.gmra.mxu0 %vm66_vm0, %v65_v16 }
  0x8f   :  { %v86_v18 = vpop.f32.mrf.mxu0 }
  0x90   :  { %v87_v19 = vadd.f32 %v96_v17, %v86_v18 }
  0x92   :  { %90 = vst.msk [vmem:[%s174_s3] sm:$0xff] %vm89_vm1, %v87_v19 }

</bundles_post_ra>
